<compile_context>
chip_gen: v7x
topology: tpu7x:2x2x1
jax: 0.10.0
libtpu: 0.0.40
codegen_flags: <defaults>
</compile_context>

<pallas_src>
import functools

import jax
import jax.numpy as jnp
from jax.experimental import pallas as pl
from jax.experimental.pallas import tpu as pltpu


def _round_up(n, m):
    return ((n + m - 1) // m) * m


def attention_lstm_kernel(
    x_ref,        # (T*Bp, D)    bf16 time-major input, batch padded to Bp
    w_ih0_ref,    # (D, 4Hp)     bf16 layer-0 input weights (gate-padded cols)
    w_hh0_ref,    # (Hp, 4Hp)    bf16 layer-0 hidden weights
    b0_ref,       # (1, 4Hp)     f32  b_ih0 + b_hh0
    w_ih1_ref,    # (Hp, 4Hp)    bf16 layer-1 input weights
    w_hh1_ref,    # (Hp, 4Hp)    bf16 layer-1 hidden weights
    b1_ref,       # (1, 4Hp)     f32  b_ih1 + b_hh1
    w_attn_ref,   # (1, Hp)      f32
    w_lin_ref,    # (Hp, OUTp)   bf16
    b_lin_ref,    # (1, OUTp)    f32
    out_ref,      # (Bp, OUTp)   f32
    xproj_ref,    # scratch (T*Bp, 4Hp) f32 -- hoisted layer-0 input projection
    *,
    unroll,
):
    Bp = out_ref.shape[0]
    Hp = w_hh0_ref.shape[0]
    T = x_ref.shape[0] // Bp

    # One tall bf16 MXU matmul for the layer-0 input projection of ALL
    # timesteps (M = T*Bp rows per weight push), fused layer-0 bias folded in.
    # Only the h-dependent dot remains on the serial recurrence.
    xproj_ref[...] = (
        jnp.dot(x_ref[...], w_ih0_ref[...], preferred_element_type=jnp.float32)
        + b0_ref[...])

    w_hh0 = w_hh0_ref[...]
    w_ih1 = w_ih1_ref[...]
    w_hh1 = w_hh1_ref[...]
    # Hoist broadcasts out of the recurrence (JAX does not CSE broadcast_in_dim).
    b1_full = jnp.broadcast_to(b1_ref[...], (Bp, 4 * Hp))
    w_a_full = jnp.broadcast_to(w_attn_ref[...], (Bp, Hp))

    def gates_to_hc(gates, c_prev):
        # Gate math strictly in f32 (no bf16 VPU/EUP on v5e). Hp is 128-aligned,
        # so each gate slice is whole vregs (no lane relayout).
        i = jax.nn.sigmoid(gates[:, 0 * Hp:1 * Hp])
        f = jax.nn.sigmoid(gates[:, 1 * Hp:2 * Hp])
        g = jnp.tanh(gates[:, 2 * Hp:3 * Hp])
        o = jax.nn.sigmoid(gates[:, 3 * Hp:4 * Hp])
        c_new = f * c_prev + i * g
        h_new = o * jnp.tanh(c_new)
        return h_new, c_new

    def step(t, carry):
        h0, c0, h1, c1, m, l, acc = carry
        row = pl.multiple_of(t * Bp, Bp)                  # sublane-aligned slice
        xp = xproj_ref[pl.ds(row, Bp), :]                 # (Bp, 4Hp) f32

        # Layer 0: only the hidden matmul is on the critical path (bf16 LHS/RHS,
        # f32 accumulate).
        g0 = xp + jnp.dot(h0.astype(jnp.bfloat16), w_hh0,
                          preferred_element_type=jnp.float32)
        h0n, c0n = gates_to_hc(g0, c0)

        # Layer 1: two accumulating bf16 dots -- no concat, so no (Bp, 2Hp)
        # VMEM copy / extra vst+vld inside every unrolled step.
        g1 = (jnp.dot(h0n.astype(jnp.bfloat16), w_ih1,
                      preferred_element_type=jnp.float32)
              + jnp.dot(h1.astype(jnp.bfloat16), w_hh1,
                        preferred_element_type=jnp.float32)
              + b1_full)
        h1n, c1n = gates_to_hc(g1, c1)

        # Online-softmax attention pooling over time: XLU lane-reduce for the
        # score (keeps it off the MXU), no (T, B, H) buffer, no second pass.
        score = jnp.sum(h1n * w_a_full, axis=-1, keepdims=True)   # (Bp, 1)
        m_new = jnp.maximum(m, score)
        alpha = jnp.exp(m - m_new)
        p = jnp.exp(score - m_new)
        l_new = alpha * l + p
        acc_new = alpha * acc + p * h1n
        return (h0n, c0n, h1n, c1n, m_new, l_new, acc_new)

    zeros_bh = jnp.zeros((Bp, Hp), jnp.float32)
    init = (zeros_bh, zeros_bh, zeros_bh, zeros_bh,
            jnp.full((Bp, 1), -jnp.inf, jnp.float32),
            jnp.zeros((Bp, 1), jnp.float32),
            zeros_bh)
    # Full unroll only for small T; partial unroll for long T bounds instruction
    # memory and vreg pressure while keeping LLO scheduling visibility.
    _, _, _, _, _, l, acc = jax.lax.fori_loop(0, T, step, init, unroll=unroll)

    # Reciprocal on the EUP slot (off the MXU/VPU path).
    context = acc * pl.reciprocal(l, approx=True)                  # (Bp, Hp)
    out_ref[...] = (
        jnp.dot(context.astype(jnp.bfloat16), w_lin_ref[...],
                preferred_element_type=jnp.float32)
        + b_lin_ref[...])


def _pad_gate_cols(w, H, Hp):
    """w: (K, 4H) with PyTorch gate order (i,f,g,o) -> (K, 4Hp), zero-padded per gate."""
    blocks = [w[:, g * H:(g + 1) * H] for g in range(4)]
    blocks = [jnp.pad(b, ((0, 0), (0, Hp - H))) for b in blocks]
    return jnp.concatenate(blocks, axis=1)


def _pad_gate_bias(b, H, Hp):
    blocks = [b[g * H:(g + 1) * H] for g in range(4)]
    blocks = [jnp.pad(v, (0, Hp - H)) for v in blocks]
    return jnp.concatenate(blocks).reshape(1, 4 * Hp)


def attention_lstm_forward(x, params):
    """x: (B, T, D) batch-first (as PyTorch). Returns (B, 100)."""
    B, T, D = x.shape
    H = params["w_hh0"].shape[1]
    OUT = params["w_lin"].shape[0]
    Hp = _round_up(H, 128)          # gate slices land on whole vregs
    Bp = _round_up(B, 16)           # bf16 vreg packs 16 sublane rows
    OUTp = _round_up(OUT, 128)      # lane-dense (unmasked) output stores

    # time-major, batch padded with zero rows, flattened to (T*Bp, D), bf16.
    x_p = jnp.pad(x.astype(jnp.float32), ((0, Bp - B), (0, 0), (0, 0)))
    x_tm = jnp.transpose(x_p, (1, 0, 2)).reshape(T * Bp, D).astype(jnp.bfloat16)

    # layer 0 (weights bf16 for the MXU; fused biases stay f32)
    w_ih0 = _pad_gate_cols(params["w_ih0"].T, H, Hp).astype(jnp.bfloat16)
    w_hh0 = _pad_gate_cols(
        jnp.pad(params["w_hh0"].T, ((0, Hp - H), (0, 0))), H, Hp).astype(jnp.bfloat16)
    b0 = _pad_gate_bias(params["b_ih0"] + params["b_hh0"], H, Hp)

    # layer 1 (kept as two separate weight matrices; the per-step dots accumulate)
    w_ih1 = _pad_gate_cols(
        jnp.pad(params["w_ih1"].T, ((0, Hp - H), (0, 0))), H, Hp).astype(jnp.bfloat16)
    w_hh1 = _pad_gate_cols(
        jnp.pad(params["w_hh1"].T, ((0, Hp - H), (0, 0))), H, Hp).astype(jnp.bfloat16)
    b1 = _pad_gate_bias(params["b_ih1"] + params["b_hh1"], H, Hp)

    w_attn = jnp.pad(params["w_attn"], ((0, 0), (0, Hp - H)))              # (1, Hp)
    # b_attn intentionally omitted: softmax over time is shift-invariant, so a
    # constant added to every timestep's score cancels exactly.

    w_lin = jnp.pad(params["w_lin"].T,
                    ((0, Hp - H), (0, OUTp - OUT))).astype(jnp.bfloat16)   # (Hp, OUTp)
    b_lin = jnp.pad(params["b_lin"], (0, OUTp - OUT)).reshape(1, OUTp)

    unroll = True if T <= 32 else 8

    # Explicit VMEM budget from the actual footprint (capped at 64 MiB for v7x).
    xproj_bytes = T * Bp * 4 * Hp * 4
    weight_bytes = 2 * (w_ih0.size + w_hh0.size + w_ih1.size + w_hh1.size + w_lin.size)
    small_bytes = 4 * (b0.size + b1.size + w_attn.size + b_lin.size)
    io_bytes = 2 * x_tm.size + 4 * Bp * OUTp
    vmem_limit = int(min(max(2 * (io_bytes + weight_bytes + small_bytes)
                             + xproj_bytes + (4 << 20), 16 << 20), 64 << 20))

    out_p = pl.pallas_call(
        functools.partial(attention_lstm_kernel, unroll=unroll),
        out_shape=jax.ShapeDtypeStruct((Bp, OUTp), jnp.float32),
        scratch_shapes=[
            pltpu.VMEM((T * Bp, 4 * Hp), jnp.float32),   # hoisted input projection
        ],
        compiler_params=pltpu.CompilerParams(vmem_limit_bytes=vmem_limit),
    )(x_tm, w_ih0, w_hh0, b0, w_ih1, w_hh1, b1, w_attn, w_lin, b_lin)

    return out_p[:B, :OUT]


def reference_forward(x, params):
    """Pure-JAX f32 reference mirroring torch.nn.LSTM(batch_first) + attention."""
    B, T, D = x.shape
    H = params["w_hh0"].shape[1]

    def cell(x_t, h, c, w_ih, w_hh, b_ih, b_hh):
        g = x_t @ w_ih.T + b_ih + h @ w_hh.T + b_hh
        i = jax.nn.sigmoid(g[:, 0 * H:1 * H])
        f = jax.nn.sigmoid(g[:, 1 * H:2 * H])
        gg = jnp.tanh(g[:, 2 * H:3 * H])
        o = jax.nn.sigmoid(g[:, 3 * H:4 * H])
        c = f * c + i * gg
        return o * jnp.tanh(c), c

    h0 = c0 = h1 = c1 = jnp.zeros((B, H), jnp.float32)
    outs = []
    for t in range(T):
        h0, c0 = cell(x[:, t], h0, c0, params["w_ih0"], params["w_hh0"],
                      params["b_ih0"], params["b_hh0"])
        h1, c1 = cell(h0, h1, c1, params["w_ih1"], params["w_hh1"],
                      params["b_ih1"], params["b_hh1"])
        outs.append(h1)
    outputs = jnp.stack(outs, axis=1)                             # (B, T, H)
    scores = outputs @ params["w_attn"].T + params["b_attn"]      # (B, T, 1)
    attn = jax.nn.softmax(scores, axis=1)
    context = jnp.einsum("btx,bth->bxh", attn, outputs)[:, 0, :]  # (B, H)
    return context @ params["w_lin"].T + params["b_lin"]


def make_params(key, input_dim, hidden_dim):
    H = hidden_dim
    ks = jax.random.split(key, 12)
    scale = 0.1
    return {
        "w_ih0": scale * jax.random.normal(ks[0], (4 * H, input_dim), jnp.float32),
        "w_hh0": scale * jax.random.normal(ks[1], (4 * H, H), jnp.float32),
        "b_ih0": scale * jax.random.normal(ks[2], (4 * H,), jnp.float32),
        "b_hh0": scale * jax.random.normal(ks[3], (4 * H,), jnp.float32),
        "w_ih1": scale * jax.random.normal(ks[4], (4 * H, H), jnp.float32),
        "w_hh1": scale * jax.random.normal(ks[5], (4 * H, H), jnp.float32),
        "b_ih1": scale * jax.random.normal(ks[6], (4 * H,), jnp.float32),
        "b_hh1": scale * jax.random.normal(ks[7], (4 * H,), jnp.float32),
        "w_attn": scale * jax.random.normal(ks[8], (1, H), jnp.float32),
        "b_attn": scale * jax.random.normal(ks[9], (1,), jnp.float32),
        "w_lin": scale * jax.random.normal(ks[10], (100, H), jnp.float32),
        "b_lin": scale * jax.random.normal(ks[11], (100,), jnp.float32),
    }


if __name__ == "__main__":
    B, T, INPUT_DIM, HIDDEN_DIM = 2, 8, 16, 32  # num_layers = 2

    key = jax.random.PRNGKey(0)
    kx, kp = jax.random.split(key)
    x = jax.random.normal(kx, (B, T, INPUT_DIM), jnp.float32)
    params = make_params(kp, INPUT_DIM, HIDDEN_DIM)

    out = attention_lstm_forward(x, params)
    out = jax.block_until_ready(out)

    ref = reference_forward(x, params)
    assert out.shape == (B, 100)
    # Tolerance loosened vs. the f32-only version: MXU operands are bf16 and the
    # softmax normalization uses the approximate EUP reciprocal.
    assert jnp.allclose(out, ref, atol=2e-2, rtol=2e-2), (
        f"max abs err {jnp.max(jnp.abs(out - ref))}")

    print("KERNEL_OK")
</pallas_src>

<mosaic_0001>
module attributes {stable_mosaic.version = 11 : i64} {
  func.func @attention_lstm_kernel(%arg0: memref<128x16xbf16, #tpu.memory_space<vmem>>, %arg1: memref<16x512xbf16, #tpu.memory_space<vmem>>, %arg2: memref<128x512xbf16, #tpu.memory_space<vmem>>, %arg3: memref<1x512xf32, #tpu.memory_space<vmem>>, %arg4: memref<128x512xbf16, #tpu.memory_space<vmem>>, %arg5: memref<128x512xbf16, #tpu.memory_space<vmem>>, %arg6: memref<1x512xf32, #tpu.memory_space<vmem>>, %arg7: memref<1x128xf32, #tpu.memory_space<vmem>>, %arg8: memref<128x128xbf16, #tpu.memory_space<vmem>>, %arg9: memref<1x128xf32, #tpu.memory_space<vmem>>, %arg10: memref<16x128xf32, #tpu.memory_space<vmem>>, %arg11: memref<128x512xf32, #tpu.memory_space<vmem>>) attributes {dimension_semantics = [], scalar_prefetch = 0 : i64, scratch_operands = 1 : i64, tpu.core_type = #tpu.core_type<tc>} {
    %c0 = arith.constant 0 : index
    %c0_0 = arith.constant 0 : index
    %0 = vector.load %arg0[%c0, %c0_0] : memref<128x16xbf16, #tpu.memory_space<vmem>>, vector<128x16xbf16>
    %c0_1 = arith.constant 0 : index
    %c0_2 = arith.constant 0 : index
    %1 = vector.load %arg1[%c0_1, %c0_2] : memref<16x512xbf16, #tpu.memory_space<vmem>>, vector<16x512xbf16>
    %cst = arith.constant dense<0.000000e+00> : vector<128x512xf32>
    %2 = tpu.matmul %0, %1, %cst {dimension_numbers = #tpu.dot_dimension_numbers<[1], [0], [0], [1], [0, 0, 1, 1], [], []>} : vector<128x16xbf16>, vector<16x512xbf16>, vector<128x512xf32> -> vector<128x512xf32>
    %c0_3 = arith.constant 0 : index
    %c0_4 = arith.constant 0 : index
    %3 = vector.load %arg3[%c0_3, %c0_4] : memref<1x512xf32, #tpu.memory_space<vmem>>, vector<1x512xf32>
    %4 = vector.broadcast %3 : vector<1x512xf32> to vector<128x512xf32>
    %5 = arith.addf %2, %4 : vector<128x512xf32>
    %c0_5 = arith.constant 0 : index
    %c0_6 = arith.constant 0 : index
    %6 = vector.load %arg11[%c0_5, %c0_6] : memref<128x512xf32, #tpu.memory_space<vmem>>, vector<128x512xf32>
    tpu.vector_store %arg11[%c0_5, %c0_6], %5 {strides = array<i32>} : memref<128x512xf32, #tpu.memory_space<vmem>>, vector<128x512xf32>,
    %c0_7 = arith.constant 0 : index
    %c0_8 = arith.constant 0 : index
    %7 = vector.load %arg2[%c0_7, %c0_8] : memref<128x512xbf16, #tpu.memory_space<vmem>>, vector<128x512xbf16>
    %c0_9 = arith.constant 0 : index
    %c0_10 = arith.constant 0 : index
    %8 = vector.load %arg4[%c0_9, %c0_10] : memref<128x512xbf16, #tpu.memory_space<vmem>>, vector<128x512xbf16>
    %c0_11 = arith.constant 0 : index
    %c0_12 = arith.constant 0 : index
    %9 = vector.load %arg5[%c0_11, %c0_12] : memref<128x512xbf16, #tpu.memory_space<vmem>>, vector<128x512xbf16>
    %c0_13 = arith.constant 0 : index
    %c0_14 = arith.constant 0 : index
    %10 = vector.load %arg6[%c0_13, %c0_14] : memref<1x512xf32, #tpu.memory_space<vmem>>, vector<1x512xf32>
    %11 = vector.shape_cast %10 : vector<1x512xf32> to vector<1x512xf32>
    %12 = vector.broadcast %11 : vector<1x512xf32> to vector<16x512xf32>
    %c0_15 = arith.constant 0 : index
    %c0_16 = arith.constant 0 : index
    %13 = vector.load %arg7[%c0_15, %c0_16] : memref<1x128xf32, #tpu.memory_space<vmem>>, vector<1x128xf32>
    %14 = vector.shape_cast %13 : vector<1x128xf32> to vector<1x128xf32>
    %15 = vector.broadcast %14 : vector<1x128xf32> to vector<16x128xf32>
    %cst_17 = arith.constant 0.000000e+00 : f32
    %16 = vector.broadcast %cst_17 : f32 to vector<16x128xf32>
    %cst_18 = arith.constant 0xFF800000 : f32
    %17 = vector.broadcast %cst_18 : f32 to vector<16x1xf32>
    %cst_19 = arith.constant 0.000000e+00 : f32
    %18 = vector.broadcast %cst_19 : f32 to vector<16x1xf32>
    %c0_i32 = arith.constant 0 : i32
    %c16_i32 = arith.constant 16 : i32
    %19 = arith.muli %c0_i32, %c16_i32 : i32
    %20 = tpu.assume_multiple %19, 16 : i32
    %21 = arith.index_cast %20 : i32 to index
    %c0_20 = arith.constant 0 : index
    %22 = vector.load %arg11[%21, %c0_20] : memref<128x512xf32, #tpu.memory_space<vmem>>, vector<16x512xf32>
    %23 = arith.truncf %16 : vector<16x128xf32> to vector<16x128xbf16>
    %cst_21 = arith.constant dense<0.000000e+00> : vector<16x512xf32>
    %24 = tpu.matmul %23, %7, %cst_21 {dimension_numbers = #tpu.dot_dimension_numbers<[1], [0], [0], [1], [0, 0, 1, 1], [], []>} : vector<16x128xbf16>, vector<128x512xbf16>, vector<16x512xf32> -> vector<16x512xf32>
    %25 = arith.addf %22, %24 : vector<16x512xf32>
    %26 = vector.extract_strided_slice %25 {offsets = [0, 0], sizes = [16, 128], strides = [1, 1]} : vector<16x512xf32> to vector<16x128xf32>
    %27 = arith.negf %26 : vector<16x128xf32>
    %28 = math.exp %27 : vector<16x128xf32>
    %cst_22 = arith.constant 1.000000e+00 : f32
    %29 = vector.broadcast %cst_22 : f32 to vector<16x128xf32>
    %30 = arith.addf %29, %28 : vector<16x128xf32>
    %31 = arith.divf %29, %30 : vector<16x128xf32>
    %32 = vector.extract_strided_slice %25 {offsets = [0, 128], sizes = [16, 128], strides = [1, 1]} : vector<16x512xf32> to vector<16x128xf32>
    %33 = arith.negf %32 : vector<16x128xf32>
    %34 = math.exp %33 : vector<16x128xf32>
    %cst_23 = arith.constant 1.000000e+00 : f32
    %35 = vector.broadcast %cst_23 : f32 to vector<16x128xf32>
    %36 = arith.addf %35, %34 : vector<16x128xf32>
    %37 = arith.divf %35, %36 : vector<16x128xf32>
    %38 = vector.extract_strided_slice %25 {offsets = [0, 256], sizes = [16, 128], strides = [1, 1]} : vector<16x512xf32> to vector<16x128xf32>
    %39 = math.tanh %38 : vector<16x128xf32>
    %40 = vector.extract_strided_slice %25 {offsets = [0, 384], sizes = [16, 128], strides = [1, 1]} : vector<16x512xf32> to vector<16x128xf32>
    %41 = arith.negf %40 : vector<16x128xf32>
    %42 = math.exp %41 : vector<16x128xf32>
    %cst_24 = arith.constant 1.000000e+00 : f32
    %43 = vector.broadcast %cst_24 : f32 to vector<16x128xf32>
    %44 = arith.addf %43, %42 : vector<16x128xf32>
    %45 = arith.divf %43, %44 : vector<16x128xf32>
    %46 = arith.mulf %37, %16 : vector<16x128xf32>
    %47 = arith.mulf %31, %39 : vector<16x128xf32>
    %48 = arith.addf %46, %47 : vector<16x128xf32>
    %49 = math.tanh %48 : vector<16x128xf32>
    %50 = arith.mulf %45, %49 : vector<16x128xf32>
    %51 = arith.truncf %50 : vector<16x128xf32> to vector<16x128xbf16>
    %cst_25 = arith.constant dense<0.000000e+00> : vector<16x512xf32>
    %52 = tpu.matmul %51, %8, %cst_25 {dimension_numbers = #tpu.dot_dimension_numbers<[1], [0], [0], [1], [0, 0, 1, 1], [], []>} : vector<16x128xbf16>, vector<128x512xbf16>, vector<16x512xf32> -> vector<16x512xf32>
    %53 = arith.truncf %16 : vector<16x128xf32> to vector<16x128xbf16>
    %cst_26 = arith.constant dense<0.000000e+00> : vector<16x512xf32>
    %54 = tpu.matmul %53, %9, %cst_26 {dimension_numbers = #tpu.dot_dimension_numbers<[1], [0], [0], [1], [0, 0, 1, 1], [], []>} : vector<16x128xbf16>, vector<128x512xbf16>, vector<16x512xf32> -> vector<16x512xf32>
    %55 = arith.addf %52, %54 : vector<16x512xf32>
    %56 = arith.addf %55, %12 : vector<16x512xf32>
    %57 = vector.extract_strided_slice %56 {offsets = [0, 0], sizes = [16, 128], strides = [1, 1]} : vector<16x512xf32> to vector<16x128xf32>
    %58 = arith.negf %57 : vector<16x128xf32>
    %59 = math.exp %58 : vector<16x128xf32>
    %cst_27 = arith.constant 1.000000e+00 : f32
    %60 = vector.broadcast %cst_27 : f32 to vector<16x128xf32>
    %61 = arith.addf %60, %59 : vector<16x128xf32>
    %62 = arith.divf %60, %61 : vector<16x128xf32>
    %63 = vector.extract_strided_slice %56 {offsets = [0, 128], sizes = [16, 128], strides = [1, 1]} : vector<16x512xf32> to vector<16x128xf32>
    %64 = arith.negf %63 : vector<16x128xf32>
    %65 = math.exp %64 : vector<16x128xf32>
    %cst_28 = arith.constant 1.000000e+00 : f32
    %66 = vector.broadcast %cst_28 : f32 to vector<16x128xf32>
    %67 = arith.addf %66, %65 : vector<16x128xf32>
    %68 = arith.divf %66, %67 : vector<16x128xf32>
    %69 = vector.extract_strided_slice %56 {offsets = [0, 256], sizes = [16, 128], strides = [1, 1]} : vector<16x512xf32> to vector<16x128xf32>
    %70 = math.tanh %69 : vector<16x128xf32>
    %71 = vector.extract_strided_slice %56 {offsets = [0, 384], sizes = [16, 128], strides = [1, 1]} : vector<16x512xf32> to vector<16x128xf32>
    %72 = arith.negf %71 : vector<16x128xf32>
    %73 = math.exp %72 : vector<16x128xf32>
    %cst_29 = arith.constant 1.000000e+00 : f32
    %74 = vector.broadcast %cst_29 : f32 to vector<16x128xf32>
    %75 = arith.addf %74, %73 : vector<16x128xf32>
    %76 = arith.divf %74, %75 : vector<16x128xf32>
    %77 = arith.mulf %68, %16 : vector<16x128xf32>
    %78 = arith.mulf %62, %70 : vector<16x128xf32>
    %79 = arith.addf %77, %78 : vector<16x128xf32>
    %80 = math.tanh %79 : vector<16x128xf32>
    %81 = arith.mulf %76, %80 : vector<16x128xf32>
    %82 = arith.mulf %81, %15 : vector<16x128xf32>
    %cst_30 = arith.constant dense<0.000000e+00> : vector<16xf32>
    %83 = vector.multi_reduction <add>, %82, %cst_30 [1] : vector<16x128xf32> to vector<16xf32>
    %84 = vector.shape_cast %83 : vector<16xf32> to vector<16x1xf32>
    %85 = arith.maximumf %17, %84 : vector<16x1xf32>
    %86 = arith.subf %17, %85 : vector<16x1xf32>
    %87 = math.exp %86 : vector<16x1xf32>
    %88 = arith.subf %84, %85 : vector<16x1xf32>
    %89 = math.exp %88 : vector<16x1xf32>
    %90 = arith.mulf %87, %18 : vector<16x1xf32>
    %91 = arith.addf %90, %89 : vector<16x1xf32>
    %92 = vector.broadcast %87 : vector<16x1xf32> to vector<16x128xf32>
    %93 = arith.mulf %92, %16 : vector<16x128xf32>
    %94 = vector.broadcast %89 : vector<16x1xf32> to vector<16x128xf32>
    %95 = arith.mulf %94, %81 : vector<16x128xf32>
    %96 = arith.addf %93, %95 : vector<16x128xf32>
    %c1_i32 = arith.constant 1 : i32
    %c16_i32_31 = arith.constant 16 : i32
    %97 = arith.muli %c1_i32, %c16_i32_31 : i32
    %98 = tpu.assume_multiple %97, 16 : i32
    %99 = arith.index_cast %98 : i32 to index
    %c0_32 = arith.constant 0 : index
    %100 = vector.load %arg11[%99, %c0_32] : memref<128x512xf32, #tpu.memory_space<vmem>>, vector<16x512xf32>
    %101 = arith.truncf %50 : vector<16x128xf32> to vector<16x128xbf16>
    %cst_33 = arith.constant dense<0.000000e+00> : vector<16x512xf32>
    %102 = tpu.matmul %101, %7, %cst_33 {dimension_numbers = #tpu.dot_dimension_numbers<[1], [0], [0], [1], [0, 0, 1, 1], [], []>} : vector<16x128xbf16>, vector<128x512xbf16>, vector<16x512xf32> -> vector<16x512xf32>
    %103 = arith.addf %100, %102 : vector<16x512xf32>
    %104 = vector.extract_strided_slice %103 {offsets = [0, 0], sizes = [16, 128], strides = [1, 1]} : vector<16x512xf32> to vector<16x128xf32>
    %105 = arith.negf %104 : vector<16x128xf32>
    %106 = math.exp %105 : vector<16x128xf32>
    %cst_34 = arith.constant 1.000000e+00 : f32
    %107 = vector.broadcast %cst_34 : f32 to vector<16x128xf32>
    %108 = arith.addf %107, %106 : vector<16x128xf32>
    %109 = arith.divf %107, %108 : vector<16x128xf32>
    %110 = vector.extract_strided_slice %103 {offsets = [0, 128], sizes = [16, 128], strides = [1, 1]} : vector<16x512xf32> to vector<16x128xf32>
    %111 = arith.negf %110 : vector<16x128xf32>
    %112 = math.exp %111 : vector<16x128xf32>
    %cst_35 = arith.constant 1.000000e+00 : f32
    %113 = vector.broadcast %cst_35 : f32 to vector<16x128xf32>
    %114 = arith.addf %113, %112 : vector<16x128xf32>
    %115 = arith.divf %113, %114 : vector<16x128xf32>
    %116 = vector.extract_strided_slice %103 {offsets = [0, 256], sizes = [16, 128], strides = [1, 1]} : vector<16x512xf32> to vector<16x128xf32>
    %117 = math.tanh %116 : vector<16x128xf32>
    %118 = vector.extract_strided_slice %103 {offsets = [0, 384], sizes = [16, 128], strides = [1, 1]} : vector<16x512xf32> to vector<16x128xf32>
    %119 = arith.negf %118 : vector<16x128xf32>
    %120 = math.exp %119 : vector<16x128xf32>
    %cst_36 = arith.constant 1.000000e+00 : f32
    %121 = vector.broadcast %cst_36 : f32 to vector<16x128xf32>
    %122 = arith.addf %121, %120 : vector<16x128xf32>
    %123 = arith.divf %121, %122 : vector<16x128xf32>
    %124 = arith.mulf %115, %48 : vector<16x128xf32>
    %125 = arith.mulf %109, %117 : vector<16x128xf32>
    %126 = arith.addf %124, %125 : vector<16x128xf32>
    %127 = math.tanh %126 : vector<16x128xf32>
    %128 = arith.mulf %123, %127 : vector<16x128xf32>
    %129 = arith.truncf %128 : vector<16x128xf32> to vector<16x128xbf16>
    %cst_37 = arith.constant dense<0.000000e+00> : vector<16x512xf32>
    %130 = tpu.matmul %129, %8, %cst_37 {dimension_numbers = #tpu.dot_dimension_numbers<[1], [0], [0], [1], [0, 0, 1, 1], [], []>} : vector<16x128xbf16>, vector<128x512xbf16>, vector<16x512xf32> -> vector<16x512xf32>
    %131 = arith.truncf %81 : vector<16x128xf32> to vector<16x128xbf16>
    %cst_38 = arith.constant dense<0.000000e+00> : vector<16x512xf32>
    %132 = tpu.matmul %131, %9, %cst_38 {dimension_numbers = #tpu.dot_dimension_numbers<[1], [0], [0], [1], [0, 0, 1, 1], [], []>} : vector<16x128xbf16>, vector<128x512xbf16>, vector<16x512xf32> -> vector<16x512xf32>
    %133 = arith.addf %130, %132 : vector<16x512xf32>
    %134 = arith.addf %133, %12 : vector<16x512xf32>
    %135 = vector.extract_strided_slice %134 {offsets = [0, 0], sizes = [16, 128], strides = [1, 1]} : vector<16x512xf32> to vector<16x128xf32>
    %136 = arith.negf %135 : vector<16x128xf32>
    %137 = math.exp %136 : vector<16x128xf32>
    %cst_39 = arith.constant 1.000000e+00 : f32
    %138 = vector.broadcast %cst_39 : f32 to vector<16x128xf32>
    %139 = arith.addf %138, %137 : vector<16x128xf32>
    %140 = arith.divf %138, %139 : vector<16x128xf32>
    %141 = vector.extract_strided_slice %134 {offsets = [0, 128], sizes = [16, 128], strides = [1, 1]} : vector<16x512xf32> to vector<16x128xf32>
    %142 = arith.negf %141 : vector<16x128xf32>
    %143 = math.exp %142 : vector<16x128xf32>
    %cst_40 = arith.constant 1.000000e+00 : f32
    %144 = vector.broadcast %cst_40 : f32 to vector<16x128xf32>
    %145 = arith.addf %144, %143 : vector<16x128xf32>
    %146 = arith.divf %144, %145 : vector<16x128xf32>
    %147 = vector.extract_strided_slice %134 {offsets = [0, 256], sizes = [16, 128], strides = [1, 1]} : vector<16x512xf32> to vector<16x128xf32>
    %148 = math.tanh %147 : vector<16x128xf32>
    %149 = vector.extract_strided_slice %134 {offsets = [0, 384], sizes = [16, 128], strides = [1, 1]} : vector<16x512xf32> to vector<16x128xf32>
    %150 = arith.negf %149 : vector<16x128xf32>
    %151 = math.exp %150 : vector<16x128xf32>
    %cst_41 = arith.constant 1.000000e+00 : f32
    %152 = vector.broadcast %cst_41 : f32 to vector<16x128xf32>
    %153 = arith.addf %152, %151 : vector<16x128xf32>
    %154 = arith.divf %152, %153 : vector<16x128xf32>
    %155 = arith.mulf %146, %79 : vector<16x128xf32>
    %156 = arith.mulf %140, %148 : vector<16x128xf32>
    %157 = arith.addf %155, %156 : vector<16x128xf32>
    %158 = math.tanh %157 : vector<16x128xf32>
    %159 = arith.mulf %154, %158 : vector<16x128xf32>
    %160 = arith.mulf %159, %15 : vector<16x128xf32>
    %cst_42 = arith.constant dense<0.000000e+00> : vector<16xf32>
    %161 = vector.multi_reduction <add>, %160, %cst_42 [1] : vector<16x128xf32> to vector<16xf32>
    %162 = vector.shape_cast %161 : vector<16xf32> to vector<16x1xf32>
    %163 = arith.maximumf %85, %162 : vector<16x1xf32>
    %164 = arith.subf %85, %163 : vector<16x1xf32>
    %165 = math.exp %164 : vector<16x1xf32>
    %166 = arith.subf %162, %163 : vector<16x1xf32>
    %167 = math.exp %166 : vector<16x1xf32>
    %168 = arith.mulf %165, %91 : vector<16x1xf32>
    %169 = arith.addf %168, %167 : vector<16x1xf32>
    %170 = vector.broadcast %165 : vector<16x1xf32> to vector<16x128xf32>
    %171 = arith.mulf %170, %96 : vector<16x128xf32>
    %172 = vector.broadcast %167 : vector<16x1xf32> to vector<16x128xf32>
    %173 = arith.mulf %172, %159 : vector<16x128xf32>
    %174 = arith.addf %171, %173 : vector<16x128xf32>
    %c2_i32 = arith.constant 2 : i32
    %c16_i32_43 = arith.constant 16 : i32
    %175 = arith.muli %c2_i32, %c16_i32_43 : i32
    %176 = tpu.assume_multiple %175, 16 : i32
    %177 = arith.index_cast %176 : i32 to index
    %c0_44 = arith.constant 0 : index
    %178 = vector.load %arg11[%177, %c0_44] : memref<128x512xf32, #tpu.memory_space<vmem>>, vector<16x512xf32>
    %179 = arith.truncf %128 : vector<16x128xf32> to vector<16x128xbf16>
    %cst_45 = arith.constant dense<0.000000e+00> : vector<16x512xf32>
    %180 = tpu.matmul %179, %7, %cst_45 {dimension_numbers = #tpu.dot_dimension_numbers<[1], [0], [0], [1], [0, 0, 1, 1], [], []>} : vector<16x128xbf16>, vector<128x512xbf16>, vector<16x512xf32> -> vector<16x512xf32>
    %181 = arith.addf %178, %180 : vector<16x512xf32>
    %182 = vector.extract_strided_slice %181 {offsets = [0, 0], sizes = [16, 128], strides = [1, 1]} : vector<16x512xf32> to vector<16x128xf32>
    %183 = arith.negf %182 : vector<16x128xf32>
    %184 = math.exp %183 : vector<16x128xf32>
    %cst_46 = arith.constant 1.000000e+00 : f32
    %185 = vector.broadcast %cst_46 : f32 to vector<16x128xf32>
    %186 = arith.addf %185, %184 : vector<16x128xf32>
    %187 = arith.divf %185, %186 : vector<16x128xf32>
    %188 = vector.extract_strided_slice %181 {offsets = [0, 128], sizes = [16, 128], strides = [1, 1]} : vector<16x512xf32> to vector<16x128xf32>
    %189 = arith.negf %188 : vector<16x128xf32>
    %190 = math.exp %189 : vector<16x128xf32>
    %cst_47 = arith.constant 1.000000e+00 : f32
    %191 = vector.broadcast %cst_47 : f32 to vector<16x128xf32>
    %192 = arith.addf %191, %190 : vector<16x128xf32>
    %193 = arith.divf %191, %192 : vector<16x128xf32>
    %194 = vector.extract_strided_slice %181 {offsets = [0, 256], sizes = [16, 128], strides = [1, 1]} : vector<16x512xf32> to vector<16x128xf32>
    %195 = math.tanh %194 : vector<16x128xf32>
    %196 = vector.extract_strided_slice %181 {offsets = [0, 384], sizes = [16, 128], strides = [1, 1]} : vector<16x512xf32> to vector<16x128xf32>
    %197 = arith.negf %196 : vector<16x128xf32>
    %198 = math.exp %197 : vector<16x128xf32>
    %cst_48 = arith.constant 1.000000e+00 : f32
    %199 = vector.broadcast %cst_48 : f32 to vector<16x128xf32>
    %200 = arith.addf %199, %198 : vector<16x128xf32>
    %201 = arith.divf %199, %200 : vector<16x128xf32>
    %202 = arith.mulf %193, %126 : vector<16x128xf32>
    %203 = arith.mulf %187, %195 : vector<16x128xf32>
    %204 = arith.addf %202, %203 : vector<16x128xf32>
    %205 = math.tanh %204 : vector<16x128xf32>
    %206 = arith.mulf %201, %205 : vector<16x128xf32>
    %207 = arith.truncf %206 : vector<16x128xf32> to vector<16x128xbf16>
    %cst_49 = arith.constant dense<0.000000e+00> : vector<16x512xf32>
    %208 = tpu.matmul %207, %8, %cst_49 {dimension_numbers = #tpu.dot_dimension_numbers<[1], [0], [0], [1], [0, 0, 1, 1], [], []>} : vector<16x128xbf16>, vector<128x512xbf16>, vector<16x512xf32> -> vector<16x512xf32>
    %209 = arith.truncf %159 : vector<16x128xf32> to vector<16x128xbf16>
    %cst_50 = arith.constant dense<0.000000e+00> : vector<16x512xf32>
    %210 = tpu.matmul %209, %9, %cst_50 {dimension_numbers = #tpu.dot_dimension_numbers<[1], [0], [0], [1], [0, 0, 1, 1], [], []>} : vector<16x128xbf16>, vector<128x512xbf16>, vector<16x512xf32> -> vector<16x512xf32>
    %211 = arith.addf %208, %210 : vector<16x512xf32>
    %212 = arith.addf %211, %12 : vector<16x512xf32>
    %213 = vector.extract_strided_slice %212 {offsets = [0, 0], sizes = [16, 128], strides = [1, 1]} : vector<16x512xf32> to vector<16x128xf32>
    %214 = arith.negf %213 : vector<16x128xf32>
    %215 = math.exp %214 : vector<16x128xf32>
    %cst_51 = arith.constant 1.000000e+00 : f32
    %216 = vector.broadcast %cst_51 : f32 to vector<16x128xf32>
    %217 = arith.addf %216, %215 : vector<16x128xf32>
    %218 = arith.divf %216, %217 : vector<16x128xf32>
    %219 = vector.extract_strided_slice %212 {offsets = [0, 128], sizes = [16, 128], strides = [1, 1]} : vector<16x512xf32> to vector<16x128xf32>
    %220 = arith.negf %219 : vector<16x128xf32>
    %221 = math.exp %220 : vector<16x128xf32>
    %cst_52 = arith.constant 1.000000e+00 : f32
    %222 = vector.broadcast %cst_52 : f32 to vector<16x128xf32>
    %223 = arith.addf %222, %221 : vector<16x128xf32>
    %224 = arith.divf %222, %223 : vector<16x128xf32>
    %225 = vector.extract_strided_slice %212 {offsets = [0, 256], sizes = [16, 128], strides = [1, 1]} : vector<16x512xf32> to vector<16x128xf32>
    %226 = math.tanh %225 : vector<16x128xf32>
    %227 = vector.extract_strided_slice %212 {offsets = [0, 384], sizes = [16, 128], strides = [1, 1]} : vector<16x512xf32> to vector<16x128xf32>
    %228 = arith.negf %227 : vector<16x128xf32>
    %229 = math.exp %228 : vector<16x128xf32>
    %cst_53 = arith.constant 1.000000e+00 : f32
    %230 = vector.broadcast %cst_53 : f32 to vector<16x128xf32>
    %231 = arith.addf %230, %229 : vector<16x128xf32>
    %232 = arith.divf %230, %231 : vector<16x128xf32>
    %233 = arith.mulf %224, %157 : vector<16x128xf32>
    %234 = arith.mulf %218, %226 : vector<16x128xf32>
    %235 = arith.addf %233, %234 : vector<16x128xf32>
    %236 = math.tanh %235 : vector<16x128xf32>
    %237 = arith.mulf %232, %236 : vector<16x128xf32>
    %238 = arith.mulf %237, %15 : vector<16x128xf32>
    %cst_54 = arith.constant dense<0.000000e+00> : vector<16xf32>
    %239 = vector.multi_reduction <add>, %238, %cst_54 [1] : vector<16x128xf32> to vector<16xf32>
    %240 = vector.shape_cast %239 : vector<16xf32> to vector<16x1xf32>
    %241 = arith.maximumf %163, %240 : vector<16x1xf32>
    %242 = arith.subf %163, %241 : vector<16x1xf32>
    %243 = math.exp %242 : vector<16x1xf32>
    %244 = arith.subf %240, %241 : vector<16x1xf32>
    %245 = math.exp %244 : vector<16x1xf32>
    %246 = arith.mulf %243, %169 : vector<16x1xf32>
    %247 = arith.addf %246, %245 : vector<16x1xf32>
    %248 = vector.broadcast %243 : vector<16x1xf32> to vector<16x128xf32>
    %249 = arith.mulf %248, %174 : vector<16x128xf32>
    %250 = vector.broadcast %245 : vector<16x1xf32> to vector<16x128xf32>
    %251 = arith.mulf %250, %237 : vector<16x128xf32>
    %252 = arith.addf %249, %251 : vector<16x128xf32>
    %c3_i32 = arith.constant 3 : i32
    %c16_i32_55 = arith.constant 16 : i32
    %253 = arith.muli %c3_i32, %c16_i32_55 : i32
    %254 = tpu.assume_multiple %253, 16 : i32
    %255 = arith.index_cast %254 : i32 to index
    %c0_56 = arith.constant 0 : index
    %256 = vector.load %arg11[%255, %c0_56] : memref<128x512xf32, #tpu.memory_space<vmem>>, vector<16x512xf32>
    %257 = arith.truncf %206 : vector<16x128xf32> to vector<16x128xbf16>
    %cst_57 = arith.constant dense<0.000000e+00> : vector<16x512xf32>
    %258 = tpu.matmul %257, %7, %cst_57 {dimension_numbers = #tpu.dot_dimension_numbers<[1], [0], [0], [1], [0, 0, 1, 1], [], []>} : vector<16x128xbf16>, vector<128x512xbf16>, vector<16x512xf32> -> vector<16x512xf32>
    %259 = arith.addf %256, %258 : vector<16x512xf32>
    %260 = vector.extract_strided_slice %259 {offsets = [0, 0], sizes = [16, 128], strides = [1, 1]} : vector<16x512xf32> to vector<16x128xf32>
    %261 = arith.negf %260 : vector<16x128xf32>
    %262 = math.exp %261 : vector<16x128xf32>
    %cst_58 = arith.constant 1.000000e+00 : f32
    %263 = vector.broadcast %cst_58 : f32 to vector<16x128xf32>
    %264 = arith.addf %263, %262 : vector<16x128xf32>
    %265 = arith.divf %263, %264 : vector<16x128xf32>
    %266 = vector.extract_strided_slice %259 {offsets = [0, 128], sizes = [16, 128], strides = [1, 1]} : vector<16x512xf32> to vector<16x128xf32>
    %267 = arith.negf %266 : vector<16x128xf32>
    %268 = math.exp %267 : vector<16x128xf32>
    %cst_59 = arith.constant 1.000000e+00 : f32
    %269 = vector.broadcast %cst_59 : f32 to vector<16x128xf32>
    %270 = arith.addf %269, %268 : vector<16x128xf32>
    %271 = arith.divf %269, %270 : vector<16x128xf32>
    %272 = vector.extract_strided_slice %259 {offsets = [0, 256], sizes = [16, 128], strides = [1, 1]} : vector<16x512xf32> to vector<16x128xf32>
    %273 = math.tanh %272 : vector<16x128xf32>
    %274 = vector.extract_strided_slice %259 {offsets = [0, 384], sizes = [16, 128], strides = [1, 1]} : vector<16x512xf32> to vector<16x128xf32>
    %275 = arith.negf %274 : vector<16x128xf32>
    %276 = math.exp %275 : vector<16x128xf32>
    %cst_60 = arith.constant 1.000000e+00 : f32
    %277 = vector.broadcast %cst_60 : f32 to vector<16x128xf32>
    %278 = arith.addf %277, %276 : vector<16x128xf32>
    %279 = arith.divf %277, %278 : vector<16x128xf32>
    %280 = arith.mulf %271, %204 : vector<16x128xf32>
    %281 = arith.mulf %265, %273 : vector<16x128xf32>
    %282 = arith.addf %280, %281 : vector<16x128xf32>
    %283 = math.tanh %282 : vector<16x128xf32>
    %284 = arith.mulf %279, %283 : vector<16x128xf32>
    %285 = arith.truncf %284 : vector<16x128xf32> to vector<16x128xbf16>
    %cst_61 = arith.constant dense<0.000000e+00> : vector<16x512xf32>
    %286 = tpu.matmul %285, %8, %cst_61 {dimension_numbers = #tpu.dot_dimension_numbers<[1], [0], [0], [1], [0, 0, 1, 1], [], []>} : vector<16x128xbf16>, vector<128x512xbf16>, vector<16x512xf32> -> vector<16x512xf32>
    %287 = arith.truncf %237 : vector<16x128xf32> to vector<16x128xbf16>
    %cst_62 = arith.constant dense<0.000000e+00> : vector<16x512xf32>
    %288 = tpu.matmul %287, %9, %cst_62 {dimension_numbers = #tpu.dot_dimension_numbers<[1], [0], [0], [1], [0, 0, 1, 1], [], []>} : vector<16x128xbf16>, vector<128x512xbf16>, vector<16x512xf32> -> vector<16x512xf32>
    %289 = arith.addf %286, %288 : vector<16x512xf32>
    %290 = arith.addf %289, %12 : vector<16x512xf32>
    %291 = vector.extract_strided_slice %290 {offsets = [0, 0], sizes = [16, 128], strides = [1, 1]} : vector<16x512xf32> to vector<16x128xf32>
    %292 = arith.negf %291 : vector<16x128xf32>
    %293 = math.exp %292 : vector<16x128xf32>
    %cst_63 = arith.constant 1.000000e+00 : f32
    %294 = vector.broadcast %cst_63 : f32 to vector<16x128xf32>
    %295 = arith.addf %294, %293 : vector<16x128xf32>
    %296 = arith.divf %294, %295 : vector<16x128xf32>
    %297 = vector.extract_strided_slice %290 {offsets = [0, 128], sizes = [16, 128], strides = [1, 1]} : vector<16x512xf32> to vector<16x128xf32>
    %298 = arith.negf %297 : vector<16x128xf32>
    %299 = math.exp %298 : vector<16x128xf32>
    %cst_64 = arith.constant 1.000000e+00 : f32
    %300 = vector.broadcast %cst_64 : f32 to vector<16x128xf32>
    %301 = arith.addf %300, %299 : vector<16x128xf32>
    %302 = arith.divf %300, %301 : vector<16x128xf32>
    %303 = vector.extract_strided_slice %290 {offsets = [0, 256], sizes = [16, 128], strides = [1, 1]} : vector<16x512xf32> to vector<16x128xf32>
    %304 = math.tanh %303 : vector<16x128xf32>
    %305 = vector.extract_strided_slice %290 {offsets = [0, 384], sizes = [16, 128], strides = [1, 1]} : vector<16x512xf32> to vector<16x128xf32>
    %306 = arith.negf %305 : vector<16x128xf32>
    %307 = math.exp %306 : vector<16x128xf32>
    %cst_65 = arith.constant 1.000000e+00 : f32
    %308 = vector.broadcast %cst_65 : f32 to vector<16x128xf32>
    %309 = arith.addf %308, %307 : vector<16x128xf32>
    %310 = arith.divf %308, %309 : vector<16x128xf32>
    %311 = arith.mulf %302, %235 : vector<16x128xf32>
    %312 = arith.mulf %296, %304 : vector<16x128xf32>
    %313 = arith.addf %311, %312 : vector<16x128xf32>
    %314 = math.tanh %313 : vector<16x128xf32>
    %315 = arith.mulf %310, %314 : vector<16x128xf32>
    %316 = arith.mulf %315, %15 : vector<16x128xf32>
    %cst_66 = arith.constant dense<0.000000e+00> : vector<16xf32>
    %317 = vector.multi_reduction <add>, %316, %cst_66 [1] : vector<16x128xf32> to vector<16xf32>
    %318 = vector.shape_cast %317 : vector<16xf32> to vector<16x1xf32>
    %319 = arith.maximumf %241, %318 : vector<16x1xf32>
    %320 = arith.subf %241, %319 : vector<16x1xf32>
    %321 = math.exp %320 : vector<16x1xf32>
    %322 = arith.subf %318, %319 : vector<16x1xf32>
    %323 = math.exp %322 : vector<16x1xf32>
    %324 = arith.mulf %321, %247 : vector<16x1xf32>
    %325 = arith.addf %324, %323 : vector<16x1xf32>
    %326 = vector.broadcast %321 : vector<16x1xf32> to vector<16x128xf32>
    %327 = arith.mulf %326, %252 : vector<16x128xf32>
    %328 = vector.broadcast %323 : vector<16x1xf32> to vector<16x128xf32>
    %329 = arith.mulf %328, %315 : vector<16x128xf32>
    %330 = arith.addf %327, %329 : vector<16x128xf32>
    %c4_i32 = arith.constant 4 : i32
    %c16_i32_67 = arith.constant 16 : i32
    %331 = arith.muli %c4_i32, %c16_i32_67 : i32
    %332 = tpu.assume_multiple %331, 16 : i32
    %333 = arith.index_cast %332 : i32 to index
    %c0_68 = arith.constant 0 : index
    %334 = vector.load %arg11[%333, %c0_68] : memref<128x512xf32, #tpu.memory_space<vmem>>, vector<16x512xf32>
    %335 = arith.truncf %284 : vector<16x128xf32> to vector<16x128xbf16>
    %cst_69 = arith.constant dense<0.000000e+00> : vector<16x512xf32>
    %336 = tpu.matmul %335, %7, %cst_69 {dimension_numbers = #tpu.dot_dimension_numbers<[1], [0], [0], [1], [0, 0, 1, 1], [], []>} : vector<16x128xbf16>, vector<128x512xbf16>, vector<16x512xf32> -> vector<16x512xf32>
    %337 = arith.addf %334, %336 : vector<16x512xf32>
    %338 = vector.extract_strided_slice %337 {offsets = [0, 0], sizes = [16, 128], strides = [1, 1]} : vector<16x512xf32> to vector<16x128xf32>
    %339 = arith.negf %338 : vector<16x128xf32>
    %340 = math.exp %339 : vector<16x128xf32>
    %cst_70 = arith.constant 1.000000e+00 : f32
    %341 = vector.broadcast %cst_70 : f32 to vector<16x128xf32>
    %342 = arith.addf %341, %340 : vector<16x128xf32>
    %343 = arith.divf %341, %342 : vector<16x128xf32>
    %344 = vector.extract_strided_slice %337 {offsets = [0, 128], sizes = [16, 128], strides = [1, 1]} : vector<16x512xf32> to vector<16x128xf32>
    %345 = arith.negf %344 : vector<16x128xf32>
    %346 = math.exp %345 : vector<16x128xf32>
    %cst_71 = arith.constant 1.000000e+00 : f32
    %347 = vector.broadcast %cst_71 : f32 to vector<16x128xf32>
    %348 = arith.addf %347, %346 : vector<16x128xf32>
    %349 = arith.divf %347, %348 : vector<16x128xf32>
    %350 = vector.extract_strided_slice %337 {offsets = [0, 256], sizes = [16, 128], strides = [1, 1]} : vector<16x512xf32> to vector<16x128xf32>
    %351 = math.tanh %350 : vector<16x128xf32>
    %352 = vector.extract_strided_slice %337 {offsets = [0, 384], sizes = [16, 128], strides = [1, 1]} : vector<16x512xf32> to vector<16x128xf32>
    %353 = arith.negf %352 : vector<16x128xf32>
    %354 = math.exp %353 : vector<16x128xf32>
    %cst_72 = arith.constant 1.000000e+00 : f32
    %355 = vector.broadcast %cst_72 : f32 to vector<16x128xf32>
    %356 = arith.addf %355, %354 : vector<16x128xf32>
    %357 = arith.divf %355, %356 : vector<16x128xf32>
    %358 = arith.mulf %349, %282 : vector<16x128xf32>
    %359 = arith.mulf %343, %351 : vector<16x128xf32>
    %360 = arith.addf %358, %359 : vector<16x128xf32>
    %361 = math.tanh %360 : vector<16x128xf32>
    %362 = arith.mulf %357, %361 : vector<16x128xf32>
    %363 = arith.truncf %362 : vector<16x128xf32> to vector<16x128xbf16>
    %cst_73 = arith.constant dense<0.000000e+00> : vector<16x512xf32>
    %364 = tpu.matmul %363, %8, %cst_73 {dimension_numbers = #tpu.dot_dimension_numbers<[1], [0], [0], [1], [0, 0, 1, 1], [], []>} : vector<16x128xbf16>, vector<128x512xbf16>, vector<16x512xf32> -> vector<16x512xf32>
    %365 = arith.truncf %315 : vector<16x128xf32> to vector<16x128xbf16>
    %cst_74 = arith.constant dense<0.000000e+00> : vector<16x512xf32>
    %366 = tpu.matmul %365, %9, %cst_74 {dimension_numbers = #tpu.dot_dimension_numbers<[1], [0], [0], [1], [0, 0, 1, 1], [], []>} : vector<16x128xbf16>, vector<128x512xbf16>, vector<16x512xf32> -> vector<16x512xf32>
    %367 = arith.addf %364, %366 : vector<16x512xf32>
    %368 = arith.addf %367, %12 : vector<16x512xf32>
    %369 = vector.extract_strided_slice %368 {offsets = [0, 0], sizes = [16, 128], strides = [1, 1]} : vector<16x512xf32> to vector<16x128xf32>
    %370 = arith.negf %369 : vector<16x128xf32>
    %371 = math.exp %370 : vector<16x128xf32>
    %cst_75 = arith.constant 1.000000e+00 : f32
    %372 = vector.broadcast %cst_75 : f32 to vector<16x128xf32>
    %373 = arith.addf %372, %371 : vector<16x128xf32>
    %374 = arith.divf %372, %373 : vector<16x128xf32>
    %375 = vector.extract_strided_slice %368 {offsets = [0, 128], sizes = [16, 128], strides = [1, 1]} : vector<16x512xf32> to vector<16x128xf32>
    %376 = arith.negf %375 : vector<16x128xf32>
    %377 = math.exp %376 : vector<16x128xf32>
    %cst_76 = arith.constant 1.000000e+00 : f32
    %378 = vector.broadcast %cst_76 : f32 to vector<16x128xf32>
    %379 = arith.addf %378, %377 : vector<16x128xf32>
    %380 = arith.divf %378, %379 : vector<16x128xf32>
    %381 = vector.extract_strided_slice %368 {offsets = [0, 256], sizes = [16, 128], strides = [1, 1]} : vector<16x512xf32> to vector<16x128xf32>
    %382 = math.tanh %381 : vector<16x128xf32>
    %383 = vector.extract_strided_slice %368 {offsets = [0, 384], sizes = [16, 128], strides = [1, 1]} : vector<16x512xf32> to vector<16x128xf32>
    %384 = arith.negf %383 : vector<16x128xf32>
    %385 = math.exp %384 : vector<16x128xf32>
    %cst_77 = arith.constant 1.000000e+00 : f32
    %386 = vector.broadcast %cst_77 : f32 to vector<16x128xf32>
    %387 = arith.addf %386, %385 : vector<16x128xf32>
    %388 = arith.divf %386, %387 : vector<16x128xf32>
    %389 = arith.mulf %380, %313 : vector<16x128xf32>
    %390 = arith.mulf %374, %382 : vector<16x128xf32>
    %391 = arith.addf %389, %390 : vector<16x128xf32>
    %392 = math.tanh %391 : vector<16x128xf32>
    %393 = arith.mulf %388, %392 : vector<16x128xf32>
    %394 = arith.mulf %393, %15 : vector<16x128xf32>
    %cst_78 = arith.constant dense<0.000000e+00> : vector<16xf32>
    %395 = vector.multi_reduction <add>, %394, %cst_78 [1] : vector<16x128xf32> to vector<16xf32>
    %396 = vector.shape_cast %395 : vector<16xf32> to vector<16x1xf32>
    %397 = arith.maximumf %319, %396 : vector<16x1xf32>
    %398 = arith.subf %319, %397 : vector<16x1xf32>
    %399 = math.exp %398 : vector<16x1xf32>
    %400 = arith.subf %396, %397 : vector<16x1xf32>
    %401 = math.exp %400 : vector<16x1xf32>
    %402 = arith.mulf %399, %325 : vector<16x1xf32>
    %403 = arith.addf %402, %401 : vector<16x1xf32>
    %404 = vector.broadcast %399 : vector<16x1xf32> to vector<16x128xf32>
    %405 = arith.mulf %404, %330 : vector<16x128xf32>
    %406 = vector.broadcast %401 : vector<16x1xf32> to vector<16x128xf32>
    %407 = arith.mulf %406, %393 : vector<16x128xf32>
    %408 = arith.addf %405, %407 : vector<16x128xf32>
    %c5_i32 = arith.constant 5 : i32
    %c16_i32_79 = arith.constant 16 : i32
    %409 = arith.muli %c5_i32, %c16_i32_79 : i32
    %410 = tpu.assume_multiple %409, 16 : i32
    %411 = arith.index_cast %410 : i32 to index
    %c0_80 = arith.constant 0 : index
    %412 = vector.load %arg11[%411, %c0_80] : memref<128x512xf32, #tpu.memory_space<vmem>>, vector<16x512xf32>
    %413 = arith.truncf %362 : vector<16x128xf32> to vector<16x128xbf16>
    %cst_81 = arith.constant dense<0.000000e+00> : vector<16x512xf32>
    %414 = tpu.matmul %413, %7, %cst_81 {dimension_numbers = #tpu.dot_dimension_numbers<[1], [0], [0], [1], [0, 0, 1, 1], [], []>} : vector<16x128xbf16>, vector<128x512xbf16>, vector<16x512xf32> -> vector<16x512xf32>
    %415 = arith.addf %412, %414 : vector<16x512xf32>
    %416 = vector.extract_strided_slice %415 {offsets = [0, 0], sizes = [16, 128], strides = [1, 1]} : vector<16x512xf32> to vector<16x128xf32>
    %417 = arith.negf %416 : vector<16x128xf32>
    %418 = math.exp %417 : vector<16x128xf32>
    %cst_82 = arith.constant 1.000000e+00 : f32
    %419 = vector.broadcast %cst_82 : f32 to vector<16x128xf32>
    %420 = arith.addf %419, %418 : vector<16x128xf32>
    %421 = arith.divf %419, %420 : vector<16x128xf32>
    %422 = vector.extract_strided_slice %415 {offsets = [0, 128], sizes = [16, 128], strides = [1, 1]} : vector<16x512xf32> to vector<16x128xf32>
    %423 = arith.negf %422 : vector<16x128xf32>
    %424 = math.exp %423 : vector<16x128xf32>
    %cst_83 = arith.constant 1.000000e+00 : f32
    %425 = vector.broadcast %cst_83 : f32 to vector<16x128xf32>
    %426 = arith.addf %425, %424 : vector<16x128xf32>
    %427 = arith.divf %425, %426 : vector<16x128xf32>
    %428 = vector.extract_strided_slice %415 {offsets = [0, 256], sizes = [16, 128], strides = [1, 1]} : vector<16x512xf32> to vector<16x128xf32>
    %429 = math.tanh %428 : vector<16x128xf32>
    %430 = vector.extract_strided_slice %415 {offsets = [0, 384], sizes = [16, 128], strides = [1, 1]} : vector<16x512xf32> to vector<16x128xf32>
    %431 = arith.negf %430 : vector<16x128xf32>
    %432 = math.exp %431 : vector<16x128xf32>
    %cst_84 = arith.constant 1.000000e+00 : f32
    %433 = vector.broadcast %cst_84 : f32 to vector<16x128xf32>
    %434 = arith.addf %433, %432 : vector<16x128xf32>
    %435 = arith.divf %433, %434 : vector<16x128xf32>
    %436 = arith.mulf %427, %360 : vector<16x128xf32>
    %437 = arith.mulf %421, %429 : vector<16x128xf32>
    %438 = arith.addf %436, %437 : vector<16x128xf32>
    %439 = math.tanh %438 : vector<16x128xf32>
    %440 = arith.mulf %435, %439 : vector<16x128xf32>
    %441 = arith.truncf %440 : vector<16x128xf32> to vector<16x128xbf16>
    %cst_85 = arith.constant dense<0.000000e+00> : vector<16x512xf32>
    %442 = tpu.matmul %441, %8, %cst_85 {dimension_numbers = #tpu.dot_dimension_numbers<[1], [0], [0], [1], [0, 0, 1, 1], [], []>} : vector<16x128xbf16>, vector<128x512xbf16>, vector<16x512xf32> -> vector<16x512xf32>
    %443 = arith.truncf %393 : vector<16x128xf32> to vector<16x128xbf16>
    %cst_86 = arith.constant dense<0.000000e+00> : vector<16x512xf32>
    %444 = tpu.matmul %443, %9, %cst_86 {dimension_numbers = #tpu.dot_dimension_numbers<[1], [0], [0], [1], [0, 0, 1, 1], [], []>} : vector<16x128xbf16>, vector<128x512xbf16>, vector<16x512xf32> -> vector<16x512xf32>
    %445 = arith.addf %442, %444 : vector<16x512xf32>
    %446 = arith.addf %445, %12 : vector<16x512xf32>
    %447 = vector.extract_strided_slice %446 {offsets = [0, 0], sizes = [16, 128], strides = [1, 1]} : vector<16x512xf32> to vector<16x128xf32>
    %448 = arith.negf %447 : vector<16x128xf32>
    %449 = math.exp %448 : vector<16x128xf32>
    %cst_87 = arith.constant 1.000000e+00 : f32
    %450 = vector.broadcast %cst_87 : f32 to vector<16x128xf32>
    %451 = arith.addf %450, %449 : vector<16x128xf32>
    %452 = arith.divf %450, %451 : vector<16x128xf32>
    %453 = vector.extract_strided_slice %446 {offsets = [0, 128], sizes = [16, 128], strides = [1, 1]} : vector<16x512xf32> to vector<16x128xf32>
    %454 = arith.negf %453 : vector<16x128xf32>
    %455 = math.exp %454 : vector<16x128xf32>
    %cst_88 = arith.constant 1.000000e+00 : f32
    %456 = vector.broadcast %cst_88 : f32 to vector<16x128xf32>
    %457 = arith.addf %456, %455 : vector<16x128xf32>
    %458 = arith.divf %456, %457 : vector<16x128xf32>
    %459 = vector.extract_strided_slice %446 {offsets = [0, 256], sizes = [16, 128], strides = [1, 1]} : vector<16x512xf32> to vector<16x128xf32>
    %460 = math.tanh %459 : vector<16x128xf32>
    %461 = vector.extract_strided_slice %446 {offsets = [0, 384], sizes = [16, 128], strides = [1, 1]} : vector<16x512xf32> to vector<16x128xf32>
    %462 = arith.negf %461 : vector<16x128xf32>
    %463 = math.exp %462 : vector<16x128xf32>
    %cst_89 = arith.constant 1.000000e+00 : f32
    %464 = vector.broadcast %cst_89 : f32 to vector<16x128xf32>
    %465 = arith.addf %464, %463 : vector<16x128xf32>
    %466 = arith.divf %464, %465 : vector<16x128xf32>
    %467 = arith.mulf %458, %391 : vector<16x128xf32>
    %468 = arith.mulf %452, %460 : vector<16x128xf32>
    %469 = arith.addf %467, %468 : vector<16x128xf32>
    %470 = math.tanh %469 : vector<16x128xf32>
    %471 = arith.mulf %466, %470 : vector<16x128xf32>
    %472 = arith.mulf %471, %15 : vector<16x128xf32>
    %cst_90 = arith.constant dense<0.000000e+00> : vector<16xf32>
    %473 = vector.multi_reduction <add>, %472, %cst_90 [1] : vector<16x128xf32> to vector<16xf32>
    %474 = vector.shape_cast %473 : vector<16xf32> to vector<16x1xf32>
    %475 = arith.maximumf %397, %474 : vector<16x1xf32>
    %476 = arith.subf %397, %475 : vector<16x1xf32>
    %477 = math.exp %476 : vector<16x1xf32>
    %478 = arith.subf %474, %475 : vector<16x1xf32>
    %479 = math.exp %478 : vector<16x1xf32>
    %480 = arith.mulf %477, %403 : vector<16x1xf32>
    %481 = arith.addf %480, %479 : vector<16x1xf32>
    %482 = vector.broadcast %477 : vector<16x1xf32> to vector<16x128xf32>
    %483 = arith.mulf %482, %408 : vector<16x128xf32>
    %484 = vector.broadcast %479 : vector<16x1xf32> to vector<16x128xf32>
    %485 = arith.mulf %484, %471 : vector<16x128xf32>
    %486 = arith.addf %483, %485 : vector<16x128xf32>
    %c6_i32 = arith.constant 6 : i32
    %c16_i32_91 = arith.constant 16 : i32
    %487 = arith.muli %c6_i32, %c16_i32_91 : i32
    %488 = tpu.assume_multiple %487, 16 : i32
    %489 = arith.index_cast %488 : i32 to index
    %c0_92 = arith.constant 0 : index
    %490 = vector.load %arg11[%489, %c0_92] : memref<128x512xf32, #tpu.memory_space<vmem>>, vector<16x512xf32>
    %491 = arith.truncf %440 : vector<16x128xf32> to vector<16x128xbf16>
    %cst_93 = arith.constant dense<0.000000e+00> : vector<16x512xf32>
    %492 = tpu.matmul %491, %7, %cst_93 {dimension_numbers = #tpu.dot_dimension_numbers<[1], [0], [0], [1], [0, 0, 1, 1], [], []>} : vector<16x128xbf16>, vector<128x512xbf16>, vector<16x512xf32> -> vector<16x512xf32>
    %493 = arith.addf %490, %492 : vector<16x512xf32>
    %494 = vector.extract_strided_slice %493 {offsets = [0, 0], sizes = [16, 128], strides = [1, 1]} : vector<16x512xf32> to vector<16x128xf32>
    %495 = arith.negf %494 : vector<16x128xf32>
    %496 = math.exp %495 : vector<16x128xf32>
    %cst_94 = arith.constant 1.000000e+00 : f32
    %497 = vector.broadcast %cst_94 : f32 to vector<16x128xf32>
    %498 = arith.addf %497, %496 : vector<16x128xf32>
    %499 = arith.divf %497, %498 : vector<16x128xf32>
    %500 = vector.extract_strided_slice %493 {offsets = [0, 128], sizes = [16, 128], strides = [1, 1]} : vector<16x512xf32> to vector<16x128xf32>
    %501 = arith.negf %500 : vector<16x128xf32>
    %502 = math.exp %501 : vector<16x128xf32>
    %cst_95 = arith.constant 1.000000e+00 : f32
    %503 = vector.broadcast %cst_95 : f32 to vector<16x128xf32>
    %504 = arith.addf %503, %502 : vector<16x128xf32>
    %505 = arith.divf %503, %504 : vector<16x128xf32>
    %506 = vector.extract_strided_slice %493 {offsets = [0, 256], sizes = [16, 128], strides = [1, 1]} : vector<16x512xf32> to vector<16x128xf32>
    %507 = math.tanh %506 : vector<16x128xf32>
    %508 = vector.extract_strided_slice %493 {offsets = [0, 384], sizes = [16, 128], strides = [1, 1]} : vector<16x512xf32> to vector<16x128xf32>
    %509 = arith.negf %508 : vector<16x128xf32>
    %510 = math.exp %509 : vector<16x128xf32>
    %cst_96 = arith.constant 1.000000e+00 : f32
    %511 = vector.broadcast %cst_96 : f32 to vector<16x128xf32>
    %512 = arith.addf %511, %510 : vector<16x128xf32>
    %513 = arith.divf %511, %512 : vector<16x128xf32>
    %514 = arith.mulf %505, %438 : vector<16x128xf32>
    %515 = arith.mulf %499, %507 : vector<16x128xf32>
    %516 = arith.addf %514, %515 : vector<16x128xf32>
    %517 = math.tanh %516 : vector<16x128xf32>
    %518 = arith.mulf %513, %517 : vector<16x128xf32>
    %519 = arith.truncf %518 : vector<16x128xf32> to vector<16x128xbf16>
    %cst_97 = arith.constant dense<0.000000e+00> : vector<16x512xf32>
    %520 = tpu.matmul %519, %8, %cst_97 {dimension_numbers = #tpu.dot_dimension_numbers<[1], [0], [0], [1], [0, 0, 1, 1], [], []>} : vector<16x128xbf16>, vector<128x512xbf16>, vector<16x512xf32> -> vector<16x512xf32>
    %521 = arith.truncf %471 : vector<16x128xf32> to vector<16x128xbf16>
    %cst_98 = arith.constant dense<0.000000e+00> : vector<16x512xf32>
    %522 = tpu.matmul %521, %9, %cst_98 {dimension_numbers = #tpu.dot_dimension_numbers<[1], [0], [0], [1], [0, 0, 1, 1], [], []>} : vector<16x128xbf16>, vector<128x512xbf16>, vector<16x512xf32> -> vector<16x512xf32>
    %523 = arith.addf %520, %522 : vector<16x512xf32>
    %524 = arith.addf %523, %12 : vector<16x512xf32>
    %525 = vector.extract_strided_slice %524 {offsets = [0, 0], sizes = [16, 128], strides = [1, 1]} : vector<16x512xf32> to vector<16x128xf32>
    %526 = arith.negf %525 : vector<16x128xf32>
    %527 = math.exp %526 : vector<16x128xf32>
    %cst_99 = arith.constant 1.000000e+00 : f32
    %528 = vector.broadcast %cst_99 : f32 to vector<16x128xf32>
    %529 = arith.addf %528, %527 : vector<16x128xf32>
    %530 = arith.divf %528, %529 : vector<16x128xf32>
    %531 = vector.extract_strided_slice %524 {offsets = [0, 128], sizes = [16, 128], strides = [1, 1]} : vector<16x512xf32> to vector<16x128xf32>
    %532 = arith.negf %531 : vector<16x128xf32>
    %533 = math.exp %532 : vector<16x128xf32>
    %cst_100 = arith.constant 1.000000e+00 : f32
    %534 = vector.broadcast %cst_100 : f32 to vector<16x128xf32>
    %535 = arith.addf %534, %533 : vector<16x128xf32>
    %536 = arith.divf %534, %535 : vector<16x128xf32>
    %537 = vector.extract_strided_slice %524 {offsets = [0, 256], sizes = [16, 128], strides = [1, 1]} : vector<16x512xf32> to vector<16x128xf32>
    %538 = math.tanh %537 : vector<16x128xf32>
    %539 = vector.extract_strided_slice %524 {offsets = [0, 384], sizes = [16, 128], strides = [1, 1]} : vector<16x512xf32> to vector<16x128xf32>
    %540 = arith.negf %539 : vector<16x128xf32>
    %541 = math.exp %540 : vector<16x128xf32>
    %cst_101 = arith.constant 1.000000e+00 : f32
    %542 = vector.broadcast %cst_101 : f32 to vector<16x128xf32>
    %543 = arith.addf %542, %541 : vector<16x128xf32>
    %544 = arith.divf %542, %543 : vector<16x128xf32>
    %545 = arith.mulf %536, %469 : vector<16x128xf32>
    %546 = arith.mulf %530, %538 : vector<16x128xf32>
    %547 = arith.addf %545, %546 : vector<16x128xf32>
    %548 = math.tanh %547 : vector<16x128xf32>
    %549 = arith.mulf %544, %548 : vector<16x128xf32>
    %550 = arith.mulf %549, %15 : vector<16x128xf32>
    %cst_102 = arith.constant dense<0.000000e+00> : vector<16xf32>
    %551 = vector.multi_reduction <add>, %550, %cst_102 [1] : vector<16x128xf32> to vector<16xf32>
    %552 = vector.shape_cast %551 : vector<16xf32> to vector<16x1xf32>
    %553 = arith.maximumf %475, %552 : vector<16x1xf32>
    %554 = arith.subf %475, %553 : vector<16x1xf32>
    %555 = math.exp %554 : vector<16x1xf32>
    %556 = arith.subf %552, %553 : vector<16x1xf32>
    %557 = math.exp %556 : vector<16x1xf32>
    %558 = arith.mulf %555, %481 : vector<16x1xf32>
    %559 = arith.addf %558, %557 : vector<16x1xf32>
    %560 = vector.broadcast %555 : vector<16x1xf32> to vector<16x128xf32>
    %561 = arith.mulf %560, %486 : vector<16x128xf32>
    %562 = vector.broadcast %557 : vector<16x1xf32> to vector<16x128xf32>
    %563 = arith.mulf %562, %549 : vector<16x128xf32>
    %564 = arith.addf %561, %563 : vector<16x128xf32>
    %c7_i32 = arith.constant 7 : i32
    %c16_i32_103 = arith.constant 16 : i32
    %565 = arith.muli %c7_i32, %c16_i32_103 : i32
    %566 = tpu.assume_multiple %565, 16 : i32
    %567 = arith.index_cast %566 : i32 to index
    %c0_104 = arith.constant 0 : index
    %568 = vector.load %arg11[%567, %c0_104] : memref<128x512xf32, #tpu.memory_space<vmem>>, vector<16x512xf32>
    %569 = arith.truncf %518 : vector<16x128xf32> to vector<16x128xbf16>
    %cst_105 = arith.constant dense<0.000000e+00> : vector<16x512xf32>
    %570 = tpu.matmul %569, %7, %cst_105 {dimension_numbers = #tpu.dot_dimension_numbers<[1], [0], [0], [1], [0, 0, 1, 1], [], []>} : vector<16x128xbf16>, vector<128x512xbf16>, vector<16x512xf32> -> vector<16x512xf32>
    %571 = arith.addf %568, %570 : vector<16x512xf32>
    %572 = vector.extract_strided_slice %571 {offsets = [0, 0], sizes = [16, 128], strides = [1, 1]} : vector<16x512xf32> to vector<16x128xf32>
    %573 = arith.negf %572 : vector<16x128xf32>
    %574 = math.exp %573 : vector<16x128xf32>
    %cst_106 = arith.constant 1.000000e+00 : f32
    %575 = vector.broadcast %cst_106 : f32 to vector<16x128xf32>
    %576 = arith.addf %575, %574 : vector<16x128xf32>
    %577 = arith.divf %575, %576 : vector<16x128xf32>
    %578 = vector.extract_strided_slice %571 {offsets = [0, 128], sizes = [16, 128], strides = [1, 1]} : vector<16x512xf32> to vector<16x128xf32>
    %579 = arith.negf %578 : vector<16x128xf32>
    %580 = math.exp %579 : vector<16x128xf32>
    %cst_107 = arith.constant 1.000000e+00 : f32
    %581 = vector.broadcast %cst_107 : f32 to vector<16x128xf32>
    %582 = arith.addf %581, %580 : vector<16x128xf32>
    %583 = arith.divf %581, %582 : vector<16x128xf32>
    %584 = vector.extract_strided_slice %571 {offsets = [0, 256], sizes = [16, 128], strides = [1, 1]} : vector<16x512xf32> to vector<16x128xf32>
    %585 = math.tanh %584 : vector<16x128xf32>
    %586 = vector.extract_strided_slice %571 {offsets = [0, 384], sizes = [16, 128], strides = [1, 1]} : vector<16x512xf32> to vector<16x128xf32>
    %587 = arith.negf %586 : vector<16x128xf32>
    %588 = math.exp %587 : vector<16x128xf32>
    %cst_108 = arith.constant 1.000000e+00 : f32
    %589 = vector.broadcast %cst_108 : f32 to vector<16x128xf32>
    %590 = arith.addf %589, %588 : vector<16x128xf32>
    %591 = arith.divf %589, %590 : vector<16x128xf32>
    %592 = arith.mulf %583, %516 : vector<16x128xf32>
    %593 = arith.mulf %577, %585 : vector<16x128xf32>
    %594 = arith.addf %592, %593 : vector<16x128xf32>
    %595 = math.tanh %594 : vector<16x128xf32>
    %596 = arith.mulf %591, %595 : vector<16x128xf32>
    %597 = arith.truncf %596 : vector<16x128xf32> to vector<16x128xbf16>
    %cst_109 = arith.constant dense<0.000000e+00> : vector<16x512xf32>
    %598 = tpu.matmul %597, %8, %cst_109 {dimension_numbers = #tpu.dot_dimension_numbers<[1], [0], [0], [1], [0, 0, 1, 1], [], []>} : vector<16x128xbf16>, vector<128x512xbf16>, vector<16x512xf32> -> vector<16x512xf32>
    %599 = arith.truncf %549 : vector<16x128xf32> to vector<16x128xbf16>
    %cst_110 = arith.constant dense<0.000000e+00> : vector<16x512xf32>
    %600 = tpu.matmul %599, %9, %cst_110 {dimension_numbers = #tpu.dot_dimension_numbers<[1], [0], [0], [1], [0, 0, 1, 1], [], []>} : vector<16x128xbf16>, vector<128x512xbf16>, vector<16x512xf32> -> vector<16x512xf32>
    %601 = arith.addf %598, %600 : vector<16x512xf32>
    %602 = arith.addf %601, %12 : vector<16x512xf32>
    %603 = vector.extract_strided_slice %602 {offsets = [0, 0], sizes = [16, 128], strides = [1, 1]} : vector<16x512xf32> to vector<16x128xf32>
    %604 = arith.negf %603 : vector<16x128xf32>
    %605 = math.exp %604 : vector<16x128xf32>
    %cst_111 = arith.constant 1.000000e+00 : f32
    %606 = vector.broadcast %cst_111 : f32 to vector<16x128xf32>
    %607 = arith.addf %606, %605 : vector<16x128xf32>
    %608 = arith.divf %606, %607 : vector<16x128xf32>
    %609 = vector.extract_strided_slice %602 {offsets = [0, 128], sizes = [16, 128], strides = [1, 1]} : vector<16x512xf32> to vector<16x128xf32>
    %610 = arith.negf %609 : vector<16x128xf32>
    %611 = math.exp %610 : vector<16x128xf32>
    %cst_112 = arith.constant 1.000000e+00 : f32
    %612 = vector.broadcast %cst_112 : f32 to vector<16x128xf32>
    %613 = arith.addf %612, %611 : vector<16x128xf32>
    %614 = arith.divf %612, %613 : vector<16x128xf32>
    %615 = vector.extract_strided_slice %602 {offsets = [0, 256], sizes = [16, 128], strides = [1, 1]} : vector<16x512xf32> to vector<16x128xf32>
    %616 = math.tanh %615 : vector<16x128xf32>
    %617 = vector.extract_strided_slice %602 {offsets = [0, 384], sizes = [16, 128], strides = [1, 1]} : vector<16x512xf32> to vector<16x128xf32>
    %618 = arith.negf %617 : vector<16x128xf32>
    %619 = math.exp %618 : vector<16x128xf32>
    %cst_113 = arith.constant 1.000000e+00 : f32
    %620 = vector.broadcast %cst_113 : f32 to vector<16x128xf32>
    %621 = arith.addf %620, %619 : vector<16x128xf32>
    %622 = arith.divf %620, %621 : vector<16x128xf32>
    %623 = arith.mulf %614, %547 : vector<16x128xf32>
    %624 = arith.mulf %608, %616 : vector<16x128xf32>
    %625 = arith.addf %623, %624 : vector<16x128xf32>
    %626 = math.tanh %625 : vector<16x128xf32>
    %627 = arith.mulf %622, %626 : vector<16x128xf32>
    %628 = arith.mulf %627, %15 : vector<16x128xf32>
    %cst_114 = arith.constant dense<0.000000e+00> : vector<16xf32>
    %629 = vector.multi_reduction <add>, %628, %cst_114 [1] : vector<16x128xf32> to vector<16xf32>
    %630 = vector.shape_cast %629 : vector<16xf32> to vector<16x1xf32>
    %631 = arith.maximumf %553, %630 : vector<16x1xf32>
    %632 = arith.subf %553, %631 : vector<16x1xf32>
    %633 = math.exp %632 : vector<16x1xf32>
    %634 = arith.subf %630, %631 : vector<16x1xf32>
    %635 = math.exp %634 : vector<16x1xf32>
    %636 = arith.mulf %633, %559 : vector<16x1xf32>
    %637 = arith.addf %636, %635 : vector<16x1xf32>
    %638 = vector.broadcast %633 : vector<16x1xf32> to vector<16x128xf32>
    %639 = arith.mulf %638, %564 : vector<16x128xf32>
    %640 = vector.broadcast %635 : vector<16x1xf32> to vector<16x128xf32>
    %641 = arith.mulf %640, %627 : vector<16x128xf32>
    %642 = arith.addf %639, %641 : vector<16x128xf32>
    %c8_i32 = arith.constant 8 : i32
    %643 = tpu.reciprocal %637 {approx = true} : vector<16x1xf32> -> vector<16x1xf32>
    %644 = vector.broadcast %643 : vector<16x1xf32> to vector<16x128xf32>
    %645 = arith.mulf %642, %644 : vector<16x128xf32>
    %646 = arith.truncf %645 : vector<16x128xf32> to vector<16x128xbf16>
    %c0_115 = arith.constant 0 : index
    %c0_116 = arith.constant 0 : index
    %647 = vector.load %arg8[%c0_115, %c0_116] : memref<128x128xbf16, #tpu.memory_space<vmem>>, vector<128x128xbf16>
    %cst_117 = arith.constant dense<0.000000e+00> : vector<16x128xf32>
    %648 = tpu.matmul %646, %647, %cst_117 {dimension_numbers = #tpu.dot_dimension_numbers<[1], [0], [0], [1], [0, 0, 1, 1], [], []>} : vector<16x128xbf16>, vector<128x128xbf16>, vector<16x128xf32> -> vector<16x128xf32>
    %c0_118 = arith.constant 0 : index
    %c0_119 = arith.constant 0 : index
    %649 = vector.load %arg9[%c0_118, %c0_119] : memref<1x128xf32, #tpu.memory_space<vmem>>, vector<1x128xf32>
    %650 = vector.broadcast %649 : vector<1x128xf32> to vector<16x128xf32>
    %651 = arith.addf %648, %650 : vector<16x128xf32>
    %c0_120 = arith.constant 0 : index
    %c0_121 = arith.constant 0 : index
    %652 = vector.load %arg10[%c0_120, %c0_121] : memref<16x128xf32, #tpu.memory_space<vmem>>, vector<16x128xf32>
    tpu.vector_store %arg10[%c0_120, %c0_121], %651 {strides = array<i32>} : memref<16x128xf32, #tpu.memory_space<vmem>>, vector<16x128xf32>,
    return
  }
}

</mosaic_0001>

<bundles_post_ra>
// kernel: tpu_custom_call.1
= control target key start
LH: loop header
LB: loop body
LE: loop exit
PB: predicated region body
PF: predicated region fallthrough
CT: control target
= control target key end

     0   :  { %15 = vsyncpa [#allocation4], 0  ;;  %s8183_s0 = inlined_call_operand.vmem [shape: bf16[128,16], index: 0, kind: input, shape index: {}]   ;;  %s8184_s1 = inlined_call_operand.vmem [shape: bf16[16,512], index: 1, kind: input, shape index: {}]   ;;  %s8185_s2 = inlined_call_operand.hbm [shape: bf16[128,512], index: 2, kind: input, shape index: {}]   ;;  %s8186_s3 = inlined_call_operand.vmem [shape: f32[1,512], index: 3, kind: input, shape index: {}]   ;;  %s8187_s4 = inlined_call_operand.hbm [shape: bf16[128,512], index: 4, kind: input, shape index: {}]   ;;  %s8188_s5 = inlined_call_operand.hbm [shape: bf16[128,512], index: 5, kind: input, shape index: {}]   ;;  %s8189_s6 = inlined_call_operand.hbm [shape: f32[1,512], index: 6, kind: input, shape index: {}]   ;;  %s8190_s7 = inlined_call_operand.vmem [shape: f32[1,128], index: 7, kind: input, shape index: {}]   ;;  %s8191_s8 = inlined_call_operand.vmem [shape: bf16[128,128], index: 8, kind: input, shape index: {}]   ;;  %s8192_s9 = inlined_call_operand.vmem [shape: f32[1,128], index: 9, kind: input, shape index: {}]   ;;  %s8193_s10 = inlined_call_operand.hbm [shape: f32[16,128], index: 10, kind: output, shape index: {}]  }
   0x1   :  { %16 = vsyncpa [#allocation7], 0 }
   0x2   :  { %17 = vsyncpa [#allocation10], 0 }
   0x3   :  { %18 = vsyncpa [#allocation5], 0  ;;  %s6079_s13 = smov [#allocation6]   ;;  %s6080_s15 = smov [#allocation3]  }
   0x4   :  { %s42_s14 = sshll.u32 %s6079_s13, 4  ;;  %s28_s16 = sshll.u32 %s6080_s15, 4  ;;  %s43_s14 = int_to_ptr.vmem [resolvable:$true] %s42_s14  ;;  %s6146_s16 = int_to_ptr.vmem [resolvable:$true] %s28_s16 }
   0x5   :  { %s5961_s19 = scalar_lea.hbm %s8187_s4, 4096 }
   0x6   :  { %p5962_p0 = scmp.ne.s32.totalorder %s8187_s4, %s5961_s19  ;;  %p5965_p1 = scmp.lt.u32.totalorder %s5961_s19, %s8187_s4 }
   0x8   :  { %p5967_p2 = pnand %p5965_p1, %p5962_p0 }
   0xa   :  { %5970 = shalt.err (!%p5967_p2)
}
   0xb   :  { %s5971_s24 = scalar_lea.vmem %s43_s14, 4096  ;;  %p5976_p4 = scmp.lt.s32.totalorder %s43_s14, %s43_s14 }
   0xc   :  { %p5972_p3 = scmp.ne.s32.totalorder %s43_s14, %s5971_s24  ;;  %p5977_p5 = scmp.lt.s32.totalorder %s5971_s24, %s5971_s24 }
   0xe   :  { %p5978_p6 = por %p5977_p5, %p5976_p4 }
  0x10   :  { %p5979_p7 = pnand %p5978_p6, %p5972_p3 }
  0x12   :  { %5982 = shalt.err (!%p5979_p7)
}
  0x13   :  { %s6081_s25 = smov 256   ;;  %s6082_s26 = smov 16  }
  0x14   :  { %48 = dma.hbm_to_vmem [thread:$0]  %s8187_s4, 4096, %s43_s14, [#allocation7], %s6081_s25, %s6081_s25, %s6082_s26  }
  0x15   :  { %s5983_s11 = scalar_lea.hbm %s8185_s2, 4096 }
  0x16   :  { %p5984_p8 = scmp.ne.s32.totalorder %s8185_s2, %s5983_s11  ;;  %p5987_p9 = scmp.lt.u32.totalorder %s5983_s11, %s8185_s2 }
  0x18   :  { %p5989_p10 = pnand %p5987_p9, %p5984_p8 }
  0x1a   :  { %5992 = shalt.err (!%p5989_p10)
}
  0x1b   :  { %s5993_s18 = scalar_lea.vmem %s6146_s16, 4096  ;;  %p5998_p12 = scmp.lt.s32.totalorder %s6146_s16, %s6146_s16 }
  0x1c   :  { %p5994_p11 = scmp.ne.s32.totalorder %s6146_s16, %s5993_s18  ;;  %p5999_p13 = scmp.lt.s32.totalorder %s5993_s18, %s5993_s18 }
  0x1e   :  { %p6000_p0 = por %p5999_p13, %p5998_p12 }
  0x20   :  { %p6001_p1 = pnand %p6000_p0, %p5994_p11 }
  0x22   :  { %6004 = shalt.err (!%p6001_p1)
}
  0x23   :  { %34 = dma.hbm_to_vmem [thread:$0]  %s8185_s2, 4096, %s6146_s16, [#allocation4], %s6081_s25, %s6081_s25, %s6082_s26  }
  0x24   :  { %s6083_s19 = smov [#allocation8]   ;;  %s6084_s21 = smov [#allocation9]  }
  0x25   :  { %s54_s20 = sshll.u32 %s6083_s19, 4  ;;  %s67_s22 = sshll.u32 %s6084_s21, 4  ;;  %s55_s20 = int_to_ptr.vmem [resolvable:$true] %s54_s20  ;;  %s68_s22 = int_to_ptr.vmem [resolvable:$true] %s67_s22 }
  0x26   :  { %s6005_s27 = scalar_lea.hbm %s8188_s5, 4096 }
  0x27   :  { %p6006_p2 = scmp.ne.s32.totalorder %s8188_s5, %s6005_s27  ;;  %p6009_p3 = scmp.lt.u32.totalorder %s6005_s27, %s8188_s5 }
  0x29   :  { %p6011_p4 = pnand %p6009_p3, %p6006_p2 }
  0x2b   :  { %6014 = shalt.err (!%p6011_p4)
}
  0x2c   :  { %s6015_s2 = scalar_lea.vmem %s55_s20, 4096  ;;  %p6020_p6 = scmp.lt.s32.totalorder %s55_s20, %s55_s20 }
  0x2d   :  { %p6016_p5 = scmp.ne.s32.totalorder %s55_s20, %s6015_s2  ;;  %p6021_p7 = scmp.lt.s32.totalorder %s6015_s2, %s6015_s2 }
  0x2f   :  { %p6022_p8 = por %p6021_p7, %p6020_p6 }
  0x31   :  { %p6023_p9 = pnand %p6022_p8, %p6016_p5 }
  0x33   :  { %6026 = shalt.err (!%p6023_p9)
}
  0x34   :  { %60 = dma.hbm_to_vmem [thread:$0]  %s8188_s5, 4096, %s55_s20, [#allocation7], %s6081_s25, %s6081_s25, %s6082_s26  }
  0x35   :  { %s6027_s17 = scalar_lea.hbm %s8189_s6, 64 }
  0x36   :  { %p6028_p10 = scmp.ne.s32.totalorder %s8189_s6, %s6027_s17  ;;  %p6031_p11 = scmp.lt.u32.totalorder %s6027_s17, %s8189_s6 }
  0x38   :  { %p6033_p12 = pnand %p6031_p11, %p6028_p10 }
  0x3a   :  { %6036 = shalt.err (!%p6033_p12)
}
  0x3b   :  { %s6037_s21 = scalar_lea.vmem %s68_s22, 64  ;;  %p6042_p0 = scmp.lt.s32.totalorder %s68_s22, %s68_s22 }
  0x3c   :  { %p6038_p13 = scmp.ne.s32.totalorder %s68_s22, %s6037_s21  ;;  %p6043_p1 = scmp.lt.s32.totalorder %s6037_s21, %s6037_s21 }
  0x3e   :  { %p6044_p2 = por %p6043_p1, %p6042_p0 }
  0x40   :  { %p6045_p3 = pnand %p6044_p2, %p6038_p13 }
  0x42   :  { %6048 = shalt.err (!%p6045_p3)
}
  0x43   :  { %70 = dma.hbm_to_vmem [thread:$0]  %s8189_s6, 64, %s68_s22, [#allocation10]  }
  0x44   :  { %6071 = dma.done.wait [#allocation4], 4096  }
  0x45   :  { %6072 = vsyncadd [#allocation4], 4294963200 }
  0x46   :  { %6073 = dma.done.wait [#allocation7], 8192  }
  0x47   :  { %6074 = vsyncadd [#allocation7], 4294959104 }
  0x48   :  { %6075 = dma.done.wait [#allocation10], 64  }
  0x49   :  { %6076 = vsyncadd [#allocation10], 4294967232  ;;  %v8194_v0 = vmov 0   ;;  %v5021_v1 = vld [vmem:[%s8184_s1 + $0x4] ss:$16 sps:$4 sm:$0xff]   ;;  %vm192_vm0 = vcmask 130048  }
  0x4a   :  { %249 = vmatprep.mubr.bf16.mxu0 %v8194_v0  ;;  %309 = vmatprep.mubr.bf16.mxu1 %v8194_v0  ;;  %v5023_v2 = vld [vmem:[%s8184_s1] ss:$16 sps:$4 sm:$0xff]   ;;  %v5026_v5 = vld [vmem:[%s8184_s1 + $0x8] ss:$16 sps:$4 sm:$0xff]   ;;  %v5028_v6 = vld [vmem:[%s8184_s1 + $0xc] ss:$16 sps:$4 sm:$0xff]  }
  0x4b   :  { %217 = vmatprep.subr.bf16.mxu0 %v5021_v1  ;;  %4815 = vmatprep.subr.bf16.mxu1 %v5021_v1  ;;  %v5024_v3 = vld [vmem:[%s8183_s0] sm:$0xff]   ;;  %v6224_v4 = vld [vmem:[%s8183_s0 + $0x30] sm:$0xff]   ;;  %v5029_v7 = vld [vmem:[%s8183_s0 + $0x8] sm:$0xff]   ;;  %vm6087_vm1 = vmmov 0   ;;  %s6088_s19 = smov [#allocation11]  }
  0x4c   :  { %218 = vmatpush1.bf16.msra.mxu0 %v5023_v2  ;;  %4816 = vmatpush1.bf16.msra.mxu1 %v5023_v2  ;;  %v6240_v8 = vld [vmem:[#allocation3 + $0x4] ss:$16 sps:$4 sm:$0xff]   ;;  %v6242_v9 = vld [vmem:[#allocation3 + $0xc] ss:$16 sps:$4 sm:$0xff]   ;;  %v6244_v10 = vld [vmem:[#allocation3] ss:$16 sps:$4 sm:$0xff]  }
  0x4d   :  { %330 = vmatprep.subr.bf16.mxu1 %v5028_v6  ;;  %v6249_v11 = vld [vmem:[%s8183_s0 + $0x38] sm:$0xff]   ;;  %803 = vmatprep.subr.bf16.mxu0 %v6240_v8  ;;  %v6254_v12 = vld [vmem:[#allocation3 + $0x24] ss:$16 sps:$4 sm:$0xff]   ;;  %v6256_v13 = vld [vmem:[#allocation3 + $0x20] ss:$16 sps:$4 sm:$0xff]   ;;  %s4535_s21 = sshll.u32 %s6088_s19, 4  ;;  %s4536_s21 = int_to_ptr.vmem [resolvable:$true] %s4535_s21 }
  0x4e   :  { %v6259_v14 = vld [vmem:[#allocation3 + $0x44] ss:$16 sps:$4 sm:$0xff]   ;;  %v6267_v15 = vld [vmem:[#allocation3 + $0x40] ss:$16 sps:$4 sm:$0xff]   ;;  %v6275_v18 = vld [vmem:[#allocation3 + $0x8] ss:$16 sps:$4 sm:$0xff]   ;;  %p6054_p5 = scmp.lt.s32.totalorder %s4536_s21, %s4536_s21 }
  0x4f   :  { %4568 = vmatmul.mubr.msk.bf16.vlgmr.msra.gmra.mrb[0].mxu0 %vm192_vm0, %v5024_v3  ;;  %4574 = vmatmul.mubr.msk.bf16.vlgmr.msra.gmra.mrb[0].mxu1 %vm192_vm0, %v6224_v4  ;;  %v6270_v16 = vld [vmem:[#allocation3 + $0x64] ss:$16 sps:$4 sm:$0xff]   ;;  %v6277_v19 = vld [vmem:[#allocation3 + $0x2c] ss:$16 sps:$4 sm:$0xff]   ;;  %v6281_v20 = vld [vmem:[#allocation3 + $0x60] ss:$16 sps:$4 sm:$0xff]  }
  0x50   :  { %259 = vmatprep.mubr.bf16.mxu0 %v8194_v0  ;;  %331 = vmatpush1.bf16.msra.mxu1 %v5026_v5  ;;  %v5031_v17 = vld [vmem:[%s8183_s0 + $0x10] sm:$0xff]   ;;  %v6289_v22 = vld [vmem:[#allocation3 + $0x28] ss:$16 sps:$4 sm:$0xff]   ;;  %v6293_v23 = vld [vmem:[#allocation3 + $0x4c] ss:$16 sps:$4 sm:$0xff]   ;;  %s6049_s5 = scalar_lea.vmem %s4536_s21, 256 }
  0x51   :  { %319 = vmatprep.mubr.bf16.mxu1 %v8194_v0  ;;  %846 = vmatprep.subr.bf16.mxu1 %v6242_v9  ;;  %v6285_v21 = vld [vmem:[#allocation3 + $0x84] ss:$16 sps:$4 sm:$0xff]   ;;  %v6296_v24 = vld [vmem:[#allocation3 + $0x80] ss:$16 sps:$4 sm:$0xff]   ;;  %v5041_v25 = vld [vmem:[%s8183_s0 + $0x18] sm:$0xff]   ;;  %p6050_p4 = scmp.ne.s32.totalorder %s4536_s21, %s6049_s5  ;;  %p6055_p6 = scmp.lt.s32.totalorder %s6049_s5, %s6049_s5 }
  0x52   :  { %804 = vmatpush1.bf16.msra.mxu0 %v6244_v10  ;;  %v6303_v26 = vld [vmem:[#allocation3 + $0x48] ss:$16 sps:$4 sm:$0xff]   ;;  %v6305_v27 = vld [vmem:[#allocation3 + $0xa4] ss:$16 sps:$4 sm:$0xff]   ;;  %v6308_v28 = vld [vmem:[#allocation3 + $0xa0] ss:$16 sps:$4 sm:$0xff]  }
  0x53   :  { %805 = vmatprep.subr.bf16.mxu0 %v6254_v12  ;;  %v6311_v29 = vld [vmem:[#allocation3 + $0x6c] ss:$16 sps:$4 sm:$0xff]   ;;  %v6315_v30 = vld [vmem:[#allocation3 + $0xc4] ss:$16 sps:$4 sm:$0xff]   ;;  %v6319_v31 = vld [vmem:[#allocation3 + $0xc0] ss:$16 sps:$4 sm:$0xff]   ;;  %p6056_p7 = por %p6055_p6, %p6054_p5 }
  0x54   :  { %v6321_v32 = vld [vmem:[#allocation3 + $0x68] ss:$16 sps:$4 sm:$0xff]   ;;  %v5051_v33 = vld [vmem:[%s8183_s0 + $0x20] sm:$0xff]   ;;  %v6328_v34 = vld [vmem:[#allocation3 + $0x8c] ss:$16 sps:$4 sm:$0xff]  }
  0x55   :  { %v6333_v35 = vld [vmem:[#allocation3 + $0xe4] ss:$16 sps:$4 sm:$0xff]   ;;  %v6335_v36 = vld [vmem:[#allocation3 + $0x88] ss:$16 sps:$4 sm:$0xff]   ;;  %v6337_v37 = vld [vmem:[#allocation3 + $0xe0] ss:$16 sps:$4 sm:$0xff]   ;;  %p6057_p8 = pnand %p6056_p7, %p6050_p4 }
  0x56   :  { %806 = vmatpush1.bf16.msra.mxu0 %v6256_v13  ;;  %v6339_v38 = vld [vmem:[#allocation3 + $0xac] ss:$16 sps:$4 sm:$0xff]   ;;  %v6346_v39 = vld [vmem:[#allocation3 + $0xa8] ss:$16 sps:$4 sm:$0xff]   ;;  %v6388_v45 = vld [vmem:[#allocation8 + $0x4] ss:$16 sps:$4 sm:$0xff]  }
  0x57   :  { %4569 = vmatmul.mubr.msk.bf16.gmra.mrb[4].mxu0 %vm192_vm0, %v5029_v7  ;;  %4575 = vmatmul.mubr.msk.bf16.gmra.mrb[4].mxu1 %vm192_vm0, %v6249_v11  ;;  %v6350_v40 = vld [vmem:[#allocation3 + $0xcc] ss:$16 sps:$4 sm:$0xff]   ;;  %v6359_v42 = vld [vmem:[#allocation3 + $0xc8] ss:$16 sps:$4 sm:$0xff]   ;;  %v6392_v47 = vld [vmem:[#allocation8] ss:$16 sps:$4 sm:$0xff]  }
  0x58   :  { %269 = vmatprep.mubr.bf16.mxu0 %v8194_v0  ;;  %362 = vmatprep.mubr.bf16.mxu1 %v8194_v0  ;;  %v5061_v41 = vld [vmem:[%s8183_s0 + $0x28] sm:$0xff]   ;;  %v6400_v49 = vld [vmem:[#allocation8 + $0x24] ss:$16 sps:$4 sm:$0xff]   ;;  %v6404_v51 = vld [vmem:[#allocation8 + $0x20] ss:$16 sps:$4 sm:$0xff]  }
  0x59   :  { %807 = vmatprep.subr.bf16.mxu0 %v6259_v14  ;;  %v6361_v43 = vld [vmem:[#allocation3 + $0xec] ss:$16 sps:$4 sm:$0xff]   ;;  %v6367_v44 = vld [vmem:[#allocation3 + $0xe8] ss:$16 sps:$4 sm:$0xff]   ;;  %v6412_v53 = vld [vmem:[#allocation8 + $0x44] ss:$16 sps:$4 sm:$0xff]  }
  0x5a   :  { %808 = vmatpush1.bf16.msra.mxu0 %v6267_v15  ;;  %v6390_v46 = vld [vmem:[#allocation8 + $0xc] ss:$16 sps:$4 sm:$0xff]   ;;  %v6394_v48 = vld [vmem:[#allocation8 + $0x8] ss:$16 sps:$4 sm:$0xff]   ;;  %v6416_v55 = vld [vmem:[#allocation8 + $0x40] ss:$16 sps:$4 sm:$0xff]  }
  0x5b   :  { %809 = vmatprep.subr.bf16.mxu0 %v6270_v16  ;;  %v6402_v50 = vld [vmem:[#allocation8 + $0x2c] ss:$16 sps:$4 sm:$0xff]   ;;  %v6406_v52 = vld [vmem:[#allocation8 + $0x28] ss:$16 sps:$4 sm:$0xff]   ;;  %v6424_v57 = vld [vmem:[#allocation8 + $0x64] ss:$16 sps:$4 sm:$0xff]  }
  0x5c   :  { %v6414_v54 = vld [vmem:[#allocation8 + $0x4c] ss:$16 sps:$4 sm:$0xff]   ;;  %v6418_v56 = vld [vmem:[#allocation8 + $0x48] ss:$16 sps:$4 sm:$0xff]   ;;  %8515 = vst [vmem:[#allocation16_spill] sm:$0xff] %v6424_v57 }
  0x5d   :  { %v6426_v58 = vld [vmem:[#allocation8 + $0x6c] ss:$16 sps:$4 sm:$0xff]   ;;  %v6428_v59 = vld [vmem:[#allocation8 + $0x60] ss:$16 sps:$4 sm:$0xff]   ;;  %v6430_v60 = vld [vmem:[#allocation8 + $0x68] ss:$16 sps:$4 sm:$0xff]  }
  0x5e   :  { %810 = vmatpush1.bf16.msra.mxu0 %v6281_v20  ;;  %8516 = vst [vmem:[#allocation17_spill] sm:$0xff] %v6426_v58  ;;  %8517 = vst [vmem:[#allocation18_spill] sm:$0xff] %v6428_v59  ;;  %v6436_v61 = vld [vmem:[#allocation8 + $0x84] ss:$16 sps:$4 sm:$0xff]   ;;  %v6438_v62 = vld [vmem:[#allocation8 + $0x8c] ss:$16 sps:$4 sm:$0xff]  }
  0x5f   :  { %4570 = vmatmul.mubr.msk.bf16.gmra.mrb[8].mxu0 %vm192_vm0, %v5031_v17  ;;  %4576 = vmatmul.mubr.msk.bf16.vlgmr.msra.gmra.mrb[8].mxu1 %vm192_vm0, %v5024_v3  ;;  %8518 = vst [vmem:[#allocation19_spill] sm:$0xff] %v6430_v60  ;;  %8519 = vst [vmem:[#allocation20_spill] sm:$0xff] %v6436_v61  ;;  %v6440_v63 = vld [vmem:[#allocation8 + $0x80] ss:$16 sps:$4 sm:$0xff]   ;;  %v6442_v1 = vld [vmem:[#allocation8 + $0x88] ss:$16 sps:$4 sm:$0xff]  }
  0x60   :  { %847 = vmatpush1.bf16.msra.mxu1 %v6275_v18  ;;  %279 = vmatprep.mubr.bf16.mxu0 %v8194_v0  ;;  %8520 = vst [vmem:[#allocation21_spill] sm:$0xff] %v6438_v62  ;;  %8521 = vst [vmem:[#allocation22_spill] sm:$0xff] %v6440_v63  ;;  %v6448_v2 = vld [vmem:[#allocation8 + $0xa4] ss:$16 sps:$4 sm:$0xff]   ;;  %v6450_v3 = vld [vmem:[#allocation8 + $0xac] ss:$16 sps:$4 sm:$0xff]  }
  0x61   :  { %372 = vmatprep.mubr.bf16.mxu1 %v8194_v0  ;;  %848 = vmatprep.subr.bf16.mxu1 %v6277_v19  ;;  %8522 = vst [vmem:[#allocation23_spill] sm:$0xff] %v6442_v1  ;;  %8523 = vst [vmem:[#allocation24_spill] sm:$0xff] %v6448_v2  ;;  %v6454_v5 = vld [vmem:[#allocation8 + $0xa8] ss:$16 sps:$4 sm:$0xff]   ;;  %v6460_v6 = vld [vmem:[#allocation8 + $0xc4] ss:$16 sps:$4 sm:$0xff]  }
  0x62   :  { %811 = vmatprep.subr.bf16.mxu0 %v6285_v21  ;;  %8524 = vst [vmem:[#allocation25_spill] sm:$0xff] %v6450_v3  ;;  %8526 = vst [vmem:[#allocation27_spill] sm:$0xff] %v6454_v5 }
  0x63   :  { %812 = vmatpush1.bf16.msra.mxu0 %v6296_v24  ;;  %8527 = vst [vmem:[#allocation28_spill] sm:$0xff] %v6460_v6 }
  0x64   :  { %849 = vmatpush1.bf16.msra.mxu1 %v6289_v22  ;;  %813 = vmatprep.subr.bf16.mxu0 %v6305_v27 }
  0x65   :  { %850 = vmatprep.subr.bf16.mxu1 %v6293_v23 }
  0x67   :  { %4571 = vmatmul.mubr.msk.bf16.gmra.mrb[12].mxu0 %vm192_vm0, %v5041_v25  ;;  %4577 = vmatmul.mubr.msk.bf16.gmra.mrb[12].mxu1 %vm192_vm0, %v5029_v7  ;;  %v6462_v7 = vld [vmem:[#allocation8 + $0xcc] ss:$16 sps:$4 sm:$0xff]  }
  0x68   :  { %289 = vmatprep.mubr.bf16.mxu0 %v8194_v0  ;;  %382 = vmatprep.mubr.bf16.mxu1 %v8194_v0  ;;  %8528 = vst [vmem:[#allocation29_spill] sm:$0xff] %v6462_v7 }
  0x69   :  { %851 = vmatpush1.bf16.msra.mxu1 %v6303_v26  ;;  %814 = vmatpush1.bf16.msra.mxu0 %v6308_v28 }
  0x6a   :  { %852 = vmatprep.subr.bf16.mxu1 %v6311_v29  ;;  %815 = vmatprep.subr.bf16.mxu0 %v6315_v30 }
  0x6d   :  { %853 = vmatpush1.bf16.msra.mxu1 %v6321_v32  ;;  %816 = vmatpush1.bf16.msra.mxu0 %v6319_v31 }
  0x6e   :  { %854 = vmatprep.subr.bf16.mxu1 %v6328_v34  ;;  %817 = vmatprep.subr.bf16.mxu0 %v6333_v35 }
  0x6f   :  { %4572 = vmatmul.mubr.msk.bf16.gmra.mrb[16].mxu0 %vm192_vm0, %v5051_v33  ;;  %4578 = vmatmul.mubr.msk.bf16.gmra.mrb[16].mxu1 %vm192_vm0, %v5031_v17  ;;  %v6466_v17 = vld [vmem:[#allocation8 + $0xc8] ss:$16 sps:$4 sm:$0xff]  }
  0x70   :  { %299 = vmatprep.mubr.bf16.mxu0 %v8194_v0  ;;  %392 = vmatprep.mubr.bf16.mxu1 %v8194_v0  ;;  %8530 = vst [vmem:[#allocation31_spill] sm:$0xff] %v6466_v17 }
  0x71   :  { %855 = vmatpush1.bf16.msra.mxu1 %v6335_v36  ;;  %818 = vmatpush1.bf16.msra.mxu0 %v6337_v37 }
  0x72   :  { %856 = vmatprep.subr.bf16.mxu1 %v6339_v38  ;;  %1106 = vmatprep.subr.bf16.mxu0 %v6388_v45 }
  0x75   :  { %857 = vmatpush1.bf16.msra.mxu1 %v6346_v39 }
  0x76   :  { %858 = vmatprep.subr.bf16.mxu1 %v6350_v40 }
  0x77   :  { %4573 = vmatmul.mubr.msk.bf16.gmra.mrb[20].mxu0 %vm192_vm0, %v5061_v41  ;;  %4579 = vmatmul.mubr.msk.bf16.gmra.mrb[20].mxu1 %vm192_vm0, %v5041_v25  ;;  %v6472_v25 = vld [vmem:[#allocation8 + $0xe4] ss:$16 sps:$4 sm:$0xff]  }
  0x78   :  { %402 = vmatprep.mubr.bf16.mxu1 %v8194_v0  ;;  %835 = vmatprep.mubr.bf16.mxu0 %v8194_v0  ;;  %8531 = vst [vmem:[#allocation32_spill] sm:$0xff] %v6472_v25 }
  0x79   :  { %859 = vmatpush1.bf16.msra.mxu1 %v6359_v42 }
  0x7a   :  { %860 = vmatprep.subr.bf16.mxu1 %v6361_v43 }
  0x7d   :  { %861 = vmatpush1.bf16.msra.mxu1 %v6367_v44 }
  0x7e   :  { %1149 = vmatprep.subr.bf16.mxu1 %v6390_v46 }
  0x7f   :  { %4580 = vmatmul.mubr.msk.bf16.gmra.mrb[24].mxu1 %vm192_vm0, %v5051_v33  ;;  %836 = vmatmul.mubr.bf16.vlgmr.msra.gmra.mrb[0].mxu0 %v8194_v0  ;;  %v6474_v33 = vld [vmem:[#allocation8 + $0xec] ss:$16 sps:$4 sm:$0xff]  }
  0x80   :  { %412 = vmatprep.mubr.bf16.mxu1 %v8194_v0  ;;  %1138 = vmatprep.mubr.bf16.mxu0 %v8194_v0  ;;  %8532 = vst [vmem:[#allocation33_spill] sm:$0xff] %v6474_v33 }
  0x81   :  { %1107 = vmatpush1.bf16.msra.mxu0 %v6392_v47 }
  0x82   :  { %1108 = vmatprep.subr.bf16.mxu0 %v6400_v49 }
  0x85   :  { %1109 = vmatpush1.bf16.msra.mxu0 %v6404_v51 }
  0x86   :  { %1110 = vmatprep.subr.bf16.mxu0 %v6412_v53 }
  0x87   :  { %4581 = vmatmul.mubr.msk.bf16.gmra.mrb[28].mxu1 %vm192_vm0, %v5061_v41  ;;  %v6476_v41 = vld [vmem:[#allocation8 + $0xe0] ss:$16 sps:$4 sm:$0xff]  }
  0x88   :  { %422 = vmatprep.mubr.bf16.mxu1 %v8194_v0  ;;  %8533 = vst [vmem:[#allocation34_spill] sm:$0xff] %v6476_v41 }
  0x89   :  { %1111 = vmatpush1.bf16.msra.mxu0 %v6416_v55 }
  0x8a   :  { %1112 = vmatprep.subr.bf16.mxu0 %v6424_v57 }
  0x8d   :  { %1113 = vmatpush1.bf16.msra.mxu0 %v6428_v59 }
  0x8e   :  { %1114 = vmatprep.subr.bf16.mxu0 %v6436_v61 }
  0x8f   :  { %4582 = vmatmul.mubr.msk.bf16.gmra.mrb[32].mxu1 %vm192_vm0, %v6224_v4  ;;  %v6452_v4 = vld [vmem:[#allocation8 + $0xa0] ss:$16 sps:$4 sm:$0xff]  }
  0x90   :  { %432 = vmatprep.mubr.bf16.mxu1 %v8194_v0  ;;  %8525 = vst [vmem:[#allocation26_spill] sm:$0xff] %v6452_v4 }
  0x91   :  { %1115 = vmatpush1.bf16.msra.mxu0 %v6440_v63 }
  0x92   :  { %1116 = vmatprep.subr.bf16.mxu0 %v6448_v2 }
  0x95   :  { %1117 = vmatpush1.bf16.msra.mxu0 %v6452_v4  ;;  %v6556_v4 = vld [vmem:[#allocation6 + $0xc4] ss:$16 sps:$4 sm:$0xff]  }
  0x96   :  { %1118 = vmatprep.subr.bf16.mxu0 %v6460_v6  ;;  %v6490_v6 = vld [vmem:[#allocation6 + $0x8] ss:$16 sps:$4 sm:$0xff]   ;;  %8560 = vst [vmem:[#allocation60_spill] sm:$0xff] %v6556_v4 }
  0x97   :  { %4583 = vmatmul.mubr.msk.bf16.gmra.mrb[36].mxu1 %vm192_vm0, %v6249_v11  ;;  %v6464_v11 = vld [vmem:[#allocation8 + $0xc0] ss:$16 sps:$4 sm:$0xff]   ;;  %8538 = vst [vmem:[#allocation39_spill] sm:$0xff] %v6490_v6 }
  0x98   :  { %878 = vmatprep.mubr.bf16.mxu1 %v8194_v0  ;;  %8529 = vst [vmem:[#allocation30_spill] sm:$0xff] %v6464_v11 }
  0x99   :  { %1119 = vmatpush1.bf16.msra.mxu0 %v6464_v11  ;;  %v6486_v11 = vld [vmem:[#allocation6 + $0xc] ss:$16 sps:$4 sm:$0xff]  }
  0x9a   :  { %1120 = vmatprep.subr.bf16.mxu0 %v6472_v25  ;;  %8536 = vst [vmem:[#allocation37_spill] sm:$0xff] %v6486_v11  ;;  %v6504_v25 = vld [vmem:[#allocation6 + $0x28] ss:$16 sps:$4 sm:$0xff]  }
  0x9b   :  { %8543 = vst [vmem:[#allocation43_spill] sm:$0xff] %v6504_v25 }
  0x9d   :  { %1121 = vmatpush1.bf16.msra.mxu0 %v6476_v41  ;;  %v6500_v41 = vld [vmem:[#allocation6 + $0x2c] ss:$16 sps:$4 sm:$0xff]  }
  0x9e   :  { %8541 = vst [vmem:[#allocation41_spill] sm:$0xff] %v6500_v41 }
  0x9f   :  { %879 = vmatmul.mubr.bf16.vlgmr.msra.gmra.mrb[8].mxu1 %v8194_v0 }
  0xa0   :  { %1181 = vmatprep.mubr.bf16.mxu1 %v8194_v0  ;;  %1150 = vmatpush1.bf16.msra.mxu1 %v6394_v48  ;;  %v6478_v0 = vld [vmem:[#allocation8 + $0xe8] ss:$16 sps:$4 sm:$0xff]  }
  0xa1   :  { %1151 = vmatprep.subr.bf16.mxu1 %v6402_v50  ;;  %8534 = vst [vmem:[#allocation35_spill] sm:$0xff] %v6478_v0 }
  0xa4   :  { %1152 = vmatpush1.bf16.msra.mxu1 %v6406_v52 }
  0xa5   :  { %1153 = vmatprep.subr.bf16.mxu1 %v6414_v54 }
  0xa8   :  { %1154 = vmatpush1.bf16.msra.mxu1 %v6418_v56 }
  0xa9   :  { %1155 = vmatprep.subr.bf16.mxu1 %v6426_v58 }
  0xac   :  { %1156 = vmatpush1.bf16.msra.mxu1 %v6430_v60 }
  0xad   :  { %1157 = vmatprep.subr.bf16.mxu1 %v6438_v62 }
  0xb0   :  { %1158 = vmatpush1.bf16.msra.mxu1 %v6442_v1 }
  0xb1   :  { %1159 = vmatprep.subr.bf16.mxu1 %v6450_v3  ;;  %v6558_v3 = vld [vmem:[#allocation6 + $0xcc] ss:$16 sps:$4 sm:$0xff]  }
  0xb2   :  { %8561 = vst [vmem:[#allocation61_spill] sm:$0xff] %v6558_v3 }
  0xb4   :  { %1160 = vmatpush1.bf16.msra.mxu1 %v6454_v5  ;;  %v8539_v5 = vmov 0  }
  0xb5   :  { %1161 = vmatprep.subr.bf16.mxu1 %v6462_v7  ;;  %v6484_v7 = vld [vmem:[#allocation6 + $0x4] ss:$16 sps:$4 sm:$0xff]   ;;  %1139 = vmatmul.mubr.bf16.vlgmr.msra.gmra.mrb[24].mxu0 %v8539_v5 }
  0xb6   :  { %8535 = vst [vmem:[#allocation36_spill] sm:$0xff] %v6484_v7  ;;  %1352 = vmatprep.subr.bf16.mxu0 %v6484_v7  ;;  %1384 = vmatprep.mubr.bf16.mxu0 %v8539_v5  ;;  %v6518_v7 = vld [vmem:[#allocation6 + $0x48] ss:$16 sps:$4 sm:$0xff]  }
  0xb7   :  { %8547 = vst [vmem:[#allocation47_spill] sm:$0xff] %v6518_v7 }
  0xb8   :  { %1162 = vmatpush1.bf16.msra.mxu1 %v6466_v17  ;;  %v6488_v17 = vld [vmem:[#allocation6] ss:$16 sps:$4 sm:$0xff]  }
  0xb9   :  { %1163 = vmatprep.subr.bf16.mxu1 %v6474_v33  ;;  %8537 = vst [vmem:[#allocation38_spill] sm:$0xff] %v6488_v17  ;;  %1353 = vmatpush1.bf16.msra.mxu0 %v6488_v17  ;;  %v6502_v33 = vld [vmem:[#allocation6 + $0x20] ss:$16 sps:$4 sm:$0xff]   ;;  %v6514_v17 = vld [vmem:[#allocation6 + $0x4c] ss:$16 sps:$4 sm:$0xff]  }
  0xba   :  { %8542 = vst [vmem:[#allocation42_spill] sm:$0xff] %v6502_v33  ;;  %8545 = vst [vmem:[#allocation45_spill] sm:$0xff] %v6514_v17 }
  0xbc   :  { %1164 = vmatpush1.bf16.msra.mxu1 %v6478_v0  ;;  %v6498_v0 = vld [vmem:[#allocation6 + $0x24] ss:$16 sps:$4 sm:$0xff]  }
  0xbd   :  { %1395 = vmatprep.subr.bf16.mxu1 %v6486_v11  ;;  %8540 = vst [vmem:[#allocation40_spill] sm:$0xff] %v6498_v0  ;;  %1354 = vmatprep.subr.bf16.mxu0 %v6498_v0  ;;  %v6516_v11 = vld [vmem:[#allocation6 + $0x40] ss:$16 sps:$4 sm:$0xff]   ;;  %v6530_v0 = vld [vmem:[#allocation6 + $0x68] ss:$16 sps:$4 sm:$0xff]  }
  0xbe   :  { %1355 = vmatpush1.bf16.msra.mxu0 %v6502_v33  ;;  %8546 = vst [vmem:[#allocation46_spill] sm:$0xff] %v6516_v11  ;;  %v6526_v33 = vld [vmem:[#allocation6 + $0x6c] ss:$16 sps:$4 sm:$0xff]   ;;  %8551 = vst [vmem:[#allocation51_spill] sm:$0xff] %v6530_v0 }
  0xbf   :  { %1182 = vmatmul.mubr.bf16.vlgmr.msra.gmra.mrb[40].mxu1 %v8539_v5  ;;  %8549 = vst [vmem:[#allocation49_spill] sm:$0xff] %v6526_v33 }
  0xc0   :  { %1396 = vmatpush1.bf16.msra.mxu1 %v6490_v6  ;;  %1427 = vmatprep.mubr.bf16.mxu1 %v8539_v5  ;;  %v6512_v6 = vld [vmem:[#allocation6 + $0x44] ss:$16 sps:$4 sm:$0xff]  }
  0xc1   :  { %1397 = vmatprep.subr.bf16.mxu1 %v6500_v41  ;;  %8544 = vst [vmem:[#allocation44_spill] sm:$0xff] %v6512_v6  ;;  %1356 = vmatprep.subr.bf16.mxu0 %v6512_v6  ;;  %v6524_v41 = vld [vmem:[#allocation6 + $0x64] ss:$16 sps:$4 sm:$0xff]   ;;  %v6542_v6 = vld [vmem:[#allocation6 + $0x88] ss:$16 sps:$4 sm:$0xff]  }
  0xc2   :  { %1357 = vmatpush1.bf16.msra.mxu0 %v6516_v11  ;;  %8548 = vst [vmem:[#allocation48_spill] sm:$0xff] %v6524_v41  ;;  %v6538_v11 = vld [vmem:[#allocation6 + $0x8c] ss:$16 sps:$4 sm:$0xff]   ;;  %8555 = vst [vmem:[#allocation55_spill] sm:$0xff] %v6542_v6 }
  0xc3   :  { %1358 = vmatprep.subr.bf16.mxu0 %v6524_v41  ;;  %8553 = vst [vmem:[#allocation53_spill] sm:$0xff] %v6538_v11  ;;  %v6554_v41 = vld [vmem:[#allocation6 + $0xa8] ss:$16 sps:$4 sm:$0xff]  }
  0xc4   :  { %1398 = vmatpush1.bf16.msra.mxu1 %v6504_v25  ;;  %v6528_v25 = vld [vmem:[#allocation6 + $0x60] ss:$16 sps:$4 sm:$0xff]   ;;  %8559 = vst [vmem:[#allocation59_spill] sm:$0xff] %v6554_v41 }
  0xc5   :  { %1399 = vmatprep.subr.bf16.mxu1 %v6514_v17  ;;  %8550 = vst [vmem:[#allocation50_spill] sm:$0xff] %v6528_v25  ;;  %v6536_v17 = vld [vmem:[#allocation6 + $0x84] ss:$16 sps:$4 sm:$0xff]  }
  0xc6   :  { %1359 = vmatpush1.bf16.msra.mxu0 %v6528_v25  ;;  %8552 = vst [vmem:[#allocation52_spill] sm:$0xff] %v6536_v17  ;;  %v6550_v25 = vld [vmem:[#allocation6 + $0xac] ss:$16 sps:$4 sm:$0xff]  }
  0xc7   :  { %1360 = vmatprep.subr.bf16.mxu0 %v6536_v17  ;;  %8557 = vst [vmem:[#allocation57_spill] sm:$0xff] %v6550_v25  ;;  %v6572_v17 = vld [vmem:[#allocation6 + $0xec] ss:$16 sps:$4 sm:$0xff]  }
  0xc8   :  { %1400 = vmatpush1.bf16.msra.mxu1 %v6518_v7  ;;  %v6540_v7 = vld [vmem:[#allocation6 + $0x80] ss:$16 sps:$4 sm:$0xff]   ;;  %8565 = vst [vmem:[#allocation65_spill] sm:$0xff] %v6572_v17 }
  0xc9   :  { %1401 = vmatprep.subr.bf16.mxu1 %v6526_v33  ;;  %8554 = vst [vmem:[#allocation54_spill] sm:$0xff] %v6540_v7  ;;  %v6548_v33 = vld [vmem:[#allocation6 + $0xa4] ss:$16 sps:$4 sm:$0xff]  }
  0xca   :  { %1361 = vmatpush1.bf16.msra.mxu0 %v6540_v7  ;;  %8556 = vst [vmem:[#allocation56_spill] sm:$0xff] %v6548_v33  ;;  %v6566_v7 = vld [vmem:[#allocation6 + $0xc8] ss:$16 sps:$4 sm:$0xff]  }
  0xcb   :  { %1362 = vmatprep.subr.bf16.mxu0 %v6548_v33  ;;  %8563 = vst [vmem:[#allocation63_spill] sm:$0xff] %v6566_v7 }
  0xcc   :  { %1402 = vmatpush1.bf16.msra.mxu1 %v6530_v0  ;;  %v6552_v0 = vld [vmem:[#allocation6 + $0xa0] ss:$16 sps:$4 sm:$0xff]  }
  0xcd   :  { %1403 = vmatprep.subr.bf16.mxu1 %v6538_v11  ;;  %8558 = vst [vmem:[#allocation58_spill] sm:$0xff] %v6552_v0  ;;  %v6570_v11 = vld [vmem:[#allocation6 + $0xe4] ss:$16 sps:$4 sm:$0xff]  }
  0xce   :  { %1363 = vmatpush1.bf16.msra.mxu0 %v6552_v0  ;;  %8564 = vst [vmem:[#allocation64_spill] sm:$0xff] %v6570_v11  ;;  %v6578_v0 = vld [vmem:[#allocation6 + $0xe8] ss:$16 sps:$4 sm:$0xff]  }
  0xcf   :  { %1364 = vmatprep.subr.bf16.mxu0 %v6556_v4  ;;  %8567 = vst [vmem:[#allocation67_spill] sm:$0xff] %v6578_v0 }
  0xd0   :  { %1404 = vmatpush1.bf16.msra.mxu1 %v6542_v6  ;;  %v6564_v6 = vld [vmem:[#allocation6 + $0xc0] ss:$16 sps:$4 sm:$0xff]  }
  0xd1   :  { %1405 = vmatprep.subr.bf16.mxu1 %v6550_v25  ;;  %8562 = vst [vmem:[#allocation62_spill] sm:$0xff] %v6564_v6  ;;  %v6576_v25 = vld [vmem:[#allocation6 + $0xe0] ss:$16 sps:$4 sm:$0xff]  }
  0xd2   :  { %1365 = vmatpush1.bf16.msra.mxu0 %v6564_v6  ;;  %8566 = vst [vmem:[#allocation66_spill] sm:$0xff] %v6576_v25 }
  0xd3   :  { %1366 = vmatprep.subr.bf16.mxu0 %v6570_v11 }
  0xd4   :  { %1406 = vmatpush1.bf16.msra.mxu1 %v6554_v41 }
  0xd5   :  { %1407 = vmatprep.subr.bf16.mxu1 %v6558_v3 }
  0xd6   :  { %1367 = vmatpush1.bf16.msra.mxu0 %v6576_v25 }
  0xd7   :  { %1531 = vmatprep.subr.bf16.mxu0 %v6240_v8 }
  0xd8   :  { %1408 = vmatpush1.bf16.msra.mxu1 %v6566_v7 }
  0xd9   :  { %1409 = vmatprep.subr.bf16.mxu1 %v6572_v17 }
  0xdc   :  { %1410 = vmatpush1.bf16.msra.mxu1 %v6578_v0  ;;  %v112_v0 = vlaneseq }
  0xdd   :  { %1574 = vmatprep.subr.bf16.mxu1 %v6242_v9 }
  0xde   :  { %v6602_v8 = vshrl.u32 %v112_v0, 7 }
 0x122   :  { %v6586_v3 = vpop.f32.mrb[0].mxu1 }
 0x123   :  { %8568 = vst [vmem:[#allocation68_spill] sm:$0xff] %v6586_v3  ;;  %v6588_v6 = vpop.f32.mrb[1].mxu1  ;;  %v8264_v3 = vsub.s32 0, %v6602_v8 }
 0x124   :  { %8569 = vst [vmem:[#allocation69_spill] sm:$0xff] %v6588_v6  ;;  %v6590_v7 = vpop.f32.mrb[2].mxu1 }
 0x125   :  { %8570 = vst [vmem:[#allocation70_spill] sm:$0xff] %v6590_v7  ;;  %v6592_v4 = vpop.f32.mrb[3].mxu1  ;;  %v110_v7 = vld [vmem:[%s8186_s3] sm:$0xf] }
 0x126   :  { %8571 = vst [vmem:[#allocation71_spill] sm:$0xff] %v6592_v4  ;;  %v8265_v4 = vsub.s32 1, %v6602_v8 }
 0x128   :  { %v6615_v0 = vrot.slane %v110_v7, %v8265_v4  ;;  %v8272_v4 = vsub.s32 2, %v6602_v8 }
 0x12a   :  { %v6594_v41 = vpop.f32.mrb[4].mxu1  ;;  %8577 = vst [vmem:[#allocation77_spill] sm:$0xff] %v6615_v0 }
 0x12b   :  { %8572 = vst [vmem:[#allocation72_spill] sm:$0xff] %v6594_v41  ;;  %v6596_v11 = vpop.f32.mrb[5].mxu1 }
 0x12c   :  { %8573 = vst [vmem:[#allocation73_spill] sm:$0xff] %v6596_v11  ;;  %v6598_v17 = vpop.f32.mrb[6].mxu1 }
 0x12d   :  { %8574 = vst [vmem:[#allocation74_spill] sm:$0xff] %v6598_v17  ;;  %v6600_v25 = vpop.f32.mrb[7].mxu1  ;;  %v6611_v17 = vrot.slane %v110_v7, %v8264_v3 }
 0x12e   :  { %8575 = vst [vmem:[#allocation75_spill] sm:$0xff] %v6600_v25 }
 0x12f   :  { %8576 = vst [vmem:[#allocation76_spill] sm:$0xff] %v6611_v17 }
 0x152   :  { %v837_v9 = vpop.f32.mrb[0].mxu0 }
 0x153   :  { %v839_v33 = vpop.f32.mrb[1].mxu0  ;;  %v4817_v25 = vadd.f32 %v837_v9, %v6611_v17  ;;  %v8273_v9 = vsub.s32 3, %v6602_v8 }
 0x154   :  { %v841_v41 = vpop.f32.mrb[2].mxu0  ;;  %v4818_v11 = vadd.f32 %v839_v33, %v6615_v0 }
 0x155   :  { %v843_v6 = vpop.f32.mrb[3].mxu0  ;;  %v4617_v1 = vmul.f32 -1.442695, %v4817_v25  ;;  %v4819_v63 = vadd.f32 %v841_v41, %v6611_v17  ;;  %v6625_v25 = vrot.slane %v110_v7, %v8272_v4 }
 0x156   :  { %v4820_v2 = vadd.f32 %v843_v6, %v6615_v0  ;;  %v4619_v62 = vmul.f32 -1.442695, %v4818_v11 }
 0x157   :  { %5187 = vpow2.f32 %v4617_v1  ;;  %v4618_v60 = vmul.f32 -1.442695, %v4819_v63  ;;  %8578 = vst [vmem:[#allocation78_spill] sm:$0xff] %v6625_v25 }
 0x158   :  { %v4620_v61 = vmul.f32 -1.442695, %v4820_v2  ;;  %5189 = vpow2.f32 %v4619_v62  ;;  %v6629_v62 = vrot.slane %v110_v7, %v8273_v9 }
 0x15a   :  { %5191 = vpow2.f32 %v4620_v61 }
 0x15b   :  { %5193 = vpow2.f32 %v4618_v60 }
 0x161   :  { %v5188_v3 = vpop.eup %5187 }
 0x162   :  { %v5190_v59 = vpop.eup %5189  ;;  %v903_v33 = vadd.f32 1.0, %v5188_v3 }
 0x163   :  { %v915_v6 = vadd.f32 1.0, %v5190_v59 }
 0x164   :  { %v5192_v58 = vpop.eup %5191  ;;  %5195 = vrcp.f32 %v903_v33 }
 0x165   :  { %v5194_v57 = vpop.eup %5193  ;;  %v916_v2 = vadd.f32 1.0, %v5192_v58  ;;  %5197 = vrcp.f32 %v915_v6 }
 0x166   :  { %v904_v60 = vadd.f32 1.0, %v5194_v57 }
 0x167   :  { %5199 = vrcp.f32 %v916_v2 }
 0x16e   :  { %v5196_v33 = vpop.eup %5195 }
 0x16f   :  { %v5198_v6 = vpop.eup %5197 }
 0x170   :  { %v935_v9 = vmul.f32 0.0, %v5198_v6 }
 0x172   :  { %v880_v61 = vpop.f32.mrb[8].mxu1 }
 0x173   :  { %v4857_v63 = vadd.f32 %v880_v61, %v6625_v25  ;;  %v882_v1 = vpop.f32.mrb[9].mxu1  ;;  %v5200_v61 = vpop.eup %5199 }
 0x174   :  { %v4858_v3 = vadd.f32 %v882_v1, %v6629_v62  ;;  %v884_v59 = vpop.f32.mrb[10].mxu1  ;;  %v936_v17 = vmul.f32 0.0, %v5200_v61 }
 0x175   :  { %5201 = vtanh.f32 %v4857_v63  ;;  %v4859_v11 = vadd.f32 %v884_v59, %v6625_v25  ;;  %v886_v41 = vpop.f32.mrb[11].mxu1 }
 0x176   :  { %5203 = vrcp.f32 %v904_v60  ;;  %v4621_v58 = vmul.f32 -1.442695, %v4858_v3  ;;  %v4860_v7 = vadd.f32 %v886_v41, %v6629_v62 }
 0x177   :  { %5205 = vtanh.f32 %v4859_v11 }
 0x178   :  { %5207 = vpow2.f32 %v4621_v58  ;;  %v4622_v57 = vmul.f32 -1.442695, %v4860_v7 }
 0x17a   :  { %5209 = vpow2.f32 %v4622_v57 }
 0x17f   :  { %v5202_v4 = vpop.eup %5201 }
 0x180   :  { %v5204_v2 = vpop.eup %5203  ;;  %v937_v1 = vmul.f32 %v5202_v4, %v5196_v33 }
 0x181   :  { %v5206_v0 = vpop.eup %5205 }
 0x182   :  { %v5208_v63 = vpop.eup %5207  ;;  %v6635_v59 = vadd.f32 %v937_v1, %v935_v9  ;;  %v938_v60 = vmul.f32 %v5206_v0, %v5204_v2  ;;  %v8605_v2 = vsub.s32 3, %v6602_v8 }
 0x183   :  { %v929_v3 = vadd.f32 1.0, %v5208_v63 }
 0x184   :  { %v5210_v25 = vpop.eup %5209  ;;  %5211 = vtanh.f32 %v6635_v59  ;;  %v6638_v11 = vadd.f32 %v938_v60, %v936_v17 }
 0x185   :  { %5213 = vrcp.f32 %v929_v3  ;;  %v930_v41 = vadd.f32 1.0, %v5210_v25 }
 0x186   :  { %5215 = vtanh.f32 %v6638_v11 }
 0x187   :  { %5217 = vrcp.f32 %v930_v41  ;;  %v8607_v41 = vsub.s32 2, %v6602_v8 }
 0x18e   :  { %v5212_v58 = vpop.eup %5211 }
 0x18f   :  { %v5214_v7 = vpop.eup %5213 }
 0x190   :  { %v5216_v4 = vpop.eup %5215  ;;  %v943_v33 = vmul.f32 %v5214_v7, %v5212_v58 }
 0x191   :  { %v5218_v57 = vpop.eup %5217 }
 0x192   :  { %v944_v6 = vmul.f32 %v5218_v57, %v5216_v4 }
 0x194   :  { %v945_v9 = vpack.c.bf16 %v944_v6, %v943_v33 }
 0x196   :  { %1385 = vmatmul.mubr.bf16.vlgmr.msra.gmra.mrb[24].mxu0 %v945_v9  ;;  %1428 = vmatmul.mubr.bf16.vlgmr.msra.gmra.mrb[40].mxu1 %v945_v9 }
 0x197   :  { %1532 = vmatpush1.bf16.msra.mxu0 %v6244_v10  ;;  %1575 = vmatpush1.bf16.msra.mxu1 %v6275_v18  ;;  %v8579_v10 = vld [vmem:[#allocation16_spill] sm:$0xff]  ;;  %v8585_v18 = vld [vmem:[#allocation22_spill] sm:$0xff] }
 0x198   :  { %1533 = vmatprep.subr.bf16.mxu0 %v6254_v12  ;;  %1576 = vmatprep.subr.bf16.mxu1 %v6277_v19  ;;  %v8580_v12 = vld [vmem:[#allocation17_spill] sm:$0xff]  ;;  %v8586_v19 = vld [vmem:[#allocation23_spill] sm:$0xff] }
 0x199   :  { %1563 = vmatprep.mubr.bf16.mxu0 %v8539_v5  ;;  %1606 = vmatprep.mubr.bf16.mxu1 %v8539_v5 }
 0x19b   :  { %1534 = vmatpush1.bf16.msra.mxu0 %v6256_v13  ;;  %1577 = vmatpush1.bf16.msra.mxu1 %v6289_v22  ;;  %v8581_v13 = vld [vmem:[#allocation18_spill] sm:$0xff] }
 0x19c   :  { %1535 = vmatprep.subr.bf16.mxu0 %v6259_v14  ;;  %1578 = vmatprep.subr.bf16.mxu1 %v6293_v23  ;;  %v8582_v14 = vld [vmem:[#allocation19_spill] sm:$0xff]  ;;  %v8589_v22 = vld [vmem:[#allocation26_spill] sm:$0xff] }
 0x19d   :  { %v8590_v23 = vld [vmem:[#allocation27_spill] sm:$0xff] }
 0x19f   :  { %1536 = vmatpush1.bf16.msra.mxu0 %v6267_v15  ;;  %1579 = vmatpush1.bf16.msra.mxu1 %v6303_v26  ;;  %v8583_v15 = vld [vmem:[#allocation20_spill] sm:$0xff]  ;;  %v8592_v26 = vld [vmem:[#allocation29_spill] sm:$0xff] }
 0x1a0   :  { %1537 = vmatprep.subr.bf16.mxu0 %v6270_v16  ;;  %1580 = vmatprep.subr.bf16.mxu1 %v6311_v29  ;;  %v8584_v16 = vld [vmem:[#allocation21_spill] sm:$0xff]  ;;  %v8595_v29 = vld [vmem:[#allocation32_spill] sm:$0xff] }
 0x1a3   :  { %1538 = vmatpush1.bf16.msra.mxu0 %v6281_v20  ;;  %1581 = vmatpush1.bf16.msra.mxu1 %v6321_v32  ;;  %v8587_v20 = vld [vmem:[#allocation24_spill] sm:$0xff]  ;;  %v8598_v32 = vld [vmem:[#allocation35_spill] sm:$0xff] }
 0x1a4   :  { %1539 = vmatprep.subr.bf16.mxu0 %v6285_v21  ;;  %1582 = vmatprep.subr.bf16.mxu1 %v6328_v34  ;;  %v8588_v21 = vld [vmem:[#allocation25_spill] sm:$0xff]  ;;  %v8599_v34 = vld [vmem:[#allocation36_spill] sm:$0xff] }
 0x1a7   :  { %1540 = vmatpush1.bf16.msra.mxu0 %v6296_v24  ;;  %1583 = vmatpush1.bf16.msra.mxu1 %v6335_v36  ;;  %v8591_v24 = vld [vmem:[#allocation28_spill] sm:$0xff]  ;;  %v603_v36 = vld [vmem:[#allocation9] sm:$0xf] }
 0x1a8   :  { %1541 = vmatprep.subr.bf16.mxu0 %v6305_v27  ;;  %1584 = vmatprep.subr.bf16.mxu1 %v6339_v38  ;;  %v8593_v27 = vld [vmem:[#allocation30_spill] sm:$0xff]  ;;  %v6722_v1 = vrot.slane %v603_v36, %v8605_v2  ;;  %v6727_v58 = vrot.slane %v603_v36, %v8607_v41 }
 0x1aa   :  { %8606 = vst [vmem:[#allocation18_spill] sm:$0xff] %v6722_v1  ;;  %8608 = vst [vmem:[#allocation19_spill] sm:$0xff] %v6727_v58 }
 0x1ab   :  { %1542 = vmatpush1.bf16.msra.mxu0 %v6308_v28  ;;  %1585 = vmatpush1.bf16.msra.mxu1 %v6346_v39  ;;  %v8594_v28 = vld [vmem:[#allocation31_spill] sm:$0xff]  ;;  %v8603_v39 = vsub.s32 1, %v6602_v8 }
 0x1ac   :  { %1543 = vmatprep.subr.bf16.mxu0 %v6315_v30  ;;  %1586 = vmatprep.subr.bf16.mxu1 %v6350_v40  ;;  %v8596_v30 = vld [vmem:[#allocation33_spill] sm:$0xff] }
 0x1ad   :  { %v6715_v40 = vrot.slane %v603_v36, %v8603_v39 }
 0x1af   :  { %1544 = vmatpush1.bf16.msra.mxu0 %v6319_v31  ;;  %1587 = vmatpush1.bf16.msra.mxu1 %v6359_v42  ;;  %v8597_v31 = vld [vmem:[#allocation34_spill] sm:$0xff]  ;;  %8604 = vst [vmem:[#allocation17_spill] sm:$0xff] %v6715_v40 }
 0x1b0   :  { %1545 = vmatprep.subr.bf16.mxu0 %v6333_v35  ;;  %1588 = vmatprep.subr.bf16.mxu1 %v6361_v43  ;;  %v8600_v35 = vld [vmem:[#allocation37_spill] sm:$0xff] }
 0x1b3   :  { %1546 = vmatpush1.bf16.msra.mxu0 %v6337_v37  ;;  %1589 = vmatpush1.bf16.msra.mxu1 %v6367_v44  ;;  %v8601_v37 = vsub.s32 0, %v6602_v8 }
 0x1b4   :  { %1675 = vmatprep.subr.bf16.mxu0 %v6388_v45  ;;  %1718 = vmatprep.subr.bf16.mxu1 %v6390_v46 }
 0x1b5   :  { %v6711_v38 = vrot.slane %v603_v36, %v8601_v37 }
 0x1b6   :  { %1564 = vmatmul.mubr.bf16.vlgmr.msra.gmra.mrb[4].mxu0 %v945_v9  ;;  %1607 = vmatmul.mubr.bf16.vlgmr.msra.gmra.mrb[12].mxu1 %v945_v9 }
 0x1b7   :  { %1676 = vmatpush1.bf16.msra.mxu0 %v6392_v47  ;;  %1719 = vmatpush1.bf16.msra.mxu1 %v6394_v48  ;;  %8602 = vst [vmem:[#allocation16_spill] sm:$0xff] %v6711_v38 }
 0x1b8   :  { %1677 = vmatprep.subr.bf16.mxu0 %v6400_v49  ;;  %1720 = vmatprep.subr.bf16.mxu1 %v6402_v50 }
 0x1b9   :  { %1707 = vmatprep.mubr.bf16.mxu0 %v8539_v5  ;;  %1750 = vmatprep.mubr.bf16.mxu1 %v8539_v5 }
 0x1bb   :  { %1678 = vmatpush1.bf16.msra.mxu0 %v6404_v51  ;;  %1721 = vmatpush1.bf16.msra.mxu1 %v6406_v52 }
 0x1bc   :  { %1679 = vmatprep.subr.bf16.mxu0 %v6412_v53  ;;  %1722 = vmatprep.subr.bf16.mxu1 %v6414_v54 }
 0x1bf   :  { %1680 = vmatpush1.bf16.msra.mxu0 %v6416_v55  ;;  %1723 = vmatpush1.bf16.msra.mxu1 %v6418_v56 }
 0x1c0   :  { %1681 = vmatprep.subr.bf16.mxu0 %v8579_v10  ;;  %1724 = vmatprep.subr.bf16.mxu1 %v8580_v12 }
 0x1c3   :  { %1682 = vmatpush1.bf16.msra.mxu0 %v8581_v13  ;;  %1725 = vmatpush1.bf16.msra.mxu1 %v8582_v14 }
 0x1c4   :  { %1683 = vmatprep.subr.bf16.mxu0 %v8583_v15  ;;  %1726 = vmatprep.subr.bf16.mxu1 %v8584_v16 }
 0x1c7   :  { %1684 = vmatpush1.bf16.msra.mxu0 %v8585_v18  ;;  %1727 = vmatpush1.bf16.msra.mxu1 %v8586_v19 }
 0x1c8   :  { %1685 = vmatprep.subr.bf16.mxu0 %v8587_v20  ;;  %1728 = vmatprep.subr.bf16.mxu1 %v8588_v21 }
 0x1cb   :  { %1686 = vmatpush1.bf16.msra.mxu0 %v8589_v22  ;;  %1729 = vmatpush1.bf16.msra.mxu1 %v8590_v23 }
 0x1cc   :  { %1687 = vmatprep.subr.bf16.mxu0 %v8591_v24  ;;  %1730 = vmatprep.subr.bf16.mxu1 %v8592_v26 }
 0x1cf   :  { %1688 = vmatpush1.bf16.msra.mxu0 %v8593_v27  ;;  %1731 = vmatpush1.bf16.msra.mxu1 %v8594_v28 }
 0x1d0   :  { %1689 = vmatprep.subr.bf16.mxu0 %v8595_v29  ;;  %1732 = vmatprep.subr.bf16.mxu1 %v8596_v30 }
 0x1d3   :  { %1690 = vmatpush1.bf16.msra.mxu0 %v8597_v31  ;;  %1733 = vmatpush1.bf16.msra.mxu1 %v8598_v32 }
 0x1d4   :  { %1761 = vmatprep.subr.bf16.mxu0 %v8599_v34  ;;  %1804 = vmatprep.subr.bf16.mxu1 %v8600_v35 }
 0x269   :  { %v1386_v42 = vpop.f32.mrb[24].mxu0  ;;  %v1429_v43 = vpop.f32.mrb[40].mxu1 }
 0x26a   :  { %v1438_v44 = vadd.f32 %v1386_v42, %v6711_v38  ;;  %v1388_v45 = vpop.f32.mrb[25].mxu0  ;;  %v1431_v46 = vpop.f32.mrb[41].mxu1  ;;  %v1440_v57 = vadd.f32 %v1429_v43, %v6727_v58 }
 0x26b   :  { %v1439_v47 = vadd.f32 %v1388_v45, %v6715_v40  ;;  %v1390_v48 = vpop.f32.mrb[26].mxu0  ;;  %v1433_v51 = vpop.f32.mrb[42].mxu1  ;;  %v1441_v7 = vadd.f32 %v1431_v46, %v6722_v1 }
 0x26c   :  { %v4687_v52 = vmul.f32 -1.442695, %v1438_v44  ;;  %v1442_v17 = vadd.f32 %v1390_v48, %v6711_v38  ;;  %v1392_v0 = vpop.f32.mrb[27].mxu0  ;;  %v1435_v25 = vpop.f32.mrb[43].mxu1  ;;  %v1444_v42 = vadd.f32 %v1433_v51, %v6727_v58 }
 0x26d   :  { %v4689_v61 = vmul.f32 -1.442695, %v1439_v47  ;;  %v1443_v63 = vadd.f32 %v1392_v0, %v6715_v40  ;;  %v1445_v4 = vadd.f32 %v1435_v25, %v6722_v1  ;;  %v4691_v33 = vmul.f32 -1.442695, %v1441_v7 }
 0x26e   :  { %5219 = vpow2.f32 %v4687_v52  ;;  %v4688_v60 = vmul.f32 -1.442695, %v1442_v17 }
 0x26f   :  { %5221 = vpow2.f32 %v4689_v61  ;;  %v4690_v3 = vmul.f32 -1.442695, %v1443_v63  ;;  %v4692_v6 = vmul.f32 -1.442695, %v1445_v4 }
 0x270   :  { %5223 = vpow2.f32 %v4688_v60 }
 0x271   :  { %5225 = vpow2.f32 %v4690_v3 }
 0x272   :  { %5227 = vtanh.f32 %v1440_v57  ;;  %v8609_v57 = vld [vmem:[#allocation76_spill] sm:$0xff] }
 0x273   :  { %5229 = vpow2.f32 %v4691_v33 }
 0x274   :  { %5231 = vpow2.f32 %v4692_v6 }
 0x278   :  { %v5220_v9 = vpop.eup %5219 }
 0x279   :  { %v5222_v37 = vpop.eup %5221  ;;  %v1452_v39 = vadd.f32 1.0, %v5220_v9 }
 0x27a   :  { %v1464_v8 = vadd.f32 1.0, %v5222_v37  ;;  %v5224_v36 = vpop.eup %5223 }
 0x27b   :  { %5233 = vrcp.f32 %v1452_v39  ;;  %v1453_v44 = vadd.f32 1.0, %v5224_v36  ;;  %v5226_v45 = vpop.eup %5225  ;;  %v8610_v39 = vld [vmem:[#allocation77_spill] sm:$0xff] }
 0x27c   :  { %5235 = vrcp.f32 %v1464_v8  ;;  %v1465_v46 = vadd.f32 1.0, %v5226_v45  ;;  %v5228_v43 = vpop.eup %5227 }
 0x27d   :  { %5237 = vtanh.f32 %v1444_v42  ;;  %v5230_v47 = vpop.eup %5229 }
 0x27e   :  { %5239 = vrcp.f32 %v1453_v44  ;;  %v5232_v48 = vpop.eup %5231  ;;  %v1478_v25 = vadd.f32 1.0, %v5230_v47 }
 0x27f   :  { %5241 = vrcp.f32 %v1465_v46  ;;  %v1479_v3 = vadd.f32 1.0, %v5232_v48 }
 0x280   :  { %5243 = vrcp.f32 %v1478_v25 }
 0x285   :  { %v5234_v52 = vpop.eup %5233 }
 0x286   :  { %v5236_v17 = vpop.eup %5235  ;;  %v1486_v0 = vmul.f32 %v5234_v52, %v5228_v43 }
 0x287   :  { %v5238_v61 = vpop.eup %5237  ;;  %v1484_v51 = vmul.f32 0.0, %v5236_v17 }
 0x288   :  { %v5240_v2 = vpop.eup %5239 }
 0x289   :  { %v6733_v63 = vadd.f32 %v1486_v0, %v1484_v51  ;;  %v1487_v60 = vmul.f32 %v5240_v2, %v5238_v61  ;;  %v1565_v41 = vpop.f32.mrb[4].mxu0  ;;  %v1608_v7 = vpop.f32.mrb[12].mxu1  ;;  %v8611_v2 = vld [vmem:[#allocation78_spill] sm:$0xff] }
 0x28a   :  { %v5242_v4 = vpop.eup %5241  ;;  %v4821_v33 = vadd.f32 %v1565_v41, %v8609_v57  ;;  %v1567_v6 = vpop.f32.mrb[5].mxu0  ;;  %v4861_v41 = vadd.f32 %v1608_v7, %v8611_v2 }
 0x28b   :  { %v1610_v9 = vpop.f32.mrb[13].mxu1  ;;  %5245 = vtanh.f32 %v6733_v63  ;;  %v1485_v37 = vmul.f32 0.0, %v5242_v4  ;;  %v4822_v42 = vadd.f32 %v1567_v6, %v8610_v39  ;;  %v1569_v8 = vpop.f32.mrb[6].mxu0 }
 0x28c   :  { %v1612_v36 = vpop.f32.mrb[14].mxu1  ;;  %v4693_v44 = vmul.f32 -1.442695, %v4821_v33  ;;  %v4823_v45 = vadd.f32 %v1569_v8, %v8609_v57  ;;  %v1571_v46 = vpop.f32.mrb[7].mxu0  ;;  %5247 = vrcp.f32 %v1479_v3  ;;  %v4862_v25 = vadd.f32 %v1610_v9, %v6629_v62 }
 0x28d   :  { %v1614_v43 = vpop.f32.mrb[15].mxu1  ;;  %v6739_v47 = vadd.f32 %v1487_v60, %v1485_v37  ;;  %v4695_v48 = vmul.f32 -1.442695, %v4822_v42  ;;  %v4824_v52 = vadd.f32 %v1571_v46, %v8610_v39  ;;  %v5244_v61 = vpop.eup %5243  ;;  %v6748_v60 = vld [vmem:[%s8190_s7] ss:$0 sm:$0xff]  ;;  %v4863_v9 = vadd.f32 %v1612_v36, %v8611_v2 }
 0x28e   :  { %5249 = vpow2.f32 %v4693_v44  ;;  %v4694_v17 = vmul.f32 -1.442695, %v4823_v45  ;;  %v4697_v3 = vmul.f32 -1.442695, %v4862_v25  ;;  %v4864_v4 = vadd.f32 %v1614_v43, %v6629_v62 }
 0x28f   :  { %5251 = vtanh.f32 %v6739_v47  ;;  %v4696_v0 = vmul.f32 -1.442695, %v4824_v52 }
 0x290   :  { %5253 = vpow2.f32 %v4695_v48  ;;  %v4698_v45 = vmul.f32 -1.442695, %v4864_v4 }
 0x291   :  { %5255 = vpow2.f32 %v4694_v17 }
 0x292   :  { %5257 = vpow2.f32 %v4696_v0 }
 0x293   :  { %5259 = vtanh.f32 %v4861_v41  ;;  %v8616_v41 = vld [vmem:[#allocation40_spill] sm:$0xff] }
 0x294   :  { %5261 = vpow2.f32 %v4697_v3  ;;  %v8617_v3 = vld [vmem:[#allocation41_spill] sm:$0xff] }
 0x295   :  { %v5246_v51 = vpop.eup %5245 }
 0x296   :  { %v6751_v33 = vmul.f32 %v5246_v51, %v5244_v61  ;;  %v5248_v6 = vpop.eup %5247  ;;  %v8614_v61 = vld [vmem:[#allocation38_spill] sm:$0xff]  ;;  %v8615_v51 = vld [vmem:[#allocation39_spill] sm:$0xff] }
 0x298   :  { %8612 = vst [vmem:[#allocation20_spill] sm:$0xff] %v6751_v33  ;;  %v5250_v37 = vpop.eup %5249  ;;  %v1494_v42 = vmul.f32 %v6748_v60, %v6751_v33 }
 0x299   :  { %v5252_v8 = vpop.eup %5251  ;;  %v1631_v44 = vadd.f32 1.0, %v5250_v37  ;;  %v8619_v37 = vld [vmem:[#allocation43_spill] sm:$0xff] }
 0x29a   :  { %v5254_v7 = vpop.eup %5253  ;;  %1496 = vadd.xlane.f32.xlu0 %v1494_v42  ;;  %v6756_v46 = vmul.f32 %v5252_v8, %v5248_v6  ;;  %v8618_v6 = vld [vmem:[#allocation42_spill] sm:$0xff]  ;;  %v8620_v42 = vld [vmem:[#allocation44_spill] sm:$0xff]  ;;  %v8621_v8 = vld [vmem:[#allocation45_spill] sm:$0xff] }
 0x29b   :  { %5263 = vrcp.f32 %v1631_v44  ;;  %v1643_v43 = vadd.f32 1.0, %v5254_v7  ;;  %v5256_v48 = vpop.eup %5255 }
 0x29c   :  { %8613 = vst [vmem:[#allocation21_spill] sm:$0xff] %v6756_v46  ;;  %5265 = vtanh.f32 %v4863_v9  ;;  %v1674_v52 = vpack.c.bf16 %v6756_v46, %v6751_v33  ;;  %v1632_v36 = vadd.f32 1.0, %v5256_v48  ;;  %v5258_v17 = vpop.eup %5257  ;;  %v1495_v0 = vmul.f32 %v6748_v60, %v6756_v46  ;;  %v8622_v48 = vld [vmem:[#allocation46_spill] sm:$0xff] }
 0x29d   :  { %5267 = vrcp.f32 %v1643_v43  ;;  %v1644_v25 = vadd.f32 1.0, %v5258_v17  ;;  %v5260_v4 = vpop.eup %5259  ;;  %v6865_v46 = vld [vmem:[#allocation3 + $0x88] ss:$16 sps:$4 sm:$0xff]   ;;  %v6868_v33 = vld [vmem:[#allocation3 + $0xa4] ss:$16 sps:$4 sm:$0xff]  }
 0x29e   :  { %5269 = vpow2.f32 %v4698_v45  ;;  %1708 = vmatmul.mubr.bf16.vlgmr.msra.gmra.mrb[28].mxu0 %v1674_v52  ;;  %1751 = vmatmul.mubr.bf16.vlgmr.msra.gmra.mrb[44].mxu1 %v1674_v52  ;;  %v5262_v9 = vpop.eup %5261  ;;  %v8623_v52 = vld [vmem:[#allocation47_spill] sm:$0xff]  ;;  %8653 = vst [vmem:[#allocation31_spill] sm:$0xff] %v6865_v46  ;;  %8654 = vst [vmem:[#allocation32_spill] sm:$0xff] %v6868_v33 }
 0x29f   :  { %5271 = vrcp.f32 %v1632_v36  ;;  %1762 = vmatpush1.bf16.msra.mxu0 %v8614_v61  ;;  %1805 = vmatpush1.bf16.msra.mxu1 %v8615_v51  ;;  %v1657_v51 = vadd.f32 1.0, %v5262_v9  ;;  %v8630_v9 = vld [vmem:[#allocation54_spill] sm:$0xff] }
 0x2a0   :  { %1498 = vadd.xlane.f32.xlu0 %v1495_v0  ;;  %1763 = vmatprep.subr.bf16.mxu0 %v8616_v41  ;;  %5273 = vrcp.f32 %v1644_v25  ;;  %v8624_v0 = vld [vmem:[#allocation48_spill] sm:$0xff]  ;;  %v8625_v25 = vld [vmem:[#allocation49_spill] sm:$0xff] }
 0x2a1   :  { %1806 = vmatprep.subr.bf16.mxu1 %v8617_v3  ;;  %1793 = vmatprep.mubr.bf16.mxu0 %v8539_v5  ;;  %5275 = vrcp.f32 %v1657_v51 }
 0x2a2   :  { %1836 = vmatprep.mubr.bf16.mxu1 %v8539_v5 }
 0x2a3   :  { %1764 = vmatpush1.bf16.msra.mxu0 %v8618_v6  ;;  %1807 = vmatpush1.bf16.msra.mxu1 %v8619_v37 }
 0x2a4   :  { %1765 = vmatprep.subr.bf16.mxu0 %v8620_v42  ;;  %1808 = vmatprep.subr.bf16.mxu1 %v8621_v8  ;;  %v8627_v42 = vld [vmem:[#allocation51_spill] sm:$0xff] }
 0x2a5   :  { %v5264_v44 = vpop.eup %5263 }
 0x2a6   :  { %v5266_v7 = vpop.eup %5265  ;;  %v1665_v45 = vmul.f32 %v5264_v44, %v5260_v4  ;;  %v8626_v4 = vld [vmem:[#allocation50_spill] sm:$0xff]  ;;  %v8628_v44 = vld [vmem:[#allocation52_spill] sm:$0xff] }
 0x2a7   :  { %v5268_v43 = vpop.eup %5267  ;;  %1766 = vmatpush1.bf16.msra.mxu0 %v8622_v48  ;;  %1809 = vmatpush1.bf16.msra.mxu1 %v8623_v52  ;;  %v8633_v48 = vld [vmem:[#allocation57_spill] sm:$0xff]  ;;  %v8635_v52 = vld [vmem:[#allocation59_spill] sm:$0xff] }
 0x2a8   :  { %v5270_v36 = vpop.eup %5269  ;;  %v1663_v17 = vmul.f32 %v5268_v43, %v6635_v59  ;;  %1767 = vmatprep.subr.bf16.mxu0 %v8624_v0  ;;  %1810 = vmatprep.subr.bf16.mxu1 %v8625_v25  ;;  %v8629_v59 = vld [vmem:[#allocation53_spill] sm:$0xff]  ;;  %v8638_v25 = vld [vmem:[#allocation62_spill] sm:$0xff] }
 0x2a9   :  { %v5272_v61 = vpop.eup %5271  ;;  %v1658_v37 = vadd.f32 1.0, %v5270_v36  ;;  %v8636_v36 = vld [vmem:[#allocation60_spill] sm:$0xff] }
 0x2aa   :  { %v6777_v41 = vadd.f32 %v1665_v45, %v1663_v17  ;;  %v1666_v3 = vmul.f32 %v5272_v61, %v5266_v7  ;;  %v5274_v6 = vpop.eup %5273  ;;  %v8631_v7 = vld [vmem:[#allocation55_spill] sm:$0xff]  ;;  %v8632_v45 = vld [vmem:[#allocation56_spill] sm:$0xff]  ;;  %v8637_v17 = vld [vmem:[#allocation61_spill] sm:$0xff] }
 0x2ab   :  { %1768 = vmatpush1.bf16.msra.mxu0 %v8626_v4  ;;  %1811 = vmatpush1.bf16.msra.mxu1 %v8627_v42  ;;  %v1664_v8 = vmul.f32 %v5274_v6, %v6638_v11  ;;  %v8634_v11 = vld [vmem:[#allocation58_spill] sm:$0xff]  ;;  %v5276_v0 = vpop.eup %5275  ;;  %v8639_v61 = vld [vmem:[#allocation63_spill] sm:$0xff]  ;;  %v8641_v6 = vld [vmem:[#allocation65_spill] sm:$0xff] }
 0x2ac   :  { %1769 = vmatprep.subr.bf16.mxu0 %v8628_v44  ;;  %1812 = vmatprep.subr.bf16.mxu1 %v8629_v59  ;;  %5277 = vtanh.f32 %v6777_v41  ;;  %v8642_v42 = vld [vmem:[#allocation66_spill] sm:$0xff] }
 0x2ad   :  { %v6785_v43 = vadd.f32 %v1666_v3, %v1664_v8  ;;  %5279 = vrcp.f32 %v1658_v37  ;;  %v8640_v3 = vld [vmem:[#allocation64_spill] sm:$0xff]  ;;  %v8643_v8 = vld [vmem:[#allocation67_spill] sm:$0xff] }
 0x2af   :  { %1770 = vmatpush1.bf16.msra.mxu0 %v8630_v9  ;;  %1813 = vmatpush1.bf16.msra.mxu1 %v8631_v7  ;;  %5281 = vtanh.f32 %v6785_v43  ;;  %v6802_v9 = vld [vmem:[#allocation3 + $0x4] ss:$16 sps:$4 sm:$0xff]   ;;  %v6805_v7 = vld [vmem:[#allocation3 + $0xc] ss:$16 sps:$4 sm:$0xff]  }
 0x2b0   :  { %1771 = vmatprep.subr.bf16.mxu0 %v8632_v45  ;;  %1814 = vmatprep.subr.bf16.mxu1 %v8633_v48  ;;  %v6812_v48 = vld [vmem:[#allocation3] ss:$16 sps:$4 sm:$0xff]  }
 0x2b3   :  { %1772 = vmatpush1.bf16.msra.mxu0 %v8634_v11  ;;  %1815 = vmatpush1.bf16.msra.mxu1 %v8635_v52  ;;  %v6815_v11 = vld [vmem:[#allocation3 + $0x8] ss:$16 sps:$4 sm:$0xff]   ;;  %v6818_v52 = vld [vmem:[#allocation3 + $0x24] ss:$16 sps:$4 sm:$0xff]  }
 0x2b4   :  { %1773 = vmatprep.subr.bf16.mxu0 %v8636_v36  ;;  %1816 = vmatprep.subr.bf16.mxu1 %v8637_v17  ;;  %v6821_v36 = vld [vmem:[#allocation3 + $0x2c] ss:$16 sps:$4 sm:$0xff]   ;;  %v6826_v17 = vld [vmem:[#allocation3 + $0x20] ss:$16 sps:$4 sm:$0xff]  }
 0x2b6   :  { %v5278_v51 = vpop.eup %5277 }
 0x2b7   :  { %1774 = vmatpush1.bf16.msra.mxu0 %v8638_v25  ;;  %1817 = vmatpush1.bf16.msra.mxu1 %v8639_v61  ;;  %v5280_v37 = vpop.eup %5279  ;;  %v1671_v44 = vmul.f32 %v5278_v51, %v5276_v0  ;;  %v6829_v0 = vld [vmem:[#allocation3 + $0x28] ss:$16 sps:$4 sm:$0xff]   ;;  %v6832_v25 = vld [vmem:[#allocation3 + $0x44] ss:$16 sps:$4 sm:$0xff]   ;;  %v6835_v61 = vld [vmem:[#allocation3 + $0x4c] ss:$16 sps:$4 sm:$0xff]  }
 0x2b8   :  { %1775 = vmatprep.subr.bf16.mxu0 %v8640_v3  ;;  %1818 = vmatprep.subr.bf16.mxu1 %v8641_v6  ;;  %v6838_v51 = vld [vmem:[#allocation3 + $0x40] ss:$16 sps:$4 sm:$0xff]   ;;  %v6841_v3 = vld [vmem:[#allocation3 + $0x48] ss:$16 sps:$4 sm:$0xff]   ;;  %v6844_v6 = vld [vmem:[#allocation3 + $0x64] ss:$16 sps:$4 sm:$0xff]  }
 0x2b9   :  { %v5282_v4 = vpop.eup %5281  ;;  %8644 = vst [vmem:[#allocation22_spill] sm:$0xff] %v6838_v51  ;;  %8645 = vst [vmem:[#allocation23_spill] sm:$0xff] %v6841_v3 }
 0x2ba   :  { %v1672_v59 = vmul.f32 %v5282_v4, %v5280_v37  ;;  %8646 = vst [vmem:[#allocation24_spill] sm:$0xff] %v6844_v6  ;;  %v6847_v37 = vld [vmem:[#allocation3 + $0x6c] ss:$16 sps:$4 sm:$0xff]   ;;  %v6850_v4 = vld [vmem:[#allocation3 + $0x60] ss:$16 sps:$4 sm:$0xff]  }
 0x2bb   :  { %1776 = vmatpush1.bf16.msra.mxu0 %v8642_v42  ;;  %1819 = vmatpush1.bf16.msra.mxu1 %v8643_v8  ;;  %8647 = vst [vmem:[#allocation25_spill] sm:$0xff] %v6847_v37  ;;  %8648 = vst [vmem:[#allocation26_spill] sm:$0xff] %v6850_v4  ;;  %v6853_v42 = vld [vmem:[#allocation3 + $0x68] ss:$16 sps:$4 sm:$0xff]   ;;  %v6856_v8 = vld [vmem:[#allocation3 + $0x84] ss:$16 sps:$4 sm:$0xff]  }
 0x2bc   :  { %1944 = vmatprep.subr.bf16.mxu0 %v6802_v9  ;;  %1987 = vmatprep.subr.bf16.mxu1 %v6805_v7  ;;  %v6808_v45 = vpack.c.bf16 %v1672_v59, %v1671_v44  ;;  %8649 = vst [vmem:[#allocation27_spill] sm:$0xff] %v6853_v42  ;;  %8650 = vst [vmem:[#allocation28_spill] sm:$0xff] %v6856_v8  ;;  %v6859_v44 = vld [vmem:[#allocation3 + $0x8c] ss:$16 sps:$4 sm:$0xff]   ;;  %v6862_v59 = vld [vmem:[#allocation3 + $0x80] ss:$16 sps:$4 sm:$0xff]  }
 0x2bd   :  { %8651 = vst [vmem:[#allocation29_spill] sm:$0xff] %v6859_v44  ;;  %8652 = vst [vmem:[#allocation30_spill] sm:$0xff] %v6862_v59 }
 0x2be   :  { %1794 = vmatmul.mubr.bf16.vlgmr.msra.gmra.mrb[28].mxu0 %v6808_v45  ;;  %1837 = vmatmul.mubr.bf16.vlgmr.msra.gmra.mrb[44].mxu1 %v6808_v45 }
 0x2bf   :  { %1945 = vmatpush1.bf16.msra.mxu0 %v6812_v48  ;;  %1988 = vmatpush1.bf16.msra.mxu1 %v6815_v11 }
 0x2c0   :  { %1946 = vmatprep.subr.bf16.mxu0 %v6818_v52  ;;  %1989 = vmatprep.subr.bf16.mxu1 %v6821_v36 }
 0x2c1   :  { %1976 = vmatprep.mubr.bf16.mxu0 %v8539_v5  ;;  %2019 = vmatprep.mubr.bf16.mxu1 %v8539_v5 }
 0x2c3   :  { %1947 = vmatpush1.bf16.msra.mxu0 %v6826_v17  ;;  %1990 = vmatpush1.bf16.msra.mxu1 %v6829_v0 }
 0x2c4   :  { %1948 = vmatprep.subr.bf16.mxu0 %v6832_v25  ;;  %1991 = vmatprep.subr.bf16.mxu1 %v6835_v61 }
 0x2c7   :  { %1949 = vmatpush1.bf16.msra.mxu0 %v6838_v51  ;;  %1992 = vmatpush1.bf16.msra.mxu1 %v6841_v3 }
 0x2c8   :  { %1950 = vmatprep.subr.bf16.mxu0 %v6844_v6  ;;  %1993 = vmatprep.subr.bf16.mxu1 %v6847_v37 }
 0x2cb   :  { %1951 = vmatpush1.bf16.msra.mxu0 %v6850_v4  ;;  %1994 = vmatpush1.bf16.msra.mxu1 %v6853_v42  ;;  %v6871_v42 = vld [vmem:[#allocation3 + $0xac] ss:$16 sps:$4 sm:$0xff]  }
 0x2cc   :  { %1952 = vmatprep.subr.bf16.mxu0 %v6856_v8  ;;  %1995 = vmatprep.subr.bf16.mxu1 %v6859_v44  ;;  %8655 = vst [vmem:[#allocation33_spill] sm:$0xff] %v6871_v42  ;;  %v6874_v8 = vld [vmem:[#allocation3 + $0xa0] ss:$16 sps:$4 sm:$0xff]   ;;  %v6877_v44 = vld [vmem:[#allocation3 + $0xa8] ss:$16 sps:$4 sm:$0xff]  }
 0x2cd   :  { %8656 = vst [vmem:[#allocation34_spill] sm:$0xff] %v6874_v8  ;;  %8657 = vst [vmem:[#allocation35_spill] sm:$0xff] %v6877_v44 }
 0x2cf   :  { %1953 = vmatpush1.bf16.msra.mxu0 %v6862_v59  ;;  %1996 = vmatpush1.bf16.msra.mxu1 %v6865_v46  ;;  %v6880_v59 = vld [vmem:[#allocation3 + $0xc4] ss:$16 sps:$4 sm:$0xff]   ;;  %v6883_v46 = vld [vmem:[#allocation3 + $0xcc] ss:$16 sps:$4 sm:$0xff]  }
 0x2d0   :  { %1954 = vmatprep.subr.bf16.mxu0 %v6868_v33  ;;  %1997 = vmatprep.subr.bf16.mxu1 %v6871_v42  ;;  %8658 = vst [vmem:[#allocation36_spill] sm:$0xff] %v6880_v59  ;;  %8659 = vst [vmem:[#allocation37_spill] sm:$0xff] %v6883_v46  ;;  %v6886_v33 = vld [vmem:[#allocation3 + $0xc0] ss:$16 sps:$4 sm:$0xff]   ;;  %v6889_v42 = vld [vmem:[#allocation3 + $0xc8] ss:$16 sps:$4 sm:$0xff]  }
 0x2d1   :  { %8660 = vst [vmem:[#allocation76_spill] sm:$0xff] %v6886_v33  ;;  %8661 = vst [vmem:[#allocation77_spill] sm:$0xff] %v6889_v42 }
 0x2d3   :  { %1955 = vmatpush1.bf16.msra.mxu0 %v6874_v8  ;;  %1998 = vmatpush1.bf16.msra.mxu1 %v6877_v44  ;;  %v6892_v8 = vld [vmem:[#allocation3 + $0xe4] ss:$16 sps:$4 sm:$0xff]   ;;  %v6895_v44 = vld [vmem:[#allocation3 + $0xec] ss:$16 sps:$4 sm:$0xff]  }
 0x2d4   :  { %1956 = vmatprep.subr.bf16.mxu0 %v6880_v59  ;;  %1999 = vmatprep.subr.bf16.mxu1 %v6883_v46  ;;  %8662 = vst [vmem:[#allocation78_spill] sm:$0xff] %v6892_v8  ;;  %8663 = vst [vmem:[#allocation38_spill] sm:$0xff] %v6895_v44  ;;  %v6898_v59 = vld [vmem:[#allocation3 + $0xe0] ss:$16 sps:$4 sm:$0xff]   ;;  %v6901_v46 = vld [vmem:[#allocation3 + $0xe8] ss:$16 sps:$4 sm:$0xff]  }
 0x2d5   :  { %8664 = vst [vmem:[#allocation39_spill] sm:$0xff] %v6898_v59  ;;  %8665 = vst [vmem:[#allocation40_spill] sm:$0xff] %v6901_v46 }
 0x2d7   :  { %1957 = vmatpush1.bf16.msra.mxu0 %v6886_v33  ;;  %2000 = vmatpush1.bf16.msra.mxu1 %v6889_v42  ;;  %v6904_v33 = vld [vmem:[#allocation8 + $0x4] ss:$16 sps:$4 sm:$0xff]   ;;  %v6907_v42 = vld [vmem:[#allocation8 + $0xc] ss:$16 sps:$4 sm:$0xff]  }
 0x2d8   :  { %1958 = vmatprep.subr.bf16.mxu0 %v6892_v8  ;;  %2001 = vmatprep.subr.bf16.mxu1 %v6895_v44  ;;  %8666 = vst [vmem:[#allocation41_spill] sm:$0xff] %v6904_v33  ;;  %8667 = vst [vmem:[#allocation42_spill] sm:$0xff] %v6907_v42  ;;  %v6912_v44 = vld [vmem:[#allocation8] ss:$16 sps:$4 sm:$0xff]  }
 0x2d9   :  { %8668 = vst [vmem:[#allocation43_spill] sm:$0xff] %v6912_v44 }
 0x2db   :  { %1959 = vmatpush1.bf16.msra.mxu0 %v6898_v59  ;;  %2002 = vmatpush1.bf16.msra.mxu1 %v6901_v46  ;;  %v6915_v59 = vld [vmem:[#allocation8 + $0x8] ss:$16 sps:$4 sm:$0xff]  }
 0x2dc   :  { %2088 = vmatprep.subr.bf16.mxu0 %v6904_v33  ;;  %2131 = vmatprep.subr.bf16.mxu1 %v6907_v42  ;;  %8669 = vst [vmem:[#allocation44_spill] sm:$0xff] %v6915_v59  ;;  %v6922_v42 = vld [vmem:[#allocation8 + $0x20] ss:$16 sps:$4 sm:$0xff]  }
 0x2dd   :  { %8670 = vst [vmem:[#allocation45_spill] sm:$0xff] %v6922_v42 }
 0x2de   :  { %1977 = vmatmul.mubr.bf16.vlgmr.msra.gmra.mrb[8].mxu0 %v6808_v45  ;;  %2020 = vmatmul.mubr.bf16.vlgmr.msra.gmra.mrb[16].mxu1 %v6808_v45  ;;  %v6925_v45 = vld [vmem:[#allocation8 + $0x28] ss:$16 sps:$4 sm:$0xff]  }
 0x2df   :  { %2089 = vmatpush1.bf16.msra.mxu0 %v6912_v44  ;;  %2132 = vmatpush1.bf16.msra.mxu1 %v6915_v59  ;;  %8671 = vst [vmem:[#allocation46_spill] sm:$0xff] %v6925_v45 }
 0x2e0   :  { %2090 = vmatprep.subr.bf16.mxu0 %v6400_v49  ;;  %2133 = vmatprep.subr.bf16.mxu1 %v6402_v50 }
 0x2e1   :  { %2120 = vmatprep.mubr.bf16.mxu0 %v8539_v5  ;;  %2163 = vmatprep.mubr.bf16.mxu1 %v8539_v5 }
 0x2e3   :  { %2091 = vmatpush1.bf16.msra.mxu0 %v6922_v42  ;;  %2134 = vmatpush1.bf16.msra.mxu1 %v6925_v45 }
 0x2e4   :  { %2092 = vmatprep.subr.bf16.mxu0 %v6412_v53  ;;  %2135 = vmatprep.subr.bf16.mxu1 %v6414_v54 }
 0x2e7   :  { %2093 = vmatpush1.bf16.msra.mxu0 %v6416_v55  ;;  %2136 = vmatpush1.bf16.msra.mxu1 %v6418_v56 }
 0x2e8   :  { %2094 = vmatprep.subr.bf16.mxu0 %v8579_v10  ;;  %2137 = vmatprep.subr.bf16.mxu1 %v8580_v12 }
 0x2eb   :  { %2095 = vmatpush1.bf16.msra.mxu0 %v8581_v13  ;;  %2138 = vmatpush1.bf16.msra.mxu1 %v8582_v14 }
 0x2ec   :  { %2096 = vmatprep.subr.bf16.mxu0 %v8583_v15  ;;  %2139 = vmatprep.subr.bf16.mxu1 %v8584_v16 }
 0x2ef   :  { %2097 = vmatpush1.bf16.msra.mxu0 %v8585_v18  ;;  %2140 = vmatpush1.bf16.msra.mxu1 %v8586_v19 }
 0x2f0   :  { %2098 = vmatprep.subr.bf16.mxu0 %v8587_v20  ;;  %2141 = vmatprep.subr.bf16.mxu1 %v8588_v21 }
 0x2f3   :  { %2099 = vmatpush1.bf16.msra.mxu0 %v8589_v22  ;;  %2142 = vmatpush1.bf16.msra.mxu1 %v8590_v23 }
 0x2f4   :  { %2100 = vmatprep.subr.bf16.mxu0 %v8591_v24  ;;  %2143 = vmatprep.subr.bf16.mxu1 %v8592_v26 }
 0x2f7   :  { %2101 = vmatpush1.bf16.msra.mxu0 %v8593_v27  ;;  %2144 = vmatpush1.bf16.msra.mxu1 %v8594_v28 }
 0x2f8   :  { %2102 = vmatprep.subr.bf16.mxu0 %v8595_v29  ;;  %2145 = vmatprep.subr.bf16.mxu1 %v8596_v30 }
 0x2fb   :  { %2103 = vmatpush1.bf16.msra.mxu0 %v8597_v31  ;;  %2146 = vmatpush1.bf16.msra.mxu1 %v8598_v32 }
 0x2fc   :  { %2174 = vmatprep.subr.bf16.mxu0 %v8599_v34  ;;  %2217 = vmatprep.subr.bf16.mxu1 %v8600_v35 }
 0x391   :  { %v1795_v49 = vpop.f32.mrb[28].mxu0  ;;  %v1838_v50 = vpop.f32.mrb[44].mxu1 }
 0x392   :  { %v1847_v53 = vadd.f32 %v1795_v49, %v6711_v38  ;;  %v1797_v54 = vpop.f32.mrb[29].mxu0  ;;  %v1840_v55 = vpop.f32.mrb[45].mxu1  ;;  %v1849_v24 = vadd.f32 %v1838_v50, %v6727_v58 }
 0x393   :  { %v1848_v56 = vadd.f32 %v1797_v54, %v6715_v40  ;;  %v1799_v10 = vpop.f32.mrb[30].mxu0  ;;  %v1842_v12 = vpop.f32.mrb[46].mxu1  ;;  %v1850_v22 = vadd.f32 %v1840_v55, %v6722_v1 }
 0x394   :  { %v4699_v13 = vmul.f32 -1.442695, %v1847_v53  ;;  %v1851_v14 = vadd.f32 %v1799_v10, %v6711_v38  ;;  %v1801_v15 = vpop.f32.mrb[31].mxu0  ;;  %v1844_v16 = vpop.f32.mrb[47].mxu1  ;;  %v1853_v31 = vadd.f32 %v1842_v12, %v6727_v58 }
 0x395   :  { %v4701_v18 = vmul.f32 -1.442695, %v1848_v56  ;;  %v1852_v19 = vadd.f32 %v1801_v15, %v6715_v40  ;;  %v1854_v23 = vadd.f32 %v1844_v16, %v6722_v1  ;;  %v4703_v26 = vmul.f32 -1.442695, %v1850_v22 }
 0x396   :  { %5283 = vpow2.f32 %v4699_v13  ;;  %v4700_v20 = vmul.f32 -1.442695, %v1851_v14 }
 0x397   :  { %5285 = vpow2.f32 %v4701_v18  ;;  %v4702_v21 = vmul.f32 -1.442695, %v1852_v19  ;;  %v4704_v27 = vmul.f32 -1.442695, %v1854_v23 }
 0x398   :  { %5287 = vpow2.f32 %v4700_v20 }
 0x399   :  { %5289 = vpow2.f32 %v4702_v21 }
 0x39a   :  { %5291 = vtanh.f32 %v1849_v24 }
 0x39b   :  { %5293 = vpow2.f32 %v4703_v26 }
 0x39c   :  { %5295 = vpow2.f32 %v4704_v27 }
 0x3a0   :  { %v5284_v28 = vpop.eup %5283 }
 0x3a1   :  { %v5286_v29 = vpop.eup %5285  ;;  %v1861_v30 = vadd.f32 1.0, %v5284_v28 }
 0x3a2   :  { %v1873_v32 = vadd.f32 1.0, %v5286_v29  ;;  %v5288_v34 = vpop.eup %5287 }
 0x3a3   :  { %5297 = vrcp.f32 %v1861_v30  ;;  %v1862_v35 = vadd.f32 1.0, %v5288_v34  ;;  %v5290_v49 = vpop.eup %5289 }
 0x3a4   :  { %5299 = vrcp.f32 %v1873_v32  ;;  %v1874_v53 = vadd.f32 1.0, %v5290_v49  ;;  %v5292_v50 = vpop.eup %5291 }
 0x3a5   :  { %5301 = vtanh.f32 %v1853_v31  ;;  %v5294_v54 = vpop.eup %5293 }
 0x3a6   :  { %5303 = vrcp.f32 %v1862_v35  ;;  %v5296_v55 = vpop.eup %5295  ;;  %v1887_v14 = vadd.f32 1.0, %v5294_v54 }
 0x3a7   :  { %5305 = vrcp.f32 %v1874_v53  ;;  %v1888_v19 = vadd.f32 1.0, %v5296_v55 }
 0x3a8   :  { %5307 = vrcp.f32 %v1887_v14 }
 0x3ad   :  { %v5298_v56 = vpop.eup %5297 }
 0x3ae   :  { %v5300_v10 = vpop.eup %5299  ;;  %v1895_v13 = vmul.f32 %v5298_v56, %v5292_v50 }
 0x3af   :  { %v5302_v15 = vpop.eup %5301  ;;  %v1893_v12 = vmul.f32 %v5300_v10, %v6733_v63 }
 0x3b0   :  { %v5304_v16 = vpop.eup %5303 }
 0x3b1   :  { %v1896_v18 = vmul.f32 %v5304_v16, %v5302_v15  ;;  %v1978_v20 = vpop.f32.mrb[8].mxu0  ;;  %v2021_v21 = vpop.f32.mrb[16].mxu1  ;;  %v6963_v22 = vadd.f32 %v1895_v13, %v1893_v12 }
 0x3b2   :  { %v5306_v23 = vpop.eup %5305  ;;  %v4825_v24 = vadd.f32 %v1978_v20, %v8609_v57  ;;  %v1980_v26 = vpop.f32.mrb[9].mxu0  ;;  %v4865_v13 = vadd.f32 %v2021_v21, %v8611_v2 }
 0x3b3   :  { %v2023_v27 = vpop.f32.mrb[17].mxu1  ;;  %v1894_v28 = vmul.f32 %v5306_v23, %v6739_v47  ;;  %v4826_v29 = vadd.f32 %v1980_v26, %v8610_v39  ;;  %v1982_v30 = vpop.f32.mrb[10].mxu0  ;;  %5309 = vtanh.f32 %v6963_v22 }
 0x3b4   :  { %v2025_v31 = vpop.f32.mrb[18].mxu1  ;;  %v4705_v63 = vmul.f32 -1.442695, %v4825_v24  ;;  %v4827_v32 = vadd.f32 %v1982_v30, %v8609_v57  ;;  %v1984_v34 = vpop.f32.mrb[11].mxu0  ;;  %5311 = vrcp.f32 %v1888_v19  ;;  %v4866_v55 = vadd.f32 %v2023_v27, %v6629_v62 }
 0x3b5   :  { %v2027_v35 = vpop.f32.mrb[19].mxu1  ;;  %v6970_v49 = vadd.f32 %v1896_v18, %v1894_v28  ;;  %v4707_v53 = vmul.f32 -1.442695, %v4826_v29  ;;  %v4828_v50 = vadd.f32 %v1984_v34, %v8610_v39  ;;  %v5308_v56 = vpop.eup %5307  ;;  %v4867_v19 = vadd.f32 %v2025_v31, %v8611_v2 }
 0x3b6   :  { %5313 = vpow2.f32 %v4705_v63  ;;  %v4706_v54 = vmul.f32 -1.442695, %v4827_v32  ;;  %v4709_v14 = vmul.f32 -1.442695, %v4866_v55  ;;  %v4868_v15 = vadd.f32 %v2027_v35, %v6629_v62  ;;  %v6988_v35 = vld [vmem:[#allocation6] ss:$16 sps:$4 sm:$0xff]  }
 0x3b7   :  { %5315 = vtanh.f32 %v6970_v49  ;;  %v4708_v47 = vmul.f32 -1.442695, %v4828_v50  ;;  %v6994_v50 = vld [vmem:[#allocation6 + $0x24] ss:$16 sps:$4 sm:$0xff]   ;;  %v7002_v55 = vld [vmem:[#allocation6 + $0x20] ss:$16 sps:$4 sm:$0xff]  }
 0x3b8   :  { %5317 = vpow2.f32 %v4707_v53  ;;  %v4710_v27 = vmul.f32 -1.442695, %v4868_v15  ;;  %v6991_v53 = vld [vmem:[#allocation6 + $0x8] ss:$16 sps:$4 sm:$0xff]  }
 0x3b9   :  { %5319 = vpow2.f32 %v4706_v54  ;;  %v6997_v54 = vld [vmem:[#allocation6 + $0x2c] ss:$16 sps:$4 sm:$0xff]  }
 0x3ba   :  { %5321 = vpow2.f32 %v4708_v47 }
 0x3bb   :  { %5323 = vtanh.f32 %v4865_v13  ;;  %v7008_v13 = vld [vmem:[#allocation6 + $0x44] ss:$16 sps:$4 sm:$0xff]  }
 0x3bc   :  { %5325 = vpow2.f32 %v4709_v14  ;;  %v7011_v14 = vld [vmem:[#allocation6 + $0x4c] ss:$16 sps:$4 sm:$0xff]  }
 0x3bd   :  { %v5310_v10 = vpop.eup %5309 }
 0x3be   :  { %v6977_v12 = vmul.f32 %v5310_v10, %v5308_v56  ;;  %v5312_v16 = vpop.eup %5311  ;;  %v7005_v56 = vld [vmem:[#allocation6 + $0x28] ss:$16 sps:$4 sm:$0xff]  }
 0x3c0   :  { %8672 = vst [vmem:[#allocation47_spill] sm:$0xff] %v6977_v12  ;;  %v5314_v18 = vpop.eup %5313  ;;  %v1903_v20 = vmul.f32 %v6748_v60, %v6977_v12 }
 0x3c1   :  { %v5316_v23 = vpop.eup %5315  ;;  %v2044_v24 = vadd.f32 1.0, %v5314_v18 }
 0x3c2   :  { %v5318_v26 = vpop.eup %5317  ;;  %1905 = vadd.xlane.f32.xlu1 %v1903_v20  ;;  %v6982_v21 = vmul.f32 %v5316_v23, %v5312_v16  ;;  %v7014_v20 = vld [vmem:[#allocation6 + $0x40] ss:$16 sps:$4 sm:$0xff]   ;;  %v7017_v23 = vld [vmem:[#allocation6 + $0x48] ss:$16 sps:$4 sm:$0xff]  }
 0x3c3   :  { %5327 = vrcp.f32 %v2044_v24  ;;  %v2056_v28 = vadd.f32 1.0, %v5318_v26  ;;  %v5320_v29 = vpop.eup %5319 }
 0x3c4   :  { %8673 = vst [vmem:[#allocation48_spill] sm:$0xff] %v6982_v21  ;;  %5329 = vtanh.f32 %v4867_v19  ;;  %v2087_v30 = vpack.c.bf16 %v6982_v21, %v6977_v12  ;;  %v2045_v31 = vadd.f32 1.0, %v5320_v29  ;;  %v5322_v63 = vpop.eup %5321  ;;  %v1904_v32 = vmul.f32 %v6748_v60, %v6982_v21  ;;  %v7073_v21 = vld [vmem:[#allocation6 + $0xc8] ss:$16 sps:$4 sm:$0xff]  }
 0x3c5   :  { %5331 = vrcp.f32 %v2056_v28  ;;  %v2057_v34 = vadd.f32 1.0, %v5322_v63  ;;  %v5324_v47 = vpop.eup %5323  ;;  %v7024_v28 = vld [vmem:[#allocation6 + $0x6c] ss:$16 sps:$4 sm:$0xff]   ;;  %8681 = vst [vmem:[#allocation56_spill] sm:$0xff] %v7073_v21 }
 0x3c6   :  { %5333 = vpow2.f32 %v4710_v27  ;;  %2121 = vmatmul.mubr.bf16.vlgmr.msra.gmra.mrb[32].mxu0 %v2087_v30  ;;  %2164 = vmatmul.mubr.bf16.vlgmr.msra.gmra.mrb[48].mxu1 %v2087_v30  ;;  %v5326_v10 = vpop.eup %5325  ;;  %v7021_v27 = vld [vmem:[#allocation6 + $0x64] ss:$16 sps:$4 sm:$0xff]  }
 0x3c7   :  { %5335 = vrcp.f32 %v2045_v31  ;;  %2175 = vmatpush1.bf16.msra.mxu0 %v6988_v35  ;;  %2218 = vmatpush1.bf16.msra.mxu1 %v6991_v53  ;;  %v2070_v30 = vadd.f32 1.0, %v5326_v10  ;;  %v7039_v10 = vld [vmem:[#allocation6 + $0x8c] ss:$16 sps:$4 sm:$0xff]  }
 0x3c8   :  { %1907 = vadd.xlane.f32.xlu1 %v1904_v32  ;;  %2176 = vmatprep.subr.bf16.mxu0 %v6994_v50  ;;  %5337 = vrcp.f32 %v2057_v34 }
 0x3c9   :  { %2219 = vmatprep.subr.bf16.mxu1 %v6997_v54  ;;  %2206 = vmatprep.mubr.bf16.mxu0 %v8539_v5  ;;  %5339 = vrcp.f32 %v2070_v30  ;;  %v7061_v30 = vld [vmem:[#allocation6 + $0xa8] ss:$16 sps:$4 sm:$0xff]  }
 0x3ca   :  { %2249 = vmatprep.mubr.bf16.mxu1 %v8539_v5  ;;  %8677 = vst [vmem:[#allocation52_spill] sm:$0xff] %v7061_v30 }
 0x3cb   :  { %2177 = vmatpush1.bf16.msra.mxu0 %v7002_v55  ;;  %2220 = vmatpush1.bf16.msra.mxu1 %v7005_v56 }
 0x3cc   :  { %2178 = vmatprep.subr.bf16.mxu0 %v7008_v13  ;;  %2221 = vmatprep.subr.bf16.mxu1 %v7011_v14 }
 0x3cd   :  { %v5328_v15 = vpop.eup %5327 }
 0x3ce   :  { %v5330_v16 = vpop.eup %5329  ;;  %v2078_v18 = vmul.f32 %v5328_v15, %v5324_v47  ;;  %v7029_v47 = vld [vmem:[#allocation6 + $0x60] ss:$16 sps:$4 sm:$0xff]  }
 0x3cf   :  { %v5332_v19 = vpop.eup %5331  ;;  %2179 = vmatpush1.bf16.msra.mxu0 %v7014_v20  ;;  %2222 = vmatpush1.bf16.msra.mxu1 %v7017_v23 }
 0x3d0   :  { %v5334_v24 = vpop.eup %5333  ;;  %v2076_v26 = vmul.f32 %v5332_v19, %v6777_v41  ;;  %2180 = vmatprep.subr.bf16.mxu0 %v7021_v27  ;;  %2223 = vmatprep.subr.bf16.mxu1 %v7024_v28  ;;  %v7032_v41 = vld [vmem:[#allocation6 + $0x68] ss:$16 sps:$4 sm:$0xff]   ;;  %v7036_v19 = vld [vmem:[#allocation6 + $0x84] ss:$16 sps:$4 sm:$0xff]  }
 0x3d1   :  { %v5336_v29 = vpop.eup %5335  ;;  %v2071_v34 = vadd.f32 1.0, %v5334_v24  ;;  %v7048_v24 = vld [vmem:[#allocation6 + $0x88] ss:$16 sps:$4 sm:$0xff]  }
 0x3d2   :  { %v7027_v31 = vadd.f32 %v2078_v18, %v2076_v26  ;;  %v2079_v63 = vmul.f32 %v5336_v29, %v5330_v16  ;;  %v5338_v32 = vpop.eup %5337  ;;  %v7045_v18 = vld [vmem:[#allocation6 + $0x80] ss:$16 sps:$4 sm:$0xff]   ;;  %v7055_v26 = vld [vmem:[#allocation6 + $0xac] ss:$16 sps:$4 sm:$0xff]  }
 0x3d3   :  { %2181 = vmatpush1.bf16.msra.mxu0 %v7029_v47  ;;  %2224 = vmatpush1.bf16.msra.mxu1 %v7032_v41  ;;  %v2077_v15 = vmul.f32 %v5338_v32, %v6785_v43  ;;  %v7052_v43 = vld [vmem:[#allocation6 + $0xa4] ss:$16 sps:$4 sm:$0xff]   ;;  %8675 = vst [vmem:[#allocation50_spill] sm:$0xff] %v7055_v26  ;;  %v7058_v29 = vld [vmem:[#allocation6 + $0xa0] ss:$16 sps:$4 sm:$0xff]  }
 0x3d4   :  { %2182 = vmatprep.subr.bf16.mxu0 %v7036_v19  ;;  %2225 = vmatprep.subr.bf16.mxu1 %v7039_v10  ;;  %5341 = vtanh.f32 %v7027_v31  ;;  %8674 = vst [vmem:[#allocation49_spill] sm:$0xff] %v7052_v43  ;;  %8676 = vst [vmem:[#allocation51_spill] sm:$0xff] %v7058_v29  ;;  %v7067_v32 = vld [vmem:[#allocation6 + $0xcc] ss:$16 sps:$4 sm:$0xff]  }
 0x3d5   :  { %v7043_v16 = vadd.f32 %v2079_v63, %v2077_v15  ;;  %5343 = vrcp.f32 %v2071_v34  ;;  %v7064_v63 = vld [vmem:[#allocation6 + $0xc4] ss:$16 sps:$4 sm:$0xff]   ;;  %8679 = vst [vmem:[#allocation54_spill] sm:$0xff] %v7067_v32  ;;  %v5340_v34 = vpop.eup %5339  ;;  %v7070_v15 = vld [vmem:[#allocation6 + $0xc0] ss:$16 sps:$4 sm:$0xff]  }
 0x3d6   :  { %8678 = vst [vmem:[#allocation53_spill] sm:$0xff] %v7064_v63  ;;  %8680 = vst [vmem:[#allocation55_spill] sm:$0xff] %v7070_v15 }
 0x3d7   :  { %2183 = vmatpush1.bf16.msra.mxu0 %v7045_v18  ;;  %2226 = vmatpush1.bf16.msra.mxu1 %v7048_v24  ;;  %5345 = vtanh.f32 %v7043_v16 }
 0x3d8   :  { %2184 = vmatprep.subr.bf16.mxu0 %v7052_v43  ;;  %2227 = vmatprep.subr.bf16.mxu1 %v7055_v26  ;;  %v7082_v26 = vld [vmem:[#allocation6 + $0xe0] ss:$16 sps:$4 sm:$0xff]  }
 0x3db   :  { %2185 = vmatpush1.bf16.msra.mxu0 %v7058_v29  ;;  %2228 = vmatpush1.bf16.msra.mxu1 %v7061_v30  ;;  %v7076_v29 = vld [vmem:[#allocation6 + $0xe4] ss:$16 sps:$4 sm:$0xff]   ;;  %v7079_v30 = vld [vmem:[#allocation6 + $0xec] ss:$16 sps:$4 sm:$0xff]  }
 0x3dc   :  { %2186 = vmatprep.subr.bf16.mxu0 %v7064_v63  ;;  %2229 = vmatprep.subr.bf16.mxu1 %v7067_v32  ;;  %8682 = vst [vmem:[#allocation57_spill] sm:$0xff] %v7076_v29 }
 0x3de   :  { %v5342_v12 = vpop.eup %5341 }
 0x3df   :  { %2187 = vmatpush1.bf16.msra.mxu0 %v7070_v15  ;;  %2230 = vmatpush1.bf16.msra.mxu1 %v7073_v21  ;;  %v5344_v63 = vpop.eup %5343  ;;  %v7085_v15 = vld [vmem:[#allocation6 + $0xe8] ss:$16 sps:$4 sm:$0xff]   ;;  %v2084_v21 = vmul.f32 %v5342_v12, %v5340_v34  ;;  %v8683_v12 = vld [vmem:[#allocation27_spill] sm:$0xff] }
 0x3e0   :  { %2188 = vmatprep.subr.bf16.mxu0 %v7076_v29  ;;  %2231 = vmatprep.subr.bf16.mxu1 %v7079_v30  ;;  %v8688_v34 = vld [vmem:[#allocation32_spill] sm:$0xff] }
 0x3e1   :  { %v5346_v32 = vpop.eup %5345 }
 0x3e2   :  { %v2085_v43 = vmul.f32 %v5346_v32, %v5344_v63  ;;  %v8686_v63 = vld [vmem:[#allocation30_spill] sm:$0xff]  ;;  %v8687_v32 = vld [vmem:[#allocation31_spill] sm:$0xff] }
 0x3e3   :  { %2189 = vmatpush1.bf16.msra.mxu0 %v7082_v26  ;;  %2232 = vmatpush1.bf16.msra.mxu1 %v7085_v15 }
 0x3e4   :  { %2357 = vmatprep.subr.bf16.mxu0 %v6802_v9  ;;  %2400 = vmatprep.subr.bf16.mxu1 %v6805_v7  ;;  %v2086_v29 = vpack.c.bf16 %v2085_v43, %v2084_v21  ;;  %v8684_v21 = vld [vmem:[#allocation28_spill] sm:$0xff]  ;;  %v8685_v43 = vld [vmem:[#allocation29_spill] sm:$0xff] }
 0x3e6   :  { %2207 = vmatmul.mubr.bf16.vlgmr.msra.gmra.mrb[32].mxu0 %v2086_v29  ;;  %2250 = vmatmul.mubr.bf16.vlgmr.msra.gmra.mrb[48].mxu1 %v2086_v29 }
 0x3e7   :  { %2358 = vmatpush1.bf16.msra.mxu0 %v6812_v48  ;;  %2401 = vmatpush1.bf16.msra.mxu1 %v6815_v11 }
 0x3e8   :  { %2359 = vmatprep.subr.bf16.mxu0 %v6818_v52  ;;  %2402 = vmatprep.subr.bf16.mxu1 %v6821_v36 }
 0x3e9   :  { %2389 = vmatprep.mubr.bf16.mxu0 %v8539_v5  ;;  %2432 = vmatprep.mubr.bf16.mxu1 %v8539_v5 }
 0x3eb   :  { %2360 = vmatpush1.bf16.msra.mxu0 %v6826_v17  ;;  %2403 = vmatpush1.bf16.msra.mxu1 %v6829_v0 }
 0x3ec   :  { %2361 = vmatprep.subr.bf16.mxu0 %v6832_v25  ;;  %2404 = vmatprep.subr.bf16.mxu1 %v6835_v61 }
 0x3ef   :  { %2362 = vmatpush1.bf16.msra.mxu0 %v6838_v51  ;;  %2405 = vmatpush1.bf16.msra.mxu1 %v6841_v3  ;;  %v8689_v51 = vld [vmem:[#allocation33_spill] sm:$0xff]  ;;  %v8690_v3 = vld [vmem:[#allocation34_spill] sm:$0xff] }
 0x3f0   :  { %2363 = vmatprep.subr.bf16.mxu0 %v6844_v6  ;;  %2406 = vmatprep.subr.bf16.mxu1 %v6847_v37  ;;  %v8691_v6 = vld [vmem:[#allocation35_spill] sm:$0xff]  ;;  %v8692_v37 = vld [vmem:[#allocation36_spill] sm:$0xff] }
 0x3f3   :  { %2364 = vmatpush1.bf16.msra.mxu0 %v6850_v4  ;;  %2407 = vmatpush1.bf16.msra.mxu1 %v8683_v12  ;;  %v8693_v4 = vld [vmem:[#allocation37_spill] sm:$0xff]  ;;  %v8694_v12 = vld [vmem:[#allocation76_spill] sm:$0xff] }
 0x3f4   :  { %2365 = vmatprep.subr.bf16.mxu0 %v8684_v21  ;;  %2408 = vmatprep.subr.bf16.mxu1 %v8685_v43  ;;  %v8695_v21 = vld [vmem:[#allocation77_spill] sm:$0xff] }
 0x3f7   :  { %2366 = vmatpush1.bf16.msra.mxu0 %v8686_v63  ;;  %2409 = vmatpush1.bf16.msra.mxu1 %v8687_v32  ;;  %v8696_v63 = vld [vmem:[#allocation38_spill] sm:$0xff]  ;;  %v8697_v32 = vld [vmem:[#allocation39_spill] sm:$0xff] }
 0x3f8   :  { %2367 = vmatprep.subr.bf16.mxu0 %v8688_v34  ;;  %2410 = vmatprep.subr.bf16.mxu1 %v8689_v51 }
 0x3fb   :  { %2368 = vmatpush1.bf16.msra.mxu0 %v8690_v3  ;;  %2411 = vmatpush1.bf16.msra.mxu1 %v8691_v6  ;;  %v8698_v3 = vld [vmem:[#allocation42_spill] sm:$0xff] }
 0x3fc   :  { %2369 = vmatprep.subr.bf16.mxu0 %v8692_v37  ;;  %2412 = vmatprep.subr.bf16.mxu1 %v8693_v4 }
 0x3ff   :  { %2370 = vmatpush1.bf16.msra.mxu0 %v8694_v12  ;;  %2413 = vmatpush1.bf16.msra.mxu1 %v8695_v21  ;;  %v7126_v12 = vld [vmem:[#allocation8 + $0x24] ss:$16 sps:$4 sm:$0xff]  }
 0x400   :  { %2371 = vmatprep.subr.bf16.mxu0 %v6892_v8  ;;  %2414 = vmatprep.subr.bf16.mxu1 %v8696_v63  ;;  %8699 = vst [vmem:[#allocation58_spill] sm:$0xff] %v7126_v12  ;;  %v7129_v8 = vld [vmem:[#allocation8 + $0x2c] ss:$16 sps:$4 sm:$0xff]  }
 0x401   :  { %8700 = vst [vmem:[#allocation59_spill] sm:$0xff] %v7129_v8 }
 0x403   :  { %2372 = vmatpush1.bf16.msra.mxu0 %v8697_v32  ;;  %2415 = vmatpush1.bf16.msra.mxu1 %v6901_v46 }
 0x404   :  { %2501 = vmatprep.subr.bf16.mxu0 %v6904_v33  ;;  %2544 = vmatprep.subr.bf16.mxu1 %v8698_v3 }
 0x406   :  { %2390 = vmatmul.mubr.bf16.vlgmr.msra.gmra.mrb[12].mxu0 %v2086_v29  ;;  %2433 = vmatmul.mubr.bf16.vlgmr.msra.gmra.mrb[20].mxu1 %v2086_v29  ;;  %v7136_v29 = vld [vmem:[#allocation8 + $0x44] ss:$16 sps:$4 sm:$0xff]  }
 0x407   :  { %2502 = vmatpush1.bf16.msra.mxu0 %v6912_v44  ;;  %2545 = vmatpush1.bf16.msra.mxu1 %v6915_v59  ;;  %8701 = vst [vmem:[#allocation60_spill] sm:$0xff] %v7136_v29  ;;  %v7139_v59 = vld [vmem:[#allocation8 + $0x4c] ss:$16 sps:$4 sm:$0xff]   ;;  %v7148_v44 = vld [vmem:[#allocation8 + $0x64] ss:$16 sps:$4 sm:$0xff]  }
 0x408   :  { %2503 = vmatprep.subr.bf16.mxu0 %v7126_v12  ;;  %2546 = vmatprep.subr.bf16.mxu1 %v7129_v8  ;;  %8702 = vst [vmem:[#allocation61_spill] sm:$0xff] %v7139_v59  ;;  %v7142_v12 = vld [vmem:[#allocation8 + $0x40] ss:$16 sps:$4 sm:$0xff]   ;;  %v7145_v8 = vld [vmem:[#allocation8 + $0x48] ss:$16 sps:$4 sm:$0xff]   ;;  %8705 = vst [vmem:[#allocation64_spill] sm:$0xff] %v7148_v44 }
 0x409   :  { %2533 = vmatprep.mubr.bf16.mxu0 %v8539_v5  ;;  %2576 = vmatprep.mubr.bf16.mxu1 %v8539_v5  ;;  %8703 = vst [vmem:[#allocation62_spill] sm:$0xff] %v7142_v12  ;;  %8704 = vst [vmem:[#allocation63_spill] sm:$0xff] %v7145_v8 }
 0x40b   :  { %2504 = vmatpush1.bf16.msra.mxu0 %v6922_v42  ;;  %2547 = vmatpush1.bf16.msra.mxu1 %v6925_v45  ;;  %v7151_v45 = vld [vmem:[#allocation8 + $0x6c] ss:$16 sps:$4 sm:$0xff]  }
 0x40c   :  { %2505 = vmatprep.subr.bf16.mxu0 %v7136_v29  ;;  %2548 = vmatprep.subr.bf16.mxu1 %v7139_v59  ;;  %8706 = vst [vmem:[#allocation65_spill] sm:$0xff] %v7151_v45  ;;  %v7154_v29 = vld [vmem:[#allocation8 + $0x60] ss:$16 sps:$4 sm:$0xff]   ;;  %v7157_v59 = vld [vmem:[#allocation8 + $0x68] ss:$16 sps:$4 sm:$0xff]  }
 0x40d   :  { %8707 = vst [vmem:[#allocation66_spill] sm:$0xff] %v7154_v29  ;;  %8708 = vst [vmem:[#allocation67_spill] sm:$0xff] %v7157_v59 }
 0x40f   :  { %2506 = vmatpush1.bf16.msra.mxu0 %v7142_v12  ;;  %2549 = vmatpush1.bf16.msra.mxu1 %v7145_v8  ;;  %v7160_v12 = vld [vmem:[#allocation8 + $0x84] ss:$16 sps:$4 sm:$0xff]   ;;  %v7163_v8 = vld [vmem:[#allocation8 + $0x8c] ss:$16 sps:$4 sm:$0xff]  }
 0x410   :  { %2507 = vmatprep.subr.bf16.mxu0 %v7148_v44  ;;  %2550 = vmatprep.subr.bf16.mxu1 %v7151_v45  ;;  %8709 = vst [vmem:[#allocation29_spill] sm:$0xff] %v7160_v12  ;;  %8710 = vst [vmem:[#allocation79_spill] sm:$0xff] %v7163_v8  ;;  %v7166_v44 = vld [vmem:[#allocation8 + $0x80] ss:$16 sps:$4 sm:$0xff]   ;;  %v7169_v45 = vld [vmem:[#allocation8 + $0x88] ss:$16 sps:$4 sm:$0xff]  }
 0x411   :  { %8711 = vst [vmem:[#allocation80_spill] sm:$0xff] %v7166_v44  ;;  %8712 = vst [vmem:[#allocation81_spill] sm:$0xff] %v7169_v45 }
 0x413   :  { %2508 = vmatpush1.bf16.msra.mxu0 %v7154_v29  ;;  %2551 = vmatpush1.bf16.msra.mxu1 %v7157_v59  ;;  %v7172_v29 = vld [vmem:[#allocation8 + $0xa4] ss:$16 sps:$4 sm:$0xff]   ;;  %v7175_v59 = vld [vmem:[#allocation8 + $0xac] ss:$16 sps:$4 sm:$0xff]  }
 0x414   :  { %2509 = vmatprep.subr.bf16.mxu0 %v7160_v12  ;;  %2552 = vmatprep.subr.bf16.mxu1 %v7163_v8  ;;  %8713 = vst [vmem:[#allocation82_spill] sm:$0xff] %v7172_v29  ;;  %8714 = vst [vmem:[#allocation83_spill] sm:$0xff] %v7175_v59  ;;  %v7178_v12 = vld [vmem:[#allocation8 + $0xa0] ss:$16 sps:$4 sm:$0xff]   ;;  %v7181_v8 = vld [vmem:[#allocation8 + $0xa8] ss:$16 sps:$4 sm:$0xff]  }
 0x415   :  { %8715 = vst [vmem:[#allocation84_spill] sm:$0xff] %v7178_v12  ;;  %8716 = vst [vmem:[#allocation85_spill] sm:$0xff] %v7181_v8 }
 0x417   :  { %2510 = vmatpush1.bf16.msra.mxu0 %v7166_v44  ;;  %2553 = vmatpush1.bf16.msra.mxu1 %v7169_v45  ;;  %v7184_v44 = vld [vmem:[#allocation8 + $0xc4] ss:$16 sps:$4 sm:$0xff]   ;;  %v7187_v45 = vld [vmem:[#allocation8 + $0xcc] ss:$16 sps:$4 sm:$0xff]  }
 0x418   :  { %2511 = vmatprep.subr.bf16.mxu0 %v7172_v29  ;;  %2554 = vmatprep.subr.bf16.mxu1 %v7175_v59  ;;  %8717 = vst [vmem:[#allocation86_spill] sm:$0xff] %v7184_v44  ;;  %8718 = vst [vmem:[#allocation87_spill] sm:$0xff] %v7187_v45  ;;  %v7190_v29 = vld [vmem:[#allocation8 + $0xc0] ss:$16 sps:$4 sm:$0xff]   ;;  %v7193_v59 = vld [vmem:[#allocation8 + $0xc8] ss:$16 sps:$4 sm:$0xff]  }
 0x419   :  { %8719 = vst [vmem:[#allocation88_spill] sm:$0xff] %v7190_v29  ;;  %8720 = vst [vmem:[#allocation89_spill] sm:$0xff] %v7193_v59 }
 0x41b   :  { %2512 = vmatpush1.bf16.msra.mxu0 %v7178_v12  ;;  %2555 = vmatpush1.bf16.msra.mxu1 %v7181_v8  ;;  %v7196_v12 = vld [vmem:[#allocation8 + $0xe4] ss:$16 sps:$4 sm:$0xff]   ;;  %v7199_v8 = vld [vmem:[#allocation8 + $0xec] ss:$16 sps:$4 sm:$0xff]  }
 0x41c   :  { %2513 = vmatprep.subr.bf16.mxu0 %v7184_v44  ;;  %2556 = vmatprep.subr.bf16.mxu1 %v7187_v45  ;;  %8721 = vst [vmem:[#allocation90_spill] sm:$0xff] %v7196_v12  ;;  %8722 = vst [vmem:[#allocation91_spill] sm:$0xff] %v7199_v8  ;;  %v7202_v44 = vld [vmem:[#allocation8 + $0xe0] ss:$16 sps:$4 sm:$0xff]   ;;  %v7205_v45 = vld [vmem:[#allocation8 + $0xe8] ss:$16 sps:$4 sm:$0xff]  }
 0x41d   :  { %8723 = vst [vmem:[#allocation92_spill] sm:$0xff] %v7202_v44  ;;  %8724 = vst [vmem:[#allocation93_spill] sm:$0xff] %v7205_v45 }
 0x41f   :  { %2514 = vmatpush1.bf16.msra.mxu0 %v7190_v29  ;;  %2557 = vmatpush1.bf16.msra.mxu1 %v7193_v59  ;;  %v7208_v29 = vld [vmem:[#allocation6 + $0x4] ss:$16 sps:$4 sm:$0xff]   ;;  %v7211_v59 = vld [vmem:[#allocation6 + $0xc] ss:$16 sps:$4 sm:$0xff]  }
 0x420   :  { %2515 = vmatprep.subr.bf16.mxu0 %v7196_v12  ;;  %2558 = vmatprep.subr.bf16.mxu1 %v7199_v8  ;;  %8725 = vst [vmem:[#allocation94_spill] sm:$0xff] %v7208_v29  ;;  %8726 = vst [vmem:[#allocation95_spill] sm:$0xff] %v7211_v59 }
 0x423   :  { %2516 = vmatpush1.bf16.msra.mxu0 %v7202_v44  ;;  %2559 = vmatpush1.bf16.msra.mxu1 %v7205_v45 }
 0x424   :  { %2587 = vmatprep.subr.bf16.mxu0 %v7208_v29  ;;  %2630 = vmatprep.subr.bf16.mxu1 %v7211_v59 }
 0x4b9   :  { %v2208_v12 = vpop.f32.mrb[32].mxu0  ;;  %v2251_v42 = vpop.f32.mrb[48].mxu1 }
 0x4ba   :  { %v2260_v8 = vadd.f32 %v2208_v12, %v6711_v38  ;;  %v2210_v3 = vpop.f32.mrb[33].mxu0  ;;  %v2253_v33 = vpop.f32.mrb[49].mxu1 }
 0x4bb   :  { %v2261_v44 = vadd.f32 %v2210_v3, %v6715_v40  ;;  %v2212_v46 = vpop.f32.mrb[34].mxu0  ;;  %v2255_v32 = vpop.f32.mrb[50].mxu1  ;;  %v2263_v12 = vadd.f32 %v2253_v33, %v6722_v1  ;;  %v2262_v3 = vadd.f32 %v2251_v42, %v6727_v58 }
 0x4bc   :  { %v4711_v63 = vmul.f32 -1.442695, %v2260_v8  ;;  %v2264_v45 = vadd.f32 %v2212_v46, %v6711_v38  ;;  %v2214_v21 = vpop.f32.mrb[35].mxu0  ;;  %v2257_v4 = vpop.f32.mrb[51].mxu1 }
 0x4bd   :  { %v4713_v29 = vmul.f32 -1.442695, %v2261_v44  ;;  %v2265_v37 = vadd.f32 %v2214_v21, %v6715_v40  ;;  %v2267_v51 = vadd.f32 %v2257_v4, %v6722_v1  ;;  %v4715_v8 = vmul.f32 -1.442695, %v2263_v12 }
 0x4be   :  { %5347 = vpow2.f32 %v4711_v63  ;;  %v4712_v59 = vmul.f32 -1.442695, %v2264_v45  ;;  %v2266_v21 = vadd.f32 %v2255_v32, %v6727_v58 }
 0x4bf   :  { %5349 = vpow2.f32 %v4713_v29  ;;  %v4714_v6 = vmul.f32 -1.442695, %v2265_v37  ;;  %v4716_v34 = vmul.f32 -1.442695, %v2267_v51 }
 0x4c0   :  { %5351 = vpow2.f32 %v4712_v59 }
 0x4c1   :  { %5353 = vpow2.f32 %v4714_v6 }
 0x4c2   :  { %5355 = vtanh.f32 %v2262_v3 }
 0x4c3   :  { %5357 = vpow2.f32 %v4715_v8 }
 0x4c4   :  { %5359 = vpow2.f32 %v4716_v34 }
 0x4c8   :  { %v5348_v46 = vpop.eup %5347 }
 0x4c9   :  { %v5350_v38 = vpop.eup %5349  ;;  %v2274_v44 = vadd.f32 1.0, %v5348_v46 }
 0x4ca   :  { %v2286_v45 = vadd.f32 1.0, %v5350_v38  ;;  %v5352_v37 = vpop.eup %5351 }
 0x4cb   :  { %5361 = vrcp.f32 %v2274_v44  ;;  %v2275_v33 = vadd.f32 1.0, %v5352_v37  ;;  %v5354_v59 = vpop.eup %5353 }
 0x4cc   :  { %5363 = vrcp.f32 %v2286_v45  ;;  %v2287_v6 = vadd.f32 1.0, %v5354_v59  ;;  %v5356_v4 = vpop.eup %5355 }
 0x4cd   :  { %5365 = vtanh.f32 %v2266_v21  ;;  %v5358_v51 = vpop.eup %5357 }
 0x4ce   :  { %5367 = vrcp.f32 %v2275_v33  ;;  %v5360_v42 = vpop.eup %5359  ;;  %v2300_v3 = vadd.f32 1.0, %v5358_v51 }
 0x4cf   :  { %5369 = vrcp.f32 %v2287_v6  ;;  %v2301_v44 = vadd.f32 1.0, %v5360_v42 }
 0x4d0   :  { %5371 = vrcp.f32 %v2300_v3 }
 0x4d5   :  { %v5362_v63 = vpop.eup %5361 }
 0x4d6   :  { %v5364_v29 = vpop.eup %5363  ;;  %v2308_v12 = vmul.f32 %v5362_v63, %v5356_v4 }
 0x4d7   :  { %v5366_v8 = vpop.eup %5365  ;;  %v2306_v38 = vmul.f32 %v5364_v29, %v6963_v22 }
 0x4d8   :  { %v5368_v32 = vpop.eup %5367 }
 0x4d9   :  { %v7223_v34 = vadd.f32 %v2308_v12, %v2306_v38  ;;  %v2309_v46 = vmul.f32 %v5368_v32, %v5366_v8  ;;  %v2391_v45 = vpop.f32.mrb[12].mxu0  ;;  %v2434_v21 = vpop.f32.mrb[20].mxu1 }
 0x4da   :  { %v5370_v37 = vpop.eup %5369  ;;  %v4829_v33 = vadd.f32 %v2391_v45, %v8609_v57  ;;  %v2393_v59 = vpop.f32.mrb[13].mxu0 }
 0x4db   :  { %v2436_v6 = vpop.f32.mrb[21].mxu1  ;;  %v2307_v58 = vmul.f32 %v5370_v37, %v6970_v49  ;;  %v4830_v4 = vadd.f32 %v2393_v59, %v8610_v39  ;;  %v2395_v51 = vpop.f32.mrb[14].mxu0  ;;  %5373 = vtanh.f32 %v7223_v34  ;;  %v4869_v59 = vadd.f32 %v2434_v21, %v8611_v2 }
 0x4dc   :  { %v2438_v63 = vpop.f32.mrb[22].mxu1  ;;  %v4717_v22 = vmul.f32 -1.442695, %v4829_v33  ;;  %v4831_v29 = vadd.f32 %v2395_v51, %v8609_v57  ;;  %v2397_v42 = vpop.f32.mrb[15].mxu0  ;;  %5375 = vrcp.f32 %v2301_v44  ;;  %v4870_v45 = vadd.f32 %v2436_v6, %v6629_v62 }
 0x4dd   :  { %v2440_v12 = vpop.f32.mrb[23].mxu1  ;;  %v7230_v8 = vadd.f32 %v2309_v46, %v2307_v58  ;;  %v4719_v3 = vmul.f32 -1.442695, %v4830_v4  ;;  %v4832_v38 = vadd.f32 %v2397_v42, %v8610_v39  ;;  %v5372_v37 = vpop.eup %5371 }
 0x4de   :  { %5377 = vpow2.f32 %v4717_v22  ;;  %v4718_v32 = vmul.f32 -1.442695, %v4831_v29  ;;  %v4721_v58 = vmul.f32 -1.442695, %v4870_v45  ;;  %v4872_v46 = vadd.f32 %v2440_v12, %v6629_v62 }
 0x4df   :  { %5379 = vtanh.f32 %v7230_v8  ;;  %v4720_v49 = vmul.f32 -1.442695, %v4832_v38  ;;  %v4871_v22 = vadd.f32 %v2438_v63, %v8611_v2 }
 0x4e0   :  { %5381 = vpow2.f32 %v4719_v3  ;;  %v4722_v38 = vmul.f32 -1.442695, %v4872_v46 }
 0x4e1   :  { %5383 = vpow2.f32 %v4718_v32 }
 0x4e2   :  { %5385 = vpow2.f32 %v4720_v49 }
 0x4e3   :  { %5387 = vtanh.f32 %v4869_v59 }
 0x4e4   :  { %5389 = vpow2.f32 %v4721_v58 }
 0x4e5   :  { %v5374_v33 = vpop.eup %5373 }
 0x4e6   :  { %v7237_v44 = vmul.f32 %v5374_v33, %v5372_v37  ;;  %v5376_v4 = vpop.eup %5375 }
 0x4e8   :  { %8727 = vst [vmem:[#allocation96_spill] sm:$0xff] %v7237_v44  ;;  %v5378_v51 = vpop.eup %5377  ;;  %v2316_v29 = vmul.f32 %v6748_v60, %v7237_v44  ;;  %v7249_v60 = vld [vmem:[%s8190_s7] ss:$0 sm:$0xff] }
 0x4e9   :  { %v5380_v42 = vpop.eup %5379  ;;  %v2457_v6 = vadd.f32 1.0, %v5378_v51 }
 0x4ea   :  { %v5382_v3 = vpop.eup %5381  ;;  %2318 = vadd.xlane.f32.xlu0 %v2316_v29  ;;  %v7242_v21 = vmul.f32 %v5380_v42, %v5376_v4 }
 0x4eb   :  { %5391 = vrcp.f32 %v2457_v6  ;;  %v2469_v12 = vadd.f32 1.0, %v5382_v3  ;;  %v5384_v32 = vpop.eup %5383 }
 0x4ec   :  { %8728 = vst [vmem:[#allocation97_spill] sm:$0xff] %v7242_v21  ;;  %5393 = vtanh.f32 %v4871_v22  ;;  %v2500_v49 = vpack.c.bf16 %v7242_v21, %v7237_v44  ;;  %v2317_v63 = vmul.f32 %v7249_v60, %v7242_v21  ;;  %v2458_v45 = vadd.f32 1.0, %v5384_v32  ;;  %v5386_v37 = vpop.eup %5385  ;;  %v8785_v21 = vld [vmem:[#allocation88_spill] sm:$0xff]  ;;  %v8786_v44 = vld [vmem:[#allocation89_spill] sm:$0xff] }
 0x4ed   :  { %5395 = vrcp.f32 %v2469_v12  ;;  %v2470_v33 = vadd.f32 1.0, %v5386_v37  ;;  %v5388_v59 = vpop.eup %5387  ;;  %v8730_v37 = vld [vmem:[#allocation50_spill] sm:$0xff] }
 0x4ee   :  { %5397 = vpow2.f32 %v4722_v38  ;;  %2534 = vmatmul.mubr.bf16.vlgmr.msra.gmra.mrb[36].mxu0 %v2500_v49  ;;  %2577 = vmatmul.mubr.bf16.vlgmr.msra.gmra.mrb[52].mxu1 %v2500_v49  ;;  %v5390_v58 = vpop.eup %5389 }
 0x4ef   :  { %5399 = vrcp.f32 %v2458_v45  ;;  %2588 = vmatpush1.bf16.msra.mxu0 %v6988_v35  ;;  %2631 = vmatpush1.bf16.msra.mxu1 %v6991_v53  ;;  %v2483_v3 = vadd.f32 1.0, %v5390_v58  ;;  %v8729_v45 = vld [vmem:[#allocation49_spill] sm:$0xff]  ;;  %v8734_v58 = vld [vmem:[#allocation54_spill] sm:$0xff] }
 0x4f0   :  { %2320 = vadd.xlane.f32.xlu1 %v2317_v63  ;;  %2589 = vmatprep.subr.bf16.mxu0 %v6994_v50  ;;  %5401 = vrcp.f32 %v2470_v33  ;;  %v8732_v33 = vld [vmem:[#allocation52_spill] sm:$0xff] }
 0x4f1   :  { %2632 = vmatprep.subr.bf16.mxu1 %v6997_v54  ;;  %2619 = vmatprep.mubr.bf16.mxu0 %v8539_v5  ;;  %5403 = vrcp.f32 %v2483_v3 }
 0x4f2   :  { %2662 = vmatprep.mubr.bf16.mxu1 %v8539_v5 }
 0x4f3   :  { %2590 = vmatpush1.bf16.msra.mxu0 %v7002_v55  ;;  %2633 = vmatpush1.bf16.msra.mxu1 %v7005_v56 }
 0x4f4   :  { %2591 = vmatprep.subr.bf16.mxu0 %v7008_v13  ;;  %2634 = vmatprep.subr.bf16.mxu1 %v7011_v14 }
 0x4f5   :  { %v5392_v46 = vpop.eup %5391 }
 0x4f6   :  { %v5394_v4 = vpop.eup %5393  ;;  %v2491_v51 = vmul.f32 %v5392_v46, %v5388_v59  ;;  %v8733_v59 = vld [vmem:[#allocation53_spill] sm:$0xff] }
 0x4f7   :  { %v5396_v22 = vpop.eup %5395  ;;  %2592 = vmatpush1.bf16.msra.mxu0 %v7014_v20  ;;  %2635 = vmatpush1.bf16.msra.mxu1 %v7017_v23 }
 0x4f8   :  { %v5398_v29 = vpop.eup %5397  ;;  %v2489_v42 = vmul.f32 %v5396_v22, %v7027_v31  ;;  %2593 = vmatprep.subr.bf16.mxu0 %v7021_v27  ;;  %2636 = vmatprep.subr.bf16.mxu1 %v7024_v28 }
 0x4f9   :  { %v5400_v6 = vpop.eup %5399  ;;  %v2484_v49 = vadd.f32 1.0, %v5398_v29  ;;  %v8737_v29 = vld [vmem:[#allocation57_spill] sm:$0xff] }
 0x4fa   :  { %v7268_v38 = vadd.f32 %v2491_v51, %v2489_v42  ;;  %v2492_v12 = vmul.f32 %v5400_v6, %v5394_v4  ;;  %v5402_v32 = vpop.eup %5401  ;;  %v8735_v4 = vld [vmem:[#allocation55_spill] sm:$0xff]  ;;  %v8736_v51 = vld [vmem:[#allocation56_spill] sm:$0xff] }
 0x4fb   :  { %2594 = vmatpush1.bf16.msra.mxu0 %v7029_v47  ;;  %2637 = vmatpush1.bf16.msra.mxu1 %v7032_v41  ;;  %v2490_v63 = vmul.f32 %v5402_v32, %v7043_v16  ;;  %v8731_v16 = vld [vmem:[#allocation51_spill] sm:$0xff]  ;;  %v5404_v46 = vpop.eup %5403 }
 0x4fc   :  { %2595 = vmatprep.subr.bf16.mxu0 %v7036_v19  ;;  %2638 = vmatprep.subr.bf16.mxu1 %v7039_v10  ;;  %5405 = vtanh.f32 %v7268_v38 }
 0x4fd   :  { %v7276_v31 = vadd.f32 %v2492_v12, %v2490_v63  ;;  %5407 = vrcp.f32 %v2484_v49  ;;  %v8744_v49 = vld [vmem:[#allocation28_spill] sm:$0xff]  ;;  %v8749_v63 = vld [vmem:[#allocation34_spill] sm:$0xff] }
 0x4ff   :  { %2596 = vmatpush1.bf16.msra.mxu0 %v7045_v18  ;;  %2639 = vmatpush1.bf16.msra.mxu1 %v7048_v24  ;;  %5409 = vtanh.f32 %v7276_v31 }
 0x500   :  { %2597 = vmatprep.subr.bf16.mxu0 %v8729_v45  ;;  %2640 = vmatprep.subr.bf16.mxu1 %v8730_v37 }
 0x503   :  { %2598 = vmatpush1.bf16.msra.mxu0 %v8731_v16  ;;  %2641 = vmatpush1.bf16.msra.mxu1 %v8732_v33 }
 0x504   :  { %2599 = vmatprep.subr.bf16.mxu0 %v8733_v59  ;;  %2642 = vmatprep.subr.bf16.mxu1 %v8734_v58 }
 0x506   :  { %v5406_v22 = vpop.eup %5405 }
 0x507   :  { %2600 = vmatpush1.bf16.msra.mxu0 %v8735_v4  ;;  %2643 = vmatpush1.bf16.msra.mxu1 %v8736_v51  ;;  %v5408_v42 = vpop.eup %5407  ;;  %v2497_v3 = vmul.f32 %v5406_v22, %v5404_v46  ;;  %v8750_v46 = vld [vmem:[#allocation35_spill] sm:$0xff]  ;;  %v8751_v22 = vld [vmem:[#allocation36_spill] sm:$0xff] }
 0x508   :  { %2601 = vmatprep.subr.bf16.mxu0 %v8737_v29  ;;  %2644 = vmatprep.subr.bf16.mxu1 %v7079_v30 }
 0x509   :  { %v5410_v6 = vpop.eup %5409 }
 0x50a   :  { %v2498_v12 = vmul.f32 %v5410_v6, %v5408_v42  ;;  %v8752_v42 = vld [vmem:[#allocation37_spill] sm:$0xff]  ;;  %v8753_v6 = vld [vmem:[#allocation76_spill] sm:$0xff] }
 0x50b   :  { %2602 = vmatpush1.bf16.msra.mxu0 %v7082_v26  ;;  %2645 = vmatpush1.bf16.msra.mxu1 %v7085_v15 }
 0x50c   :  { %2770 = vmatprep.subr.bf16.mxu0 %v6802_v9  ;;  %2813 = vmatprep.subr.bf16.mxu1 %v6805_v7  ;;  %v2499_v32 = vpack.c.bf16 %v2498_v12, %v2497_v3  ;;  %v8738_v9 = vld [vmem:[#allocation22_spill] sm:$0xff]  ;;  %v8739_v7 = vld [vmem:[#allocation23_spill] sm:$0xff]  ;;  %v8754_v3 = vld [vmem:[#allocation77_spill] sm:$0xff] }
 0x50d   :  { %v8756_v12 = vld [vmem:[#allocation38_spill] sm:$0xff] }
 0x50e   :  { %2620 = vmatmul.mubr.bf16.vlgmr.msra.gmra.mrb[36].mxu0 %v2499_v32  ;;  %2663 = vmatmul.mubr.bf16.vlgmr.msra.gmra.mrb[52].mxu1 %v2499_v32 }
 0x50f   :  { %2771 = vmatpush1.bf16.msra.mxu0 %v6812_v48  ;;  %2814 = vmatpush1.bf16.msra.mxu1 %v6815_v11  ;;  %v8740_v48 = vld [vmem:[#allocation24_spill] sm:$0xff]  ;;  %v8741_v11 = vld [vmem:[#allocation25_spill] sm:$0xff] }
 0x510   :  { %2772 = vmatprep.subr.bf16.mxu0 %v6818_v52  ;;  %2815 = vmatprep.subr.bf16.mxu1 %v6821_v36  ;;  %v8742_v52 = vld [vmem:[#allocation26_spill] sm:$0xff]  ;;  %v8743_v36 = vld [vmem:[#allocation27_spill] sm:$0xff] }
 0x511   :  { %2802 = vmatprep.mubr.bf16.mxu0 %v8539_v5  ;;  %2845 = vmatprep.mubr.bf16.mxu1 %v8539_v5 }
 0x513   :  { %2773 = vmatpush1.bf16.msra.mxu0 %v6826_v17  ;;  %2816 = vmatpush1.bf16.msra.mxu1 %v6829_v0  ;;  %v8745_v17 = vld [vmem:[#allocation30_spill] sm:$0xff]  ;;  %v8746_v0 = vld [vmem:[#allocation31_spill] sm:$0xff] }
 0x514   :  { %2774 = vmatprep.subr.bf16.mxu0 %v6832_v25  ;;  %2817 = vmatprep.subr.bf16.mxu1 %v6835_v61  ;;  %v8747_v25 = vld [vmem:[#allocation32_spill] sm:$0xff]  ;;  %v8748_v61 = vld [vmem:[#allocation33_spill] sm:$0xff] }
 0x517   :  { %2775 = vmatpush1.bf16.msra.mxu0 %v8738_v9  ;;  %2818 = vmatpush1.bf16.msra.mxu1 %v8739_v7  ;;  %v8757_v9 = vld [vmem:[#allocation39_spill] sm:$0xff]  ;;  %v8758_v7 = vld [vmem:[#allocation40_spill] sm:$0xff] }
 0x518   :  { %2776 = vmatprep.subr.bf16.mxu0 %v8740_v48  ;;  %2819 = vmatprep.subr.bf16.mxu1 %v8741_v11  ;;  %v8759_v48 = vld [vmem:[#allocation41_spill] sm:$0xff]  ;;  %v8760_v11 = vld [vmem:[#allocation42_spill] sm:$0xff] }
 0x51b   :  { %2777 = vmatpush1.bf16.msra.mxu0 %v8742_v52  ;;  %2820 = vmatpush1.bf16.msra.mxu1 %v8743_v36  ;;  %v8761_v52 = vld [vmem:[#allocation43_spill] sm:$0xff]  ;;  %v8762_v36 = vld [vmem:[#allocation44_spill] sm:$0xff] }
 0x51c   :  { %2778 = vmatprep.subr.bf16.mxu0 %v8744_v49  ;;  %2821 = vmatprep.subr.bf16.mxu1 %v8685_v43  ;;  %v8755_v43 = vld [vmem:[#allocation78_spill] sm:$0xff] }
 0x51d   :  { %v8763_v49 = vld [vmem:[#allocation58_spill] sm:$0xff] }
 0x51f   :  { %2779 = vmatpush1.bf16.msra.mxu0 %v8745_v17  ;;  %2822 = vmatpush1.bf16.msra.mxu1 %v8746_v0  ;;  %v8764_v17 = vld [vmem:[#allocation59_spill] sm:$0xff]  ;;  %v8765_v0 = vld [vmem:[#allocation45_spill] sm:$0xff] }
 0x520   :  { %2780 = vmatprep.subr.bf16.mxu0 %v8747_v25  ;;  %2823 = vmatprep.subr.bf16.mxu1 %v8748_v61  ;;  %v8766_v25 = vld [vmem:[#allocation46_spill] sm:$0xff]  ;;  %v8767_v61 = vld [vmem:[#allocation60_spill] sm:$0xff] }
 0x523   :  { %2781 = vmatpush1.bf16.msra.mxu0 %v8749_v63  ;;  %2824 = vmatpush1.bf16.msra.mxu1 %v8750_v46  ;;  %v8768_v63 = vld [vmem:[#allocation61_spill] sm:$0xff]  ;;  %v8770_v46 = vld [vmem:[#allocation63_spill] sm:$0xff] }
 0x524   :  { %2782 = vmatprep.subr.bf16.mxu0 %v8751_v22  ;;  %2825 = vmatprep.subr.bf16.mxu1 %v8752_v42  ;;  %v8771_v22 = vld [vmem:[#allocation64_spill] sm:$0xff]  ;;  %v8772_v42 = vld [vmem:[#allocation65_spill] sm:$0xff] }
 0x527   :  { %2783 = vmatpush1.bf16.msra.mxu0 %v8753_v6  ;;  %2826 = vmatpush1.bf16.msra.mxu1 %v8754_v3  ;;  %v8773_v6 = vld [vmem:[#allocation66_spill] sm:$0xff]  ;;  %v8774_v3 = vld [vmem:[#allocation67_spill] sm:$0xff] }
 0x528   :  { %2784 = vmatprep.subr.bf16.mxu0 %v8755_v43  ;;  %2827 = vmatprep.subr.bf16.mxu1 %v8756_v12  ;;  %v8775_v43 = vld [vmem:[#allocation29_spill] sm:$0xff]  ;;  %v8776_v12 = vld [vmem:[#allocation79_spill] sm:$0xff] }
 0x52b   :  { %2785 = vmatpush1.bf16.msra.mxu0 %v8757_v9  ;;  %2828 = vmatpush1.bf16.msra.mxu1 %v8758_v7  ;;  %v8777_v9 = vld [vmem:[#allocation80_spill] sm:$0xff]  ;;  %v8778_v7 = vld [vmem:[#allocation81_spill] sm:$0xff] }
 0x52c   :  { %2914 = vmatprep.subr.bf16.mxu0 %v8759_v48  ;;  %2957 = vmatprep.subr.bf16.mxu1 %v8760_v11  ;;  %v8779_v48 = vld [vmem:[#allocation82_spill] sm:$0xff]  ;;  %v8780_v11 = vld [vmem:[#allocation83_spill] sm:$0xff] }
 0x52e   :  { %2803 = vmatmul.mubr.bf16.vlgmr.msra.gmra.mrb[16].mxu0 %v2499_v32  ;;  %2846 = vmatmul.mubr.bf16.vlgmr.msra.gmra.mrb[24].mxu1 %v2499_v32  ;;  %v8769_v32 = vld [vmem:[#allocation62_spill] sm:$0xff] }
 0x52f   :  { %2915 = vmatpush1.bf16.msra.mxu0 %v8761_v52  ;;  %2958 = vmatpush1.bf16.msra.mxu1 %v8762_v36  ;;  %v8781_v52 = vld [vmem:[#allocation84_spill] sm:$0xff]  ;;  %v8782_v36 = vld [vmem:[#allocation85_spill] sm:$0xff] }
 0x530   :  { %2916 = vmatprep.subr.bf16.mxu0 %v8763_v49  ;;  %2959 = vmatprep.subr.bf16.mxu1 %v8764_v17 }
 0x531   :  { %2946 = vmatprep.mubr.bf16.mxu0 %v8539_v5  ;;  %2989 = vmatprep.mubr.bf16.mxu1 %v8539_v5 }
 0x533   :  { %2917 = vmatpush1.bf16.msra.mxu0 %v8765_v0  ;;  %2960 = vmatpush1.bf16.msra.mxu1 %v8766_v25  ;;  %v8783_v0 = vld [vmem:[#allocation86_spill] sm:$0xff]  ;;  %v8784_v25 = vld [vmem:[#allocation87_spill] sm:$0xff] }
 0x534   :  { %2918 = vmatprep.subr.bf16.mxu0 %v8767_v61  ;;  %2961 = vmatprep.subr.bf16.mxu1 %v8768_v63 }
 0x537   :  { %2919 = vmatpush1.bf16.msra.mxu0 %v8769_v32  ;;  %2962 = vmatpush1.bf16.msra.mxu1 %v8770_v46 }
 0x538   :  { %2920 = vmatprep.subr.bf16.mxu0 %v8771_v22  ;;  %2963 = vmatprep.subr.bf16.mxu1 %v8772_v42 }
 0x53b   :  { %2921 = vmatpush1.bf16.msra.mxu0 %v8773_v6  ;;  %2964 = vmatpush1.bf16.msra.mxu1 %v8774_v3 }
 0x53c   :  { %2922 = vmatprep.subr.bf16.mxu0 %v8775_v43  ;;  %2965 = vmatprep.subr.bf16.mxu1 %v8776_v12  ;;  %v8787_v12 = vld [vmem:[#allocation90_spill] sm:$0xff]  ;;  %v8793_v43 = vld [vmem:[#allocation16_spill] sm:$0xff] }
 0x53f   :  { %2923 = vmatpush1.bf16.msra.mxu0 %v8777_v9  ;;  %2966 = vmatpush1.bf16.msra.mxu1 %v8778_v7  ;;  %v8788_v9 = vld [vmem:[#allocation91_spill] sm:$0xff]  ;;  %v8789_v7 = vld [vmem:[#allocation92_spill] sm:$0xff] }
 0x540   :  { %2924 = vmatprep.subr.bf16.mxu0 %v8779_v48  ;;  %2967 = vmatprep.subr.bf16.mxu1 %v8780_v11  ;;  %v8790_v48 = vld [vmem:[#allocation93_spill] sm:$0xff]  ;;  %v8791_v11 = vld [vmem:[#allocation94_spill] sm:$0xff] }
 0x543   :  { %2925 = vmatpush1.bf16.msra.mxu0 %v8781_v52  ;;  %2968 = vmatpush1.bf16.msra.mxu1 %v8782_v36  ;;  %v8792_v52 = vld [vmem:[#allocation95_spill] sm:$0xff] }
 0x544   :  { %2926 = vmatprep.subr.bf16.mxu0 %v8783_v0  ;;  %2969 = vmatprep.subr.bf16.mxu1 %v8784_v25 }
 0x547   :  { %2927 = vmatpush1.bf16.msra.mxu0 %v8785_v21  ;;  %2970 = vmatpush1.bf16.msra.mxu1 %v8786_v44 }
 0x548   :  { %2928 = vmatprep.subr.bf16.mxu0 %v8787_v12  ;;  %2971 = vmatprep.subr.bf16.mxu1 %v8788_v9 }
 0x54b   :  { %2929 = vmatpush1.bf16.msra.mxu0 %v8789_v7  ;;  %2972 = vmatpush1.bf16.msra.mxu1 %v8790_v48 }
 0x54c   :  { %3000 = vmatprep.subr.bf16.mxu0 %v8791_v11  ;;  %3043 = vmatprep.subr.bf16.mxu1 %v8792_v52 }
 0x5e1   :  { %v2621_v36 = vpop.f32.mrb[36].mxu0  ;;  %v2664_v0 = vpop.f32.mrb[52].mxu1 }
 0x5e2   :  { %v2673_v25 = vadd.f32 %v2621_v36, %v8793_v43  ;;  %v2623_v3 = vpop.f32.mrb[37].mxu0  ;;  %v2666_v21 = vpop.f32.mrb[53].mxu1 }
 0x5e3   :  { %v2674_v44 = vadd.f32 %v2623_v3, %v6715_v40  ;;  %v2625_v6 = vpop.f32.mrb[38].mxu0  ;;  %v2668_v12 = vpop.f32.mrb[54].mxu1  ;;  %v2676_v36 = vadd.f32 %v2666_v21, %v6722_v1  ;;  %v8794_v3 = vld [vmem:[#allocation19_spill] sm:$0xff] }
 0x5e4   :  { %v4723_v42 = vmul.f32 -1.442695, %v2673_v25  ;;  %v2677_v9 = vadd.f32 %v2625_v6, %v8793_v43  ;;  %v2627_v7 = vpop.f32.mrb[39].mxu0  ;;  %v2670_v22 = vpop.f32.mrb[55].mxu1  ;;  %v2675_v63 = vadd.f32 %v2664_v0, %v8794_v3 }
 0x5e5   :  { %v4725_v48 = vmul.f32 -1.442695, %v2674_v44  ;;  %v2678_v11 = vadd.f32 %v2627_v7, %v6715_v40  ;;  %v2680_v32 = vadd.f32 %v2670_v22, %v6722_v1  ;;  %v4727_v25 = vmul.f32 -1.442695, %v2676_v36 }
 0x5e6   :  { %5411 = vpow2.f32 %v4723_v42  ;;  %v4724_v52 = vmul.f32 -1.442695, %v2677_v9  ;;  %v2679_v42 = vadd.f32 %v2668_v12, %v8794_v3 }
 0x5e7   :  { %5413 = vpow2.f32 %v4725_v48  ;;  %v4726_v46 = vmul.f32 -1.442695, %v2678_v11  ;;  %v4728_v61 = vmul.f32 -1.442695, %v2680_v32 }
 0x5e8   :  { %5415 = vpow2.f32 %v4724_v52 }
 0x5e9   :  { %5417 = vpow2.f32 %v4726_v46 }
 0x5ea   :  { %5419 = vtanh.f32 %v2675_v63 }
 0x5eb   :  { %5421 = vpow2.f32 %v4727_v25 }
 0x5ec   :  { %5423 = vpow2.f32 %v4728_v61 }
 0x5f0   :  { %v5412_v6 = vpop.eup %5411 }
 0x5f1   :  { %v5414_v43 = vpop.eup %5413  ;;  %v2687_v44 = vadd.f32 1.0, %v5412_v6 }
 0x5f2   :  { %v2699_v9 = vadd.f32 1.0, %v5414_v43  ;;  %v5416_v7 = vpop.eup %5415 }
 0x5f3   :  { %5425 = vrcp.f32 %v2687_v44  ;;  %v2688_v21 = vadd.f32 1.0, %v5416_v7  ;;  %v5418_v48 = vpop.eup %5417 }
 0x5f4   :  { %5427 = vrcp.f32 %v2699_v9  ;;  %v2700_v46 = vadd.f32 1.0, %v5418_v48  ;;  %v5420_v22 = vpop.eup %5419 }
 0x5f5   :  { %5429 = vtanh.f32 %v2679_v42  ;;  %v5422_v32 = vpop.eup %5421 }
 0x5f6   :  { %5431 = vrcp.f32 %v2688_v21  ;;  %v5424_v11 = vpop.eup %5423  ;;  %v2713_v36 = vadd.f32 1.0, %v5422_v32 }
 0x5f7   :  { %5433 = vrcp.f32 %v2700_v46  ;;  %v2714_v44 = vadd.f32 1.0, %v5424_v11 }
 0x5f8   :  { %5435 = vrcp.f32 %v2713_v36 }
 0x5fd   :  { %v5426_v63 = vpop.eup %5425 }
 0x5fe   :  { %v5428_v52 = vpop.eup %5427  ;;  %v2721_v0 = vmul.f32 %v5426_v63, %v5420_v22 }
 0x5ff   :  { %v5430_v25 = vpop.eup %5429  ;;  %v2719_v43 = vmul.f32 %v5428_v52, %v7223_v34 }
 0x600   :  { %v5432_v61 = vpop.eup %5431 }
 0x601   :  { %v7372_v12 = vadd.f32 %v2721_v0, %v2719_v43  ;;  %v2722_v6 = vmul.f32 %v5432_v61, %v5430_v25  ;;  %v2804_v9 = vpop.f32.mrb[16].mxu0  ;;  %v2847_v42 = vpop.f32.mrb[24].mxu1 }
 0x602   :  { %v5434_v7 = vpop.eup %5433  ;;  %v4833_v21 = vadd.f32 %v2804_v9, %v8609_v57  ;;  %v2806_v48 = vpop.f32.mrb[17].mxu0 }
 0x603   :  { %v2849_v46 = vpop.f32.mrb[25].mxu1  ;;  %v2720_v3 = vmul.f32 %v5434_v7, %v7230_v8  ;;  %v4834_v22 = vadd.f32 %v2806_v48, %v8610_v39  ;;  %v2808_v32 = vpop.f32.mrb[18].mxu0  ;;  %5437 = vtanh.f32 %v7372_v12  ;;  %v4873_v48 = vadd.f32 %v2847_v42, %v8611_v2 }
 0x604   :  { %v2851_v63 = vpop.f32.mrb[26].mxu1  ;;  %v4729_v34 = vmul.f32 -1.442695, %v4833_v21  ;;  %v4835_v52 = vadd.f32 %v2808_v32, %v8609_v57  ;;  %v2810_v11 = vpop.f32.mrb[19].mxu0  ;;  %5439 = vrcp.f32 %v2714_v44  ;;  %v4874_v9 = vadd.f32 %v2849_v46, %v6629_v62 }
 0x605   :  { %v2853_v0 = vpop.f32.mrb[27].mxu1  ;;  %v7379_v25 = vadd.f32 %v2722_v6, %v2720_v3  ;;  %v4731_v36 = vmul.f32 -1.442695, %v4834_v22  ;;  %v4836_v43 = vadd.f32 %v2810_v11, %v8610_v39  ;;  %v5436_v7 = vpop.eup %5435 }
 0x606   :  { %5441 = vpow2.f32 %v4729_v34  ;;  %v4730_v61 = vmul.f32 -1.442695, %v4835_v52  ;;  %v4733_v3 = vmul.f32 -1.442695, %v4874_v9  ;;  %v4876_v6 = vadd.f32 %v2853_v0, %v6629_v62 }
 0x607   :  { %5443 = vtanh.f32 %v7379_v25  ;;  %v4732_v8 = vmul.f32 -1.442695, %v4836_v43  ;;  %v4875_v34 = vadd.f32 %v2851_v63, %v8611_v2 }
 0x608   :  { %5445 = vpow2.f32 %v4731_v36  ;;  %v4734_v43 = vmul.f32 -1.442695, %v4876_v6 }
 0x609   :  { %5447 = vpow2.f32 %v4730_v61 }
 0x60a   :  { %5449 = vpow2.f32 %v4732_v8 }
 0x60b   :  { %5451 = vtanh.f32 %v4873_v48 }
 0x60c   :  { %5453 = vpow2.f32 %v4733_v3 }
 0x60d   :  { %v5438_v21 = vpop.eup %5437 }
 0x60e   :  { %v7386_v44 = vmul.f32 %v5438_v21, %v5436_v7  ;;  %v5440_v22 = vpop.eup %5439 }
 0x610   :  { %8795 = vst [vmem:[#allocation49_spill] sm:$0xff] %v7386_v44  ;;  %v5442_v32 = vpop.eup %5441  ;;  %v2729_v52 = vmul.f32 %v7249_v60, %v7386_v44 }
 0x611   :  { %v5444_v11 = vpop.eup %5443  ;;  %v2870_v46 = vadd.f32 1.0, %v5442_v32 }
 0x612   :  { %v5446_v36 = vpop.eup %5445  ;;  %2731 = vadd.xlane.f32.xlu0 %v2729_v52  ;;  %v7391_v42 = vmul.f32 %v5444_v11, %v5440_v22  ;;  %v7488_v52 = vld [vmem:[#allocation3 + $0x68] ss:$16 sps:$4 sm:$0xff]   ;;  %v7491_v11 = vld [vmem:[#allocation3 + $0x84] ss:$16 sps:$4 sm:$0xff]  }
 0x613   :  { %5455 = vrcp.f32 %v2870_v46  ;;  %v2882_v0 = vadd.f32 1.0, %v5446_v36  ;;  %v5448_v61 = vpop.eup %5447  ;;  %v7494_v46 = vld [vmem:[#allocation3 + $0x8c] ss:$16 sps:$4 sm:$0xff]   ;;  %v7497_v36 = vld [vmem:[#allocation3 + $0x80] ss:$16 sps:$4 sm:$0xff]  }
 0x614   :  { %8796 = vst [vmem:[#allocation50_spill] sm:$0xff] %v7391_v42  ;;  %5457 = vtanh.f32 %v4875_v34  ;;  %v2913_v8 = vpack.c.bf16 %v7391_v42, %v7386_v44  ;;  %v2730_v63 = vmul.f32 %v7249_v60, %v7391_v42  ;;  %v2871_v9 = vadd.f32 1.0, %v5448_v61  ;;  %v5450_v7 = vpop.eup %5449  ;;  %8797 = vst [vmem:[#allocation51_spill] sm:$0xff] %v7494_v46  ;;  %v7506_v61 = vld [vmem:[#allocation3 + $0xac] ss:$16 sps:$4 sm:$0xff]  }
 0x615   :  { %5459 = vrcp.f32 %v2882_v0  ;;  %v2883_v21 = vadd.f32 1.0, %v5450_v7  ;;  %v5452_v48 = vpop.eup %5451  ;;  %8798 = vst [vmem:[#allocation52_spill] sm:$0xff] %v7497_v36  ;;  %v7503_v0 = vld [vmem:[#allocation3 + $0xa4] ss:$16 sps:$4 sm:$0xff]   ;;  %8801 = vst [vmem:[#allocation55_spill] sm:$0xff] %v7506_v61 }
 0x616   :  { %5461 = vpow2.f32 %v4734_v43  ;;  %2947 = vmatmul.mubr.bf16.vlgmr.msra.gmra.mrb[40].mxu0 %v2913_v8  ;;  %2990 = vmatmul.mubr.bf16.vlgmr.msra.gmra.mrb[56].mxu1 %v2913_v8  ;;  %v5454_v3 = vpop.eup %5453  ;;  %v7500_v43 = vld [vmem:[#allocation3 + $0x88] ss:$16 sps:$4 sm:$0xff]   ;;  %8800 = vst [vmem:[#allocation54_spill] sm:$0xff] %v7503_v0  ;;  %v7509_v8 = vld [vmem:[#allocation3 + $0xa0] ss:$16 sps:$4 sm:$0xff]  }
 0x617   :  { %5463 = vrcp.f32 %v2871_v9  ;;  %3001 = vmatpush1.bf16.msra.mxu0 %v6988_v35  ;;  %3044 = vmatpush1.bf16.msra.mxu1 %v6991_v53  ;;  %8799 = vst [vmem:[#allocation53_spill] sm:$0xff] %v7500_v43  ;;  %8802 = vst [vmem:[#allocation56_spill] sm:$0xff] %v7509_v8  ;;  %v7515_v9 = vld [vmem:[#allocation3 + $0xc4] ss:$16 sps:$4 sm:$0xff]   ;;  %v7518_v7 = vld [vmem:[#allocation3 + $0xcc] ss:$16 sps:$4 sm:$0xff]  }
 0x618   :  { %2733 = vadd.xlane.f32.xlu1 %v2730_v63  ;;  %3002 = vmatprep.subr.bf16.mxu0 %v6994_v50  ;;  %5465 = vrcp.f32 %v2883_v21  ;;  %v7512_v63 = vld [vmem:[#allocation3 + $0xa8] ss:$16 sps:$4 sm:$0xff]   ;;  %8804 = vst [vmem:[#allocation22_spill] sm:$0xff] %v7515_v9  ;;  %8805 = vst [vmem:[#allocation23_spill] sm:$0xff] %v7518_v7  ;;  %v7521_v21 = vld [vmem:[#allocation3 + $0xc0] ss:$16 sps:$4 sm:$0xff]  }
 0x619   :  { %3045 = vmatprep.subr.bf16.mxu1 %v6997_v54  ;;  %3032 = vmatprep.mubr.bf16.mxu0 %v8539_v5  ;;  %8803 = vst [vmem:[#allocation57_spill] sm:$0xff] %v7512_v63  ;;  %8806 = vst [vmem:[#allocation24_spill] sm:$0xff] %v7521_v21 }
 0x61a   :  { %3075 = vmatprep.mubr.bf16.mxu1 %v8539_v5 }
 0x61b   :  { %3003 = vmatpush1.bf16.msra.mxu0 %v7002_v55  ;;  %3046 = vmatpush1.bf16.msra.mxu1 %v7005_v56  ;;  %v2896_v56 = vadd.f32 1.0, %v5454_v3  ;;  %v7527_v3 = vld [vmem:[#allocation3 + $0xe4] ss:$16 sps:$4 sm:$0xff]  }
 0x61c   :  { %3004 = vmatprep.subr.bf16.mxu0 %v7008_v13  ;;  %3047 = vmatprep.subr.bf16.mxu1 %v7011_v14  ;;  %8808 = vst [vmem:[#allocation26_spill] sm:$0xff] %v7527_v3 }
 0x61d   :  { %v5456_v35 = vpop.eup %5455  ;;  %5467 = vrcp.f32 %v2896_v56  ;;  %v7557_v56 = vld [vmem:[#allocation8 + $0x20] ss:$16 sps:$4 sm:$0xff]  }
 0x61e   :  { %v5458_v53 = vpop.eup %5457  ;;  %v2904_v50 = vmul.f32 %v5456_v35, %v5452_v48  ;;  %v7524_v48 = vld [vmem:[#allocation3 + $0xc8] ss:$16 sps:$4 sm:$0xff]   ;;  %v7530_v35 = vld [vmem:[#allocation3 + $0xec] ss:$16 sps:$4 sm:$0xff]   ;;  %8816 = vst [vmem:[#allocation35_spill] sm:$0xff] %v7557_v56 }
 0x61f   :  { %v5460_v6 = vpop.eup %5459  ;;  %3005 = vmatpush1.bf16.msra.mxu0 %v7014_v20  ;;  %3048 = vmatpush1.bf16.msra.mxu1 %v7017_v23  ;;  %8807 = vst [vmem:[#allocation25_spill] sm:$0xff] %v7524_v48  ;;  %8809 = vst [vmem:[#allocation27_spill] sm:$0xff] %v7530_v35 }
 0x620   :  { %v5462_v54 = vpop.eup %5461  ;;  %v2902_v22 = vmul.f32 %v5460_v6, %v7268_v38  ;;  %3006 = vmatprep.subr.bf16.mxu0 %v7021_v27  ;;  %3049 = vmatprep.subr.bf16.mxu1 %v7024_v28  ;;  %v7539_v6 = vld [vmem:[#allocation8 + $0x4] ss:$16 sps:$4 sm:$0xff]  }
 0x621   :  { %v5464_v55 = vpop.eup %5463  ;;  %v2897_v34 = vadd.f32 1.0, %v5462_v54  ;;  %8812 = vst [vmem:[#allocation31_spill] sm:$0xff] %v7539_v6  ;;  %v7542_v54 = vld [vmem:[#allocation8 + $0xc] ss:$16 sps:$4 sm:$0xff]  }
 0x622   :  { %v7412_v13 = vadd.f32 %v2904_v50, %v2902_v22  ;;  %v2905_v14 = vmul.f32 %v5464_v55, %v5458_v53  ;;  %v5466_v32 = vpop.eup %5465  ;;  %v7533_v53 = vld [vmem:[#allocation3 + $0xe0] ss:$16 sps:$4 sm:$0xff]   ;;  %v7536_v50 = vld [vmem:[#allocation3 + $0xe8] ss:$16 sps:$4 sm:$0xff]   ;;  %8813 = vst [vmem:[#allocation32_spill] sm:$0xff] %v7542_v54 }
 0x623   :  { %3007 = vmatpush1.bf16.msra.mxu0 %v7029_v47  ;;  %3050 = vmatpush1.bf16.msra.mxu1 %v7032_v41  ;;  %v2903_v20 = vmul.f32 %v5466_v32, %v7276_v31  ;;  %v7456_v31 = vld [vmem:[#allocation3 + $0x2c] ss:$16 sps:$4 sm:$0xff]   ;;  %8810 = vst [vmem:[#allocation28_spill] sm:$0xff] %v7533_v53  ;;  %8811 = vst [vmem:[#allocation30_spill] sm:$0xff] %v7536_v50  ;;  %v7547_v22 = vld [vmem:[#allocation8] ss:$16 sps:$4 sm:$0xff]  }
 0x624   :  { %3008 = vmatprep.subr.bf16.mxu0 %v7036_v19  ;;  %3051 = vmatprep.subr.bf16.mxu1 %v7039_v10  ;;  %5469 = vtanh.f32 %v7412_v13  ;;  %8814 = vst [vmem:[#allocation33_spill] sm:$0xff] %v7547_v22  ;;  %v7550_v55 = vld [vmem:[#allocation8 + $0x8] ss:$16 sps:$4 sm:$0xff]  }
 0x625   :  { %v7420_v23 = vadd.f32 %v2905_v14, %v2903_v20  ;;  %5471 = vrcp.f32 %v2897_v34  ;;  %8815 = vst [vmem:[#allocation34_spill] sm:$0xff] %v7550_v55  ;;  %v7560_v14 = vld [vmem:[#allocation8 + $0x28] ss:$16 sps:$4 sm:$0xff]   ;;  %v8819_v34 = vld [vmem:[#allocation61_spill] sm:$0xff] }
 0x626   :  { %8817 = vst [vmem:[#allocation36_spill] sm:$0xff] %v7560_v14  ;;  %v8818_v32 = vld [vmem:[#allocation60_spill] sm:$0xff]  ;;  %v8820_v20 = vld [vmem:[#allocation62_spill] sm:$0xff] }
 0x627   :  { %3009 = vmatpush1.bf16.msra.mxu0 %v7045_v18  ;;  %3052 = vmatpush1.bf16.msra.mxu1 %v7048_v24  ;;  %5473 = vtanh.f32 %v7420_v23  ;;  %v5468_v27 = vpop.eup %5467  ;;  %v7437_v18 = vld [vmem:[#allocation3 + $0x4] ss:$16 sps:$4 sm:$0xff]   ;;  %v7440_v24 = vld [vmem:[#allocation3 + $0xc] ss:$16 sps:$4 sm:$0xff]  }
 0x628   :  { %3010 = vmatprep.subr.bf16.mxu0 %v8729_v45  ;;  %3053 = vmatprep.subr.bf16.mxu1 %v8730_v37  ;;  %v7461_v45 = vld [vmem:[#allocation3 + $0x20] ss:$16 sps:$4 sm:$0xff]   ;;  %v7464_v37 = vld [vmem:[#allocation3 + $0x28] ss:$16 sps:$4 sm:$0xff]  }
 0x62b   :  { %3011 = vmatpush1.bf16.msra.mxu0 %v8731_v16  ;;  %3054 = vmatpush1.bf16.msra.mxu1 %v8732_v33  ;;  %v7467_v16 = vld [vmem:[#allocation3 + $0x44] ss:$16 sps:$4 sm:$0xff]   ;;  %v7470_v33 = vld [vmem:[#allocation3 + $0x4c] ss:$16 sps:$4 sm:$0xff]  }
 0x62c   :  { %3012 = vmatprep.subr.bf16.mxu0 %v8733_v59  ;;  %3055 = vmatprep.subr.bf16.mxu1 %v8734_v58  ;;  %v7473_v59 = vld [vmem:[#allocation3 + $0x40] ss:$16 sps:$4 sm:$0xff]   ;;  %v7476_v58 = vld [vmem:[#allocation3 + $0x48] ss:$16 sps:$4 sm:$0xff]  }
 0x62e   :  { %v5470_v28 = vpop.eup %5469 }
 0x62f   :  { %3013 = vmatpush1.bf16.msra.mxu0 %v8735_v4  ;;  %3056 = vmatpush1.bf16.msra.mxu1 %v8736_v51  ;;  %v5472_v47 = vpop.eup %5471  ;;  %v2910_v19 = vmul.f32 %v5470_v28, %v5468_v27  ;;  %v7479_v4 = vld [vmem:[#allocation3 + $0x64] ss:$16 sps:$4 sm:$0xff]   ;;  %v7482_v51 = vld [vmem:[#allocation3 + $0x6c] ss:$16 sps:$4 sm:$0xff]  }
 0x630   :  { %3014 = vmatprep.subr.bf16.mxu0 %v8737_v29  ;;  %3057 = vmatprep.subr.bf16.mxu1 %v7079_v30  ;;  %v7447_v30 = vld [vmem:[#allocation3] ss:$16 sps:$4 sm:$0xff]   ;;  %v8824_v28 = vld [vmem:[#allocation66_spill] sm:$0xff] }
 0x631   :  { %v5474_v41 = vpop.eup %5473  ;;  %v7485_v29 = vld [vmem:[#allocation3 + $0x60] ss:$16 sps:$4 sm:$0xff]  }
 0x632   :  { %v2911_v10 = vmul.f32 %v5474_v41, %v5472_v47  ;;  %v8823_v27 = vld [vmem:[#allocation65_spill] sm:$0xff]  ;;  %v8825_v47 = vld [vmem:[#allocation67_spill] sm:$0xff] }
 0x633   :  { %3015 = vmatpush1.bf16.msra.mxu0 %v7082_v26  ;;  %3058 = vmatpush1.bf16.msra.mxu1 %v7085_v15  ;;  %v7450_v26 = vld [vmem:[#allocation3 + $0x8] ss:$16 sps:$4 sm:$0xff]   ;;  %v7453_v15 = vld [vmem:[#allocation3 + $0x24] ss:$16 sps:$4 sm:$0xff]   ;;  %v8826_v41 = vld [vmem:[#allocation29_spill] sm:$0xff] }
 0x634   :  { %3183 = vmatprep.subr.bf16.mxu0 %v7437_v18  ;;  %3226 = vmatprep.subr.bf16.mxu1 %v7440_v24  ;;  %v7443_v38 = vpack.c.bf16 %v2911_v10, %v2910_v19  ;;  %v8827_v19 = vld [vmem:[#allocation79_spill] sm:$0xff]  ;;  %v8828_v10 = vld [vmem:[#allocation80_spill] sm:$0xff] }
 0x636   :  { %3033 = vmatmul.mubr.bf16.vlgmr.msra.gmra.mrb[40].mxu0 %v7443_v38  ;;  %3076 = vmatmul.mubr.bf16.vlgmr.msra.gmra.mrb[56].mxu1 %v7443_v38 }
 0x637   :  { %3184 = vmatpush1.bf16.msra.mxu0 %v7447_v30  ;;  %3227 = vmatpush1.bf16.msra.mxu1 %v7450_v26 }
 0x638   :  { %3185 = vmatprep.subr.bf16.mxu0 %v7453_v15  ;;  %3228 = vmatprep.subr.bf16.mxu1 %v7456_v31 }
 0x639   :  { %3215 = vmatprep.mubr.bf16.mxu0 %v8539_v5  ;;  %3258 = vmatprep.mubr.bf16.mxu1 %v8539_v5 }
 0x63b   :  { %3186 = vmatpush1.bf16.msra.mxu0 %v7461_v45  ;;  %3229 = vmatpush1.bf16.msra.mxu1 %v7464_v37 }
 0x63c   :  { %3187 = vmatprep.subr.bf16.mxu0 %v7467_v16  ;;  %3230 = vmatprep.subr.bf16.mxu1 %v7470_v33 }
 0x63f   :  { %3188 = vmatpush1.bf16.msra.mxu0 %v7473_v59  ;;  %3231 = vmatpush1.bf16.msra.mxu1 %v7476_v58 }
 0x640   :  { %3189 = vmatprep.subr.bf16.mxu0 %v7479_v4  ;;  %3232 = vmatprep.subr.bf16.mxu1 %v7482_v51 }
 0x643   :  { %3190 = vmatpush1.bf16.msra.mxu0 %v7485_v29  ;;  %3233 = vmatpush1.bf16.msra.mxu1 %v7488_v52 }
 0x644   :  { %3191 = vmatprep.subr.bf16.mxu0 %v7491_v11  ;;  %3234 = vmatprep.subr.bf16.mxu1 %v7494_v46 }
 0x647   :  { %3192 = vmatpush1.bf16.msra.mxu0 %v7497_v36  ;;  %3235 = vmatpush1.bf16.msra.mxu1 %v7500_v43 }
 0x648   :  { %3193 = vmatprep.subr.bf16.mxu0 %v7503_v0  ;;  %3236 = vmatprep.subr.bf16.mxu1 %v7506_v61 }
 0x64b   :  { %3194 = vmatpush1.bf16.msra.mxu0 %v7509_v8  ;;  %3237 = vmatpush1.bf16.msra.mxu1 %v7512_v63 }
 0x64c   :  { %3195 = vmatprep.subr.bf16.mxu0 %v7515_v9  ;;  %3238 = vmatprep.subr.bf16.mxu1 %v7518_v7 }
 0x64f   :  { %3196 = vmatpush1.bf16.msra.mxu0 %v7521_v21  ;;  %3239 = vmatpush1.bf16.msra.mxu1 %v7524_v48 }
 0x650   :  { %3197 = vmatprep.subr.bf16.mxu0 %v7527_v3  ;;  %3240 = vmatprep.subr.bf16.mxu1 %v7530_v35 }
 0x653   :  { %3198 = vmatpush1.bf16.msra.mxu0 %v7533_v53  ;;  %3241 = vmatpush1.bf16.msra.mxu1 %v7536_v50 }
 0x654   :  { %3327 = vmatprep.subr.bf16.mxu0 %v7539_v6  ;;  %3370 = vmatprep.subr.bf16.mxu1 %v7542_v54 }
 0x656   :  { %3216 = vmatmul.mubr.bf16.vlgmr.msra.gmra.mrb[20].mxu0 %v7443_v38  ;;  %3259 = vmatmul.mubr.bf16.vlgmr.msra.gmra.mrb[28].mxu1 %v7443_v38  ;;  %v8829_v38 = vld [vmem:[#allocation81_spill] sm:$0xff] }
 0x657   :  { %3328 = vmatpush1.bf16.msra.mxu0 %v7547_v22  ;;  %3371 = vmatpush1.bf16.msra.mxu1 %v7550_v55 }
 0x658   :  { %3329 = vmatprep.subr.bf16.mxu0 %v8763_v49  ;;  %3372 = vmatprep.subr.bf16.mxu1 %v8764_v17  ;;  %v8821_v49 = vld [vmem:[#allocation63_spill] sm:$0xff]  ;;  %v8822_v17 = vld [vmem:[#allocation64_spill] sm:$0xff] }
 0x659   :  { %3359 = vmatprep.mubr.bf16.mxu0 %v8539_v5  ;;  %3402 = vmatprep.mubr.bf16.mxu1 %v8539_v5 }
 0x65b   :  { %3330 = vmatpush1.bf16.msra.mxu0 %v7557_v56  ;;  %3373 = vmatpush1.bf16.msra.mxu1 %v7560_v14 }
 0x65c   :  { %3331 = vmatprep.subr.bf16.mxu0 %v8818_v32  ;;  %3374 = vmatprep.subr.bf16.mxu1 %v8819_v34  ;;  %v8830_v32 = vld [vmem:[#allocation82_spill] sm:$0xff]  ;;  %v8831_v34 = vld [vmem:[#allocation83_spill] sm:$0xff] }
 0x65f   :  { %3332 = vmatpush1.bf16.msra.mxu0 %v8820_v20  ;;  %3375 = vmatpush1.bf16.msra.mxu1 %v8821_v49  ;;  %v8832_v20 = vld [vmem:[#allocation84_spill] sm:$0xff]  ;;  %v8833_v49 = vld [vmem:[#allocation85_spill] sm:$0xff] }
 0x660   :  { %3333 = vmatprep.subr.bf16.mxu0 %v8822_v17  ;;  %3376 = vmatprep.subr.bf16.mxu1 %v8823_v27  ;;  %v8834_v17 = vld [vmem:[#allocation86_spill] sm:$0xff]  ;;  %v8835_v27 = vld [vmem:[#allocation87_spill] sm:$0xff] }
 0x663   :  { %3334 = vmatpush1.bf16.msra.mxu0 %v8824_v28  ;;  %3377 = vmatpush1.bf16.msra.mxu1 %v8825_v47  ;;  %v8836_v28 = vld [vmem:[#allocation88_spill] sm:$0xff]  ;;  %v8837_v47 = vld [vmem:[#allocation89_spill] sm:$0xff] }
 0x664   :  { %3335 = vmatprep.subr.bf16.mxu0 %v8826_v41  ;;  %3378 = vmatprep.subr.bf16.mxu1 %v8827_v19  ;;  %v8838_v41 = vld [vmem:[#allocation90_spill] sm:$0xff]  ;;  %v8839_v19 = vld [vmem:[#allocation91_spill] sm:$0xff] }
 0x667   :  { %3336 = vmatpush1.bf16.msra.mxu0 %v8828_v10  ;;  %3379 = vmatpush1.bf16.msra.mxu1 %v8829_v38  ;;  %v8840_v10 = vld [vmem:[#allocation92_spill] sm:$0xff]  ;;  %v8841_v38 = vld [vmem:[#allocation93_spill] sm:$0xff] }
 0x668   :  { %3337 = vmatprep.subr.bf16.mxu0 %v8830_v32  ;;  %3380 = vmatprep.subr.bf16.mxu1 %v8831_v34  ;;  %v8842_v32 = vld [vmem:[#allocation94_spill] sm:$0xff]  ;;  %v8843_v34 = vld [vmem:[#allocation95_spill] sm:$0xff] }
 0x66b   :  { %3338 = vmatpush1.bf16.msra.mxu0 %v8832_v20  ;;  %3381 = vmatpush1.bf16.msra.mxu1 %v8833_v49 }
 0x66c   :  { %3339 = vmatprep.subr.bf16.mxu0 %v8834_v17  ;;  %3382 = vmatprep.subr.bf16.mxu1 %v8835_v27  ;;  %v8844_v17 = vld [vmem:[#allocation16_spill] sm:$0xff] }
 0x66f   :  { %3340 = vmatpush1.bf16.msra.mxu0 %v8836_v28  ;;  %3383 = vmatpush1.bf16.msra.mxu1 %v8837_v47 }
 0x670   :  { %3341 = vmatprep.subr.bf16.mxu0 %v8838_v41  ;;  %3384 = vmatprep.subr.bf16.mxu1 %v8839_v19 }
 0x673   :  { %3342 = vmatpush1.bf16.msra.mxu0 %v8840_v10  ;;  %3385 = vmatpush1.bf16.msra.mxu1 %v8841_v38 }
 0x674   :  { %3413 = vmatprep.subr.bf16.mxu0 %v8842_v32  ;;  %3456 = vmatprep.subr.bf16.mxu1 %v8843_v34 }
 0x709   :  { %v3034_v20 = vpop.f32.mrb[40].mxu0  ;;  %v3077_v49 = vpop.f32.mrb[56].mxu1 }
 0x70a   :  { %v3086_v27 = vadd.f32 %v3034_v20, %v8844_v17  ;;  %v3036_v42 = vpop.f32.mrb[41].mxu0  ;;  %v3079_v28 = vpop.f32.mrb[57].mxu1 }
 0x70b   :  { %v3087_v47 = vadd.f32 %v3036_v42, %v6715_v40  ;;  %v3038_v44 = vpop.f32.mrb[42].mxu0  ;;  %v3081_v41 = vpop.f32.mrb[58].mxu1  ;;  %v3089_v20 = vadd.f32 %v3079_v28, %v6722_v1  ;;  %v8845_v42 = vld [vmem:[#allocation19_spill] sm:$0xff] }
 0x70c   :  { %v4735_v14 = vmul.f32 -1.442695, %v3086_v27  ;;  %v3090_v19 = vadd.f32 %v3038_v44, %v8844_v17  ;;  %v3040_v10 = vpop.f32.mrb[43].mxu0  ;;  %v3083_v56 = vpop.f32.mrb[59].mxu1  ;;  %v3088_v54 = vadd.f32 %v3077_v49, %v8845_v42 }
 0x70d   :  { %v4737_v38 = vmul.f32 -1.442695, %v3087_v47  ;;  %v3091_v32 = vadd.f32 %v3040_v10, %v6715_v40  ;;  %v3093_v22 = vadd.f32 %v3083_v56, %v6722_v1  ;;  %v4739_v27 = vmul.f32 -1.442695, %v3089_v20 }
 0x70e   :  { %5475 = vpow2.f32 %v4735_v14  ;;  %v4736_v34 = vmul.f32 -1.442695, %v3090_v19  ;;  %v3092_v14 = vadd.f32 %v3081_v41, %v8845_v42 }
 0x70f   :  { %5477 = vpow2.f32 %v4737_v38  ;;  %v4738_v55 = vmul.f32 -1.442695, %v3091_v32  ;;  %v4740_v6 = vmul.f32 -1.442695, %v3093_v22 }
 0x710   :  { %5479 = vpow2.f32 %v4736_v34 }
 0x711   :  { %5481 = vpow2.f32 %v4738_v55 }
 0x712   :  { %5483 = vtanh.f32 %v3088_v54 }
 0x713   :  { %5485 = vpow2.f32 %v4739_v27 }
 0x714   :  { %5487 = vpow2.f32 %v4740_v6 }
 0x718   :  { %v5476_v44 = vpop.eup %5475 }
 0x719   :  { %v5478_v17 = vpop.eup %5477  ;;  %v3100_v47 = vadd.f32 1.0, %v5476_v44 }
 0x71a   :  { %v3112_v19 = vadd.f32 1.0, %v5478_v17  ;;  %v5480_v10 = vpop.eup %5479 }
 0x71b   :  { %5489 = vrcp.f32 %v3100_v47  ;;  %v3101_v28 = vadd.f32 1.0, %v5480_v10  ;;  %v5482_v38 = vpop.eup %5481 }
 0x71c   :  { %5491 = vrcp.f32 %v3112_v19  ;;  %v3113_v55 = vadd.f32 1.0, %v5482_v38  ;;  %v5484_v56 = vpop.eup %5483 }
 0x71d   :  { %5493 = vtanh.f32 %v3092_v14  ;;  %v5486_v22 = vpop.eup %5485 }
 0x71e   :  { %5495 = vrcp.f32 %v3101_v28  ;;  %v5488_v49 = vpop.eup %5487  ;;  %v3126_v20 = vadd.f32 1.0, %v5486_v22 }
 0x71f   :  { %5497 = vrcp.f32 %v3113_v55  ;;  %v3127_v47 = vadd.f32 1.0, %v5488_v49 }
 0x720   :  { %5499 = vrcp.f32 %v3126_v20 }
 0x725   :  { %v5490_v54 = vpop.eup %5489 }
 0x726   :  { %v5492_v32 = vpop.eup %5491  ;;  %v3134_v34 = vmul.f32 %v5490_v54, %v5484_v56 }
 0x727   :  { %v5494_v27 = vpop.eup %5493  ;;  %v3132_v17 = vmul.f32 %v5492_v32, %v7372_v12 }
 0x728   :  { %v5496_v6 = vpop.eup %5495 }
 0x729   :  { %v7598_v41 = vadd.f32 %v3134_v34, %v3132_v17  ;;  %v3135_v44 = vmul.f32 %v5496_v6, %v5494_v27  ;;  %v3217_v19 = vpop.f32.mrb[20].mxu0  ;;  %v3260_v14 = vpop.f32.mrb[28].mxu1 }
 0x72a   :  { %v5498_v10 = vpop.eup %5497  ;;  %v4837_v28 = vadd.f32 %v3217_v19, %v8609_v57  ;;  %v3219_v38 = vpop.f32.mrb[21].mxu0 }
 0x72b   :  { %v3262_v55 = vpop.f32.mrb[29].mxu1  ;;  %v3133_v42 = vmul.f32 %v5498_v10, %v7379_v25  ;;  %v4838_v56 = vadd.f32 %v3219_v38, %v8610_v39  ;;  %v3221_v22 = vpop.f32.mrb[22].mxu0  ;;  %5501 = vtanh.f32 %v7598_v41  ;;  %v4877_v38 = vadd.f32 %v3260_v14, %v8611_v2 }
 0x72c   :  { %v3264_v54 = vpop.f32.mrb[30].mxu1  ;;  %v4741_v12 = vmul.f32 -1.442695, %v4837_v28  ;;  %v4839_v32 = vadd.f32 %v3221_v22, %v8609_v57  ;;  %v3223_v49 = vpop.f32.mrb[23].mxu0  ;;  %5503 = vrcp.f32 %v3127_v47  ;;  %v4878_v19 = vadd.f32 %v3262_v55, %v6629_v62 }
 0x72d   :  { %v3266_v34 = vpop.f32.mrb[31].mxu1  ;;  %v7605_v27 = vadd.f32 %v3135_v44, %v3133_v42  ;;  %v4743_v20 = vmul.f32 -1.442695, %v4838_v56  ;;  %v4840_v17 = vadd.f32 %v3223_v49, %v8610_v39  ;;  %v5500_v10 = vpop.eup %5499 }
 0x72e   :  { %5505 = vpow2.f32 %v4741_v12  ;;  %v4742_v6 = vmul.f32 -1.442695, %v4839_v32  ;;  %v4745_v42 = vmul.f32 -1.442695, %v4878_v19  ;;  %v4880_v44 = vadd.f32 %v3266_v34, %v6629_v62 }
 0x72f   :  { %5507 = vtanh.f32 %v7605_v27  ;;  %v4744_v25 = vmul.f32 -1.442695, %v4840_v17  ;;  %v4879_v12 = vadd.f32 %v3264_v54, %v8611_v2 }
 0x730   :  { %5509 = vpow2.f32 %v4743_v20  ;;  %v4746_v17 = vmul.f32 -1.442695, %v4880_v44  ;;  %v7629_v44 = vld [vmem:[#allocation6 + $0x24] ss:$16 sps:$4 sm:$0xff]  }
 0x731   :  { %5511 = vpow2.f32 %v4742_v6 }
 0x732   :  { %5513 = vpow2.f32 %v4744_v25 }
 0x733   :  { %5515 = vtanh.f32 %v4877_v38  ;;  %v7623_v38 = vld [vmem:[#allocation6] ss:$16 sps:$4 sm:$0xff]  }
 0x734   :  { %5517 = vpow2.f32 %v4745_v42  ;;  %v7626_v42 = vld [vmem:[#allocation6 + $0x8] ss:$16 sps:$4 sm:$0xff]  }
 0x735   :  { %v5502_v28 = vpop.eup %5501 }
 0x736   :  { %v7612_v47 = vmul.f32 %v5502_v28, %v5500_v10  ;;  %v5504_v56 = vpop.eup %5503 }
 0x738   :  { %8846 = vst [vmem:[#allocation37_spill] sm:$0xff] %v7612_v47  ;;  %v5506_v22 = vpop.eup %5505  ;;  %v3142_v32 = vmul.f32 %v7249_v60, %v7612_v47 }
 0x739   :  { %v5508_v49 = vpop.eup %5507  ;;  %v3283_v55 = vadd.f32 1.0, %v5506_v22  ;;  %v7637_v22 = vld [vmem:[#allocation6 + $0x20] ss:$16 sps:$4 sm:$0xff]  }
 0x73a   :  { %v5510_v20 = vpop.eup %5509  ;;  %3144 = vadd.xlane.f32.xlu0 %v3142_v32  ;;  %v7617_v14 = vmul.f32 %v5508_v49, %v5504_v56  ;;  %v7643_v49 = vld [vmem:[#allocation6 + $0x44] ss:$16 sps:$4 sm:$0xff]  }
 0x73b   :  { %5519 = vrcp.f32 %v3283_v55  ;;  %v3295_v34 = vadd.f32 1.0, %v5510_v20  ;;  %v5512_v6 = vpop.eup %5511  ;;  %8849 = vst [vmem:[#allocation78_spill] sm:$0xff] %v7643_v49  ;;  %v7646_v55 = vld [vmem:[#allocation6 + $0x4c] ss:$16 sps:$4 sm:$0xff]  }
 0x73c   :  { %8847 = vst [vmem:[#allocation76_spill] sm:$0xff] %v7617_v14  ;;  %5521 = vtanh.f32 %v4879_v12  ;;  %v3326_v25 = vpack.c.bf16 %v7617_v14, %v7612_v47  ;;  %v3143_v54 = vmul.f32 %v7249_v60, %v7617_v14  ;;  %v3284_v19 = vadd.f32 1.0, %v5512_v6  ;;  %v5514_v10 = vpop.eup %5513  ;;  %v7632_v60 = vld [vmem:[#allocation6 + $0x2c] ss:$16 sps:$4 sm:$0xff]   ;;  %v7640_v12 = vld [vmem:[#allocation6 + $0x28] ss:$16 sps:$4 sm:$0xff]  }
 0x73d   :  { %5523 = vrcp.f32 %v3295_v34  ;;  %v3296_v28 = vadd.f32 1.0, %v5514_v10  ;;  %v5516_v56 = vpop.eup %5515  ;;  %8848 = vst [vmem:[#allocation77_spill] sm:$0xff] %v7640_v12  ;;  %8850 = vst [vmem:[#allocation38_spill] sm:$0xff] %v7646_v55  ;;  %v7659_v14 = vld [vmem:[#allocation6 + $0x6c] ss:$16 sps:$4 sm:$0xff]  }
 0x73e   :  { %5525 = vpow2.f32 %v4746_v17  ;;  %3360 = vmatmul.mubr.bf16.vlgmr.msra.gmra.mrb[44].mxu0 %v3326_v25  ;;  %3403 = vmatmul.mubr.bf16.vlgmr.msra.gmra.mrb[60].mxu1 %v3326_v25  ;;  %v5518_v32 = vpop.eup %5517  ;;  %v7649_v25 = vld [vmem:[#allocation6 + $0x40] ss:$16 sps:$4 sm:$0xff]  }
 0x73f   :  { %5527 = vrcp.f32 %v3284_v19  ;;  %3414 = vmatpush1.bf16.msra.mxu0 %v7623_v38  ;;  %3457 = vmatpush1.bf16.msra.mxu1 %v7626_v42  ;;  %8851 = vst [vmem:[#allocation39_spill] sm:$0xff] %v7649_v25 }
 0x740   :  { %3146 = vadd.xlane.f32.xlu1 %v3143_v54  ;;  %3415 = vmatprep.subr.bf16.mxu0 %v7629_v44  ;;  %5529 = vrcp.f32 %v3296_v28  ;;  %v7652_v54 = vld [vmem:[#allocation6 + $0x48] ss:$16 sps:$4 sm:$0xff]   ;;  %v7656_v28 = vld [vmem:[#allocation6 + $0x64] ss:$16 sps:$4 sm:$0xff]  }
 0x741   :  { %3458 = vmatprep.subr.bf16.mxu1 %v7632_v60  ;;  %3445 = vmatprep.mubr.bf16.mxu0 %v8539_v5  ;;  %8852 = vst [vmem:[#allocation40_spill] sm:$0xff] %v7656_v28 }
 0x742   :  { %3488 = vmatprep.mubr.bf16.mxu1 %v8539_v5 }
 0x743   :  { %3416 = vmatpush1.bf16.msra.mxu0 %v7637_v22  ;;  %3459 = vmatpush1.bf16.msra.mxu1 %v7640_v12  ;;  %v7664_v12 = vld [vmem:[#allocation6 + $0x60] ss:$16 sps:$4 sm:$0xff]  }
 0x744   :  { %3417 = vmatprep.subr.bf16.mxu0 %v7643_v49  ;;  %3460 = vmatprep.subr.bf16.mxu1 %v7646_v55 }
 0x745   :  { %v5520_v20 = vpop.eup %5519 }
 0x746   :  { %v5522_v17 = vpop.eup %5521  ;;  %v3317_v34 = vmul.f32 %v5520_v20, %v5516_v56  ;;  %v3309_v20 = vadd.f32 1.0, %v5518_v32  ;;  %v7674_v32 = vld [vmem:[#allocation6 + $0x8c] ss:$16 sps:$4 sm:$0xff]  }
 0x747   :  { %v5524_v6 = vpop.eup %5523  ;;  %3418 = vmatpush1.bf16.msra.mxu0 %v7649_v25  ;;  %3461 = vmatpush1.bf16.msra.mxu1 %v7652_v54 }
 0x748   :  { %v5526_v19 = vpop.eup %5525  ;;  %v3315_v10 = vmul.f32 %v5524_v6, %v7412_v13  ;;  %3419 = vmatprep.subr.bf16.mxu0 %v7656_v28  ;;  %3462 = vmatprep.subr.bf16.mxu1 %v7659_v14  ;;  %v7667_v13 = vld [vmem:[#allocation6 + $0x68] ss:$16 sps:$4 sm:$0xff]   ;;  %v7671_v28 = vld [vmem:[#allocation6 + $0x84] ss:$16 sps:$4 sm:$0xff]   ;;  %5531 = vrcp.f32 %v3309_v20 }
 0x749   :  { %v5528_v56 = vpop.eup %5527  ;;  %v3310_v49 = vadd.f32 1.0, %v5526_v19  ;;  %v7683_v19 = vld [vmem:[#allocation6 + $0x88] ss:$16 sps:$4 sm:$0xff]  }
 0x74a   :  { %v7662_v47 = vadd.f32 %v3317_v34, %v3315_v10  ;;  %v3318_v25 = vmul.f32 %v5528_v56, %v5522_v17  ;;  %v5530_v55 = vpop.eup %5529  ;;  %v7680_v34 = vld [vmem:[#allocation6 + $0x80] ss:$16 sps:$4 sm:$0xff]   ;;  %8854 = vst [vmem:[#allocation42_spill] sm:$0xff] %v7683_v19  ;;  %v7699_v10 = vld [vmem:[#allocation6 + $0xc4] ss:$16 sps:$4 sm:$0xff]  }
 0x74b   :  { %3420 = vmatpush1.bf16.msra.mxu0 %v7664_v12  ;;  %3463 = vmatpush1.bf16.msra.mxu1 %v7667_v13  ;;  %v3316_v6 = vmul.f32 %v5530_v55, %v7420_v23  ;;  %8853 = vst [vmem:[#allocation41_spill] sm:$0xff] %v7680_v34  ;;  %v7687_v23 = vld [vmem:[#allocation6 + $0xa4] ss:$16 sps:$4 sm:$0xff]   ;;  %v7690_v55 = vld [vmem:[#allocation6 + $0xac] ss:$16 sps:$4 sm:$0xff]   ;;  %8859 = vst [vmem:[#allocation45_spill] sm:$0xff] %v7699_v10 }
 0x74c   :  { %3421 = vmatprep.subr.bf16.mxu0 %v7671_v28  ;;  %3464 = vmatprep.subr.bf16.mxu1 %v7674_v32  ;;  %5533 = vtanh.f32 %v7662_v47  ;;  %8855 = vst [vmem:[#allocation43_spill] sm:$0xff] %v7687_v23  ;;  %8856 = vst [vmem:[#allocation44_spill] sm:$0xff] %v7690_v55  ;;  %v7702_v56 = vld [vmem:[#allocation6 + $0xcc] ss:$16 sps:$4 sm:$0xff]  }
 0x74d   :  { %v7678_v17 = vadd.f32 %v3318_v25, %v3316_v6  ;;  %5535 = vrcp.f32 %v3310_v49  ;;  %v7693_v25 = vld [vmem:[#allocation6 + $0xa0] ss:$16 sps:$4 sm:$0xff]   ;;  %v7696_v49 = vld [vmem:[#allocation6 + $0xa8] ss:$16 sps:$4 sm:$0xff]   ;;  %8860 = vst [vmem:[#allocation46_spill] sm:$0xff] %v7702_v56 }
 0x74e   :  { %8857 = vst [vmem:[#allocation58_spill] sm:$0xff] %v7693_v25  ;;  %8858 = vst [vmem:[#allocation59_spill] sm:$0xff] %v7696_v49  ;;  %v7705_v6 = vld [vmem:[#allocation6 + $0xc0] ss:$16 sps:$4 sm:$0xff]  }
 0x74f   :  { %3422 = vmatpush1.bf16.msra.mxu0 %v7680_v34  ;;  %3465 = vmatpush1.bf16.msra.mxu1 %v7683_v19  ;;  %5537 = vtanh.f32 %v7678_v17  ;;  %8861 = vst [vmem:[#allocation60_spill] sm:$0xff] %v7705_v6  ;;  %v7717_v19 = vld [vmem:[#allocation6 + $0xe0] ss:$16 sps:$4 sm:$0xff]  }
 0x750   :  { %3423 = vmatprep.subr.bf16.mxu0 %v7687_v23  ;;  %3466 = vmatprep.subr.bf16.mxu1 %v7690_v55  ;;  %v7708_v55 = vld [vmem:[#allocation6 + $0xc8] ss:$16 sps:$4 sm:$0xff]   ;;  %v7711_v23 = vld [vmem:[#allocation6 + $0xe4] ss:$16 sps:$4 sm:$0xff]  }
 0x751   :  { %8862 = vst [vmem:[#allocation61_spill] sm:$0xff] %v7708_v55  ;;  %8863 = vst [vmem:[#allocation62_spill] sm:$0xff] %v7711_v23 }
 0x752   :  { %v5532_v20 = vpop.eup %5531 }
 0x753   :  { %3424 = vmatpush1.bf16.msra.mxu0 %v7693_v25  ;;  %3467 = vmatpush1.bf16.msra.mxu1 %v7696_v49  ;;  %v7714_v49 = vld [vmem:[#allocation6 + $0xec] ss:$16 sps:$4 sm:$0xff]  }
 0x754   :  { %3425 = vmatprep.subr.bf16.mxu0 %v7699_v10  ;;  %3468 = vmatprep.subr.bf16.mxu1 %v7702_v56 }
 0x756   :  { %v5534_v25 = vpop.eup %5533 }
 0x757   :  { %3426 = vmatpush1.bf16.msra.mxu0 %v7705_v6  ;;  %3469 = vmatpush1.bf16.msra.mxu1 %v7708_v55  ;;  %v5536_v10 = vpop.eup %5535  ;;  %v7720_v6 = vld [vmem:[#allocation6 + $0xe8] ss:$16 sps:$4 sm:$0xff]   ;;  %v3323_v55 = vmul.f32 %v5534_v25, %v5532_v20  ;;  %v8866_v25 = vld [vmem:[#allocation33_spill] sm:$0xff] }
 0x758   :  { %3427 = vmatprep.subr.bf16.mxu0 %v7711_v23  ;;  %3470 = vmatprep.subr.bf16.mxu1 %v7714_v49  ;;  %v7764_v20 = vld [vmem:[#allocation8 + $0x2c] ss:$16 sps:$4 sm:$0xff]  }
 0x759   :  { %v5538_v56 = vpop.eup %5537  ;;  %8869 = vst [vmem:[#allocation64_spill] sm:$0xff] %v7764_v20 }
 0x75a   :  { %v3324_v34 = vmul.f32 %v5538_v56, %v5536_v10  ;;  %v8867_v10 = vld [vmem:[#allocation34_spill] sm:$0xff] }
 0x75b   :  { %3428 = vmatpush1.bf16.msra.mxu0 %v7717_v19  ;;  %3471 = vmatpush1.bf16.msra.mxu1 %v7720_v6  ;;  %v7761_v56 = vld [vmem:[#allocation8 + $0x24] ss:$16 sps:$4 sm:$0xff]  }
 0x75c   :  { %3596 = vmatprep.subr.bf16.mxu0 %v7437_v18  ;;  %3639 = vmatprep.subr.bf16.mxu1 %v7440_v24  ;;  %v3325_v23 = vpack.c.bf16 %v3324_v34, %v3323_v55  ;;  %v8864_v34 = vld [vmem:[#allocation31_spill] sm:$0xff]  ;;  %v8865_v55 = vld [vmem:[#allocation32_spill] sm:$0xff]  ;;  %8868 = vst [vmem:[#allocation63_spill] sm:$0xff] %v7761_v56 }
 0x75e   :  { %3446 = vmatmul.mubr.bf16.vlgmr.msra.gmra.mrb[44].mxu0 %v3325_v23  ;;  %3489 = vmatmul.mubr.bf16.vlgmr.msra.gmra.mrb[60].mxu1 %v3325_v23 }
 0x75f   :  { %3597 = vmatpush1.bf16.msra.mxu0 %v7447_v30  ;;  %3640 = vmatpush1.bf16.msra.mxu1 %v7450_v26 }
 0x760   :  { %3598 = vmatprep.subr.bf16.mxu0 %v7453_v15  ;;  %3641 = vmatprep.subr.bf16.mxu1 %v7456_v31 }
 0x761   :  { %3628 = vmatprep.mubr.bf16.mxu0 %v8539_v5  ;;  %3671 = vmatprep.mubr.bf16.mxu1 %v8539_v5 }
 0x763   :  { %3599 = vmatpush1.bf16.msra.mxu0 %v7461_v45  ;;  %3642 = vmatpush1.bf16.msra.mxu1 %v7464_v37 }
 0x764   :  { %3600 = vmatprep.subr.bf16.mxu0 %v7467_v16  ;;  %3643 = vmatprep.subr.bf16.mxu1 %v7470_v33 }
 0x767   :  { %3601 = vmatpush1.bf16.msra.mxu0 %v7473_v59  ;;  %3644 = vmatpush1.bf16.msra.mxu1 %v7476_v58 }
 0x768   :  { %3602 = vmatprep.subr.bf16.mxu0 %v7479_v4  ;;  %3645 = vmatprep.subr.bf16.mxu1 %v7482_v51 }
 0x76b   :  { %3603 = vmatpush1.bf16.msra.mxu0 %v7485_v29  ;;  %3646 = vmatpush1.bf16.msra.mxu1 %v7488_v52 }
 0x76c   :  { %3604 = vmatprep.subr.bf16.mxu0 %v7491_v11  ;;  %3647 = vmatprep.subr.bf16.mxu1 %v7494_v46 }
 0x76f   :  { %3605 = vmatpush1.bf16.msra.mxu0 %v7497_v36  ;;  %3648 = vmatpush1.bf16.msra.mxu1 %v7500_v43 }
 0x770   :  { %3606 = vmatprep.subr.bf16.mxu0 %v7503_v0  ;;  %3649 = vmatprep.subr.bf16.mxu1 %v7506_v61 }
 0x773   :  { %3607 = vmatpush1.bf16.msra.mxu0 %v7509_v8  ;;  %3650 = vmatpush1.bf16.msra.mxu1 %v7512_v63 }
 0x774   :  { %3608 = vmatprep.subr.bf16.mxu0 %v7515_v9  ;;  %3651 = vmatprep.subr.bf16.mxu1 %v7518_v7 }
 0x777   :  { %3609 = vmatpush1.bf16.msra.mxu0 %v7521_v21  ;;  %3652 = vmatpush1.bf16.msra.mxu1 %v7524_v48 }
 0x778   :  { %3610 = vmatprep.subr.bf16.mxu0 %v7527_v3  ;;  %3653 = vmatprep.subr.bf16.mxu1 %v7530_v35 }
 0x77b   :  { %3611 = vmatpush1.bf16.msra.mxu0 %v7533_v53  ;;  %3654 = vmatpush1.bf16.msra.mxu1 %v7536_v50  ;;  %v8898_v50 = vld [vmem:[#allocation16_spill] sm:$0xff] }
 0x77c   :  { %3740 = vmatprep.subr.bf16.mxu0 %v8864_v34  ;;  %3783 = vmatprep.subr.bf16.mxu1 %v8865_v55  ;;  %v8870_v34 = vld [vmem:[#allocation35_spill] sm:$0xff]  ;;  %v8871_v55 = vld [vmem:[#allocation36_spill] sm:$0xff] }
 0x77e   :  { %3629 = vmatmul.mubr.bf16.vlgmr.msra.gmra.mrb[48].mxu0 %v3325_v23  ;;  %3672 = vmatmul.mubr.bf16.vlgmr.msra.gmra.mrb[32].mxu1 %v3325_v23  ;;  %v7771_v23 = vld [vmem:[#allocation8 + $0x44] ss:$16 sps:$4 sm:$0xff]  }
 0x77f   :  { %3741 = vmatpush1.bf16.msra.mxu0 %v8866_v25  ;;  %3784 = vmatpush1.bf16.msra.mxu1 %v8867_v10  ;;  %8872 = vst [vmem:[#allocation65_spill] sm:$0xff] %v7771_v23  ;;  %v7774_v10 = vld [vmem:[#allocation8 + $0x4c] ss:$16 sps:$4 sm:$0xff]   ;;  %v7783_v25 = vld [vmem:[#allocation8 + $0x64] ss:$16 sps:$4 sm:$0xff]  }
 0x780   :  { %3742 = vmatprep.subr.bf16.mxu0 %v7761_v56  ;;  %3785 = vmatprep.subr.bf16.mxu1 %v7764_v20  ;;  %8873 = vst [vmem:[#allocation66_spill] sm:$0xff] %v7774_v10  ;;  %v7777_v56 = vld [vmem:[#allocation8 + $0x40] ss:$16 sps:$4 sm:$0xff]   ;;  %v7780_v20 = vld [vmem:[#allocation8 + $0x48] ss:$16 sps:$4 sm:$0xff]   ;;  %8876 = vst [vmem:[#allocation79_spill] sm:$0xff] %v7783_v25 }
 0x781   :  { %3772 = vmatprep.mubr.bf16.mxu0 %v8539_v5  ;;  %3815 = vmatprep.mubr.bf16.mxu1 %v8539_v5  ;;  %8874 = vst [vmem:[#allocation67_spill] sm:$0xff] %v7777_v56  ;;  %8875 = vst [vmem:[#allocation29_spill] sm:$0xff] %v7780_v20 }
 0x783   :  { %3743 = vmatpush1.bf16.msra.mxu0 %v8870_v34  ;;  %3786 = vmatpush1.bf16.msra.mxu1 %v8871_v55  ;;  %v7786_v55 = vld [vmem:[#allocation8 + $0x6c] ss:$16 sps:$4 sm:$0xff]  }
 0x784   :  { %3744 = vmatprep.subr.bf16.mxu0 %v7771_v23  ;;  %3787 = vmatprep.subr.bf16.mxu1 %v7774_v10  ;;  %8877 = vst [vmem:[#allocation80_spill] sm:$0xff] %v7786_v55  ;;  %v7789_v23 = vld [vmem:[#allocation8 + $0x60] ss:$16 sps:$4 sm:$0xff]   ;;  %v7792_v10 = vld [vmem:[#allocation8 + $0x68] ss:$16 sps:$4 sm:$0xff]  }
 0x785   :  { %8878 = vst [vmem:[#allocation81_spill] sm:$0xff] %v7789_v23  ;;  %8879 = vst [vmem:[#allocation82_spill] sm:$0xff] %v7792_v10 }
 0x787   :  { %3745 = vmatpush1.bf16.msra.mxu0 %v7777_v56  ;;  %3788 = vmatpush1.bf16.msra.mxu1 %v7780_v20  ;;  %v7795_v56 = vld [vmem:[#allocation8 + $0x84] ss:$16 sps:$4 sm:$0xff]   ;;  %v7798_v20 = vld [vmem:[#allocation8 + $0x8c] ss:$16 sps:$4 sm:$0xff]  }
 0x788   :  { %3746 = vmatprep.subr.bf16.mxu0 %v7783_v25  ;;  %3789 = vmatprep.subr.bf16.mxu1 %v7786_v55  ;;  %8880 = vst [vmem:[#allocation83_spill] sm:$0xff] %v7795_v56  ;;  %8881 = vst [vmem:[#allocation84_spill] sm:$0xff] %v7798_v20  ;;  %v7801_v25 = vld [vmem:[#allocation8 + $0x80] ss:$16 sps:$4 sm:$0xff]   ;;  %v7804_v55 = vld [vmem:[#allocation8 + $0x88] ss:$16 sps:$4 sm:$0xff]  }
 0x789   :  { %8882 = vst [vmem:[#allocation85_spill] sm:$0xff] %v7801_v25  ;;  %8883 = vst [vmem:[#allocation86_spill] sm:$0xff] %v7804_v55 }
 0x78b   :  { %3747 = vmatpush1.bf16.msra.mxu0 %v7789_v23  ;;  %3790 = vmatpush1.bf16.msra.mxu1 %v7792_v10  ;;  %v7807_v23 = vld [vmem:[#allocation8 + $0xa4] ss:$16 sps:$4 sm:$0xff]   ;;  %v7810_v10 = vld [vmem:[#allocation8 + $0xac] ss:$16 sps:$4 sm:$0xff]  }
 0x78c   :  { %3748 = vmatprep.subr.bf16.mxu0 %v7795_v56  ;;  %3791 = vmatprep.subr.bf16.mxu1 %v7798_v20  ;;  %8884 = vst [vmem:[#allocation87_spill] sm:$0xff] %v7807_v23  ;;  %8885 = vst [vmem:[#allocation88_spill] sm:$0xff] %v7810_v10  ;;  %v7813_v56 = vld [vmem:[#allocation8 + $0xa0] ss:$16 sps:$4 sm:$0xff]   ;;  %v7816_v20 = vld [vmem:[#allocation8 + $0xa8] ss:$16 sps:$4 sm:$0xff]  }
 0x78d   :  { %8886 = vst [vmem:[#allocation89_spill] sm:$0xff] %v7813_v56  ;;  %8887 = vst [vmem:[#allocation90_spill] sm:$0xff] %v7816_v20 }
 0x78f   :  { %3749 = vmatpush1.bf16.msra.mxu0 %v7801_v25  ;;  %3792 = vmatpush1.bf16.msra.mxu1 %v7804_v55  ;;  %v7819_v25 = vld [vmem:[#allocation8 + $0xc4] ss:$16 sps:$4 sm:$0xff]   ;;  %v7822_v55 = vld [vmem:[#allocation8 + $0xcc] ss:$16 sps:$4 sm:$0xff]  }
 0x790   :  { %3750 = vmatprep.subr.bf16.mxu0 %v7807_v23  ;;  %3793 = vmatprep.subr.bf16.mxu1 %v7810_v10  ;;  %8888 = vst [vmem:[#allocation91_spill] sm:$0xff] %v7819_v25  ;;  %8889 = vst [vmem:[#allocation92_spill] sm:$0xff] %v7822_v55  ;;  %v7825_v23 = vld [vmem:[#allocation8 + $0xc0] ss:$16 sps:$4 sm:$0xff]   ;;  %v7828_v10 = vld [vmem:[#allocation8 + $0xc8] ss:$16 sps:$4 sm:$0xff]  }
 0x791   :  { %8890 = vst [vmem:[#allocation93_spill] sm:$0xff] %v7825_v23  ;;  %8891 = vst [vmem:[#allocation94_spill] sm:$0xff] %v7828_v10 }
 0x793   :  { %3751 = vmatpush1.bf16.msra.mxu0 %v7813_v56  ;;  %3794 = vmatpush1.bf16.msra.mxu1 %v7816_v20  ;;  %v7831_v56 = vld [vmem:[#allocation8 + $0xe4] ss:$16 sps:$4 sm:$0xff]   ;;  %v7834_v20 = vld [vmem:[#allocation8 + $0xec] ss:$16 sps:$4 sm:$0xff]  }
 0x794   :  { %3752 = vmatprep.subr.bf16.mxu0 %v7819_v25  ;;  %3795 = vmatprep.subr.bf16.mxu1 %v7822_v55  ;;  %8892 = vst [vmem:[#allocation95_spill] sm:$0xff] %v7831_v56  ;;  %8893 = vst [vmem:[#allocation98_spill] sm:$0xff] %v7834_v20  ;;  %v7837_v25 = vld [vmem:[#allocation8 + $0xe0] ss:$16 sps:$4 sm:$0xff]   ;;  %v7840_v55 = vld [vmem:[#allocation8 + $0xe8] ss:$16 sps:$4 sm:$0xff]  }
 0x795   :  { %8894 = vst [vmem:[#allocation99_spill] sm:$0xff] %v7837_v25  ;;  %8895 = vst [vmem:[#allocation100_spill] sm:$0xff] %v7840_v55 }
 0x797   :  { %3753 = vmatpush1.bf16.msra.mxu0 %v7825_v23  ;;  %3796 = vmatpush1.bf16.msra.mxu1 %v7828_v10  ;;  %v7843_v23 = vld [vmem:[#allocation6 + $0x4] ss:$16 sps:$4 sm:$0xff]   ;;  %v7846_v10 = vld [vmem:[#allocation6 + $0xc] ss:$16 sps:$4 sm:$0xff]  }
 0x798   :  { %3754 = vmatprep.subr.bf16.mxu0 %v7831_v56  ;;  %3797 = vmatprep.subr.bf16.mxu1 %v7834_v20  ;;  %8896 = vst [vmem:[#allocation101_spill] sm:$0xff] %v7843_v23  ;;  %8897 = vst [vmem:[#allocation102_spill] sm:$0xff] %v7846_v10 }
 0x79b   :  { %3755 = vmatpush1.bf16.msra.mxu0 %v7837_v25  ;;  %3798 = vmatpush1.bf16.msra.mxu1 %v7840_v55 }
 0x79c   :  { %3826 = vmatprep.subr.bf16.mxu0 %v7843_v23  ;;  %3869 = vmatprep.subr.bf16.mxu1 %v7846_v10 }
 0x831   :  { %v3447_v56 = vpop.f32.mrb[44].mxu0  ;;  %v3490_v34 = vpop.f32.mrb[60].mxu1 }
 0x832   :  { %v3499_v20 = vadd.f32 %v3447_v56, %v8898_v50  ;;  %v3449_v53 = vpop.f32.mrb[45].mxu0  ;;  %v3492_v35 = vpop.f32.mrb[61].mxu1 }
 0x833   :  { %v3500_v25 = vadd.f32 %v3449_v53, %v6715_v40  ;;  %v3451_v3 = vpop.f32.mrb[46].mxu0  ;;  %v3494_v48 = vpop.f32.mrb[62].mxu1  ;;  %v3502_v56 = vadd.f32 %v3492_v35, %v6722_v1  ;;  %v8899_v53 = vld [vmem:[#allocation19_spill] sm:$0xff] }
 0x834   :  { %v4747_v21 = vmul.f32 -1.442695, %v3499_v20  ;;  %v3503_v55 = vadd.f32 %v3451_v3, %v8898_v50  ;;  %v3453_v7 = vpop.f32.mrb[47].mxu0  ;;  %v3496_v9 = vpop.f32.mrb[63].mxu1  ;;  %v3501_v0 = vadd.f32 %v3490_v34, %v8899_v53 }
 0x835   :  { %v4749_v23 = vmul.f32 -1.442695, %v3500_v25  ;;  %v3504_v63 = vadd.f32 %v3453_v7, %v6715_v40  ;;  %v3506_v61 = vadd.f32 %v3496_v9, %v6722_v1  ;;  %v4751_v20 = vmul.f32 -1.442695, %v3502_v56  ;;  %v8903_v1 = vld [vmem:[#allocation71_spill] sm:$0xff] }
 0x836   :  { %5539 = vpow2.f32 %v4747_v21  ;;  %v4748_v10 = vmul.f32 -1.442695, %v3503_v55  ;;  %v3505_v7 = vadd.f32 %v3494_v48, %v8899_v53 }
 0x837   :  { %5541 = vpow2.f32 %v4749_v23  ;;  %v4750_v8 = vmul.f32 -1.442695, %v3504_v63  ;;  %v4752_v43 = vmul.f32 -1.442695, %v3506_v61 }
 0x838   :  { %5543 = vpow2.f32 %v4748_v10 }
 0x839   :  { %5545 = vpow2.f32 %v4750_v8 }
 0x83a   :  { %5547 = vtanh.f32 %v3501_v0 }
 0x83b   :  { %5549 = vpow2.f32 %v4751_v20 }
 0x83c   :  { %5551 = vpow2.f32 %v4752_v43 }
 0x840   :  { %v5540_v3 = vpop.eup %5539 }
 0x841   :  { %v5542_v50 = vpop.eup %5541  ;;  %v3513_v25 = vadd.f32 1.0, %v5540_v3 }
 0x842   :  { %v3525_v21 = vadd.f32 1.0, %v5542_v50  ;;  %v5544_v63 = vpop.eup %5543  ;;  %v8900_v50 = vld [vmem:[#allocation68_spill] sm:$0xff] }
 0x843   :  { %5553 = vrcp.f32 %v3513_v25  ;;  %v3514_v35 = vadd.f32 1.0, %v5544_v63  ;;  %v5546_v55 = vpop.eup %5545  ;;  %v312_v3 = vadd.f32 %v8900_v50, %v8609_v57  ;;  %v8901_v25 = vld [vmem:[#allocation69_spill] sm:$0xff]  ;;  %v318_v50 = vadd.f32 %v8903_v1, %v8610_v39 }
 0x844   :  { %5555 = vrcp.f32 %v3525_v21  ;;  %v3526_v8 = vadd.f32 1.0, %v5546_v55  ;;  %v5548_v9 = vpop.eup %5547 }
 0x845   :  { %5557 = vtanh.f32 %v3505_v7  ;;  %v5550_v61 = vpop.eup %5549  ;;  %v314_v7 = vadd.f32 %v8901_v25, %v8610_v39 }
 0x846   :  { %5559 = vrcp.f32 %v3514_v35  ;;  %v5552_v34 = vpop.eup %5551  ;;  %v3539_v56 = vadd.f32 1.0, %v5550_v61 }
 0x847   :  { %5561 = vrcp.f32 %v3526_v8  ;;  %v3540_v35 = vadd.f32 1.0, %v5552_v34 }
 0x848   :  { %5563 = vrcp.f32 %v3539_v56 }
 0x84d   :  { %v5554_v0 = vpop.eup %5553 }
 0x84e   :  { %v5556_v10 = vpop.eup %5555  ;;  %v3547_v23 = vmul.f32 %v5554_v0, %v5548_v9  ;;  %v8902_v9 = vld [vmem:[#allocation70_spill] sm:$0xff] }
 0x84f   :  { %v5558_v20 = vpop.eup %5557  ;;  %v3545_v48 = vmul.f32 %v5556_v10, %v7598_v41  ;;  %v316_v61 = vadd.f32 %v8902_v9, %v8609_v57 }
 0x850   :  { %v5560_v43 = vpop.eup %5559 }
 0x851   :  { %v7862_v21 = vadd.f32 %v3547_v23, %v3545_v48  ;;  %v3548_v63 = vmul.f32 %v5560_v43, %v5558_v20  ;;  %v3630_v55 = vpop.f32.mrb[48].mxu0  ;;  %v3673_v8 = vpop.f32.mrb[32].mxu1 }
 0x852   :  { %v5562_v53 = vpop.eup %5561  ;;  %v3682_v0 = vadd.f32 %v3630_v55, %v312_v3  ;;  %v3632_v41 = vpop.f32.mrb[49].mxu0  ;;  %v4881_v9 = vadd.f32 %v3673_v8, %v8611_v2 }
 0x853   :  { %v3675_v10 = vpop.f32.mrb[33].mxu1  ;;  %v3546_v40 = vmul.f32 %v5562_v53, %v7605_v27  ;;  %v3683_v25 = vadd.f32 %v3632_v41, %v314_v7  ;;  %v3634_v23 = vpop.f32.mrb[50].mxu0  ;;  %5565 = vtanh.f32 %v7862_v21 }
 0x854   :  { %v3677_v48 = vpop.f32.mrb[34].mxu1  ;;  %v4753_v34 = vmul.f32 -1.442695, %v3682_v0  ;;  %v3686_v20 = vadd.f32 %v3634_v23, %v316_v61  ;;  %v3636_v43 = vpop.f32.mrb[51].mxu0  ;;  %5567 = vrcp.f32 %v3540_v35  ;;  %v4882_v27 = vadd.f32 %v3675_v10, %v6629_v62 }
 0x855   :  { %v3679_v36 = vpop.f32.mrb[35].mxu1  ;;  %v7870_v46 = vadd.f32 %v3548_v63, %v3546_v40  ;;  %v4755_v56 = vmul.f32 -1.442695, %v3683_v25  ;;  %v3687_v3 = vadd.f32 %v3636_v43, %v318_v50  ;;  %v5564_v53 = vpop.eup %5563  ;;  %v4883_v41 = vadd.f32 %v3677_v48, %v8611_v2  ;;  %v7882_v50 = vld [vmem:[%s8190_s7] ss:$0 sm:$0xff] }
 0x856   :  { %5569 = vpow2.f32 %v4753_v34  ;;  %v4754_v55 = vmul.f32 -1.442695, %v3686_v20  ;;  %v4757_v61 = vmul.f32 -1.442695, %v4882_v27  ;;  %v4884_v40 = vadd.f32 %v3679_v36, %v6629_v62 }
 0x857   :  { %5571 = vtanh.f32 %v7870_v46  ;;  %v4756_v1 = vmul.f32 -1.442695, %v3687_v3 }
 0x858   :  { %5573 = vpow2.f32 %v4755_v56  ;;  %v4758_v36 = vmul.f32 -1.442695, %v4884_v40 }
 0x859   :  { %5575 = vpow2.f32 %v4754_v55 }
 0x85a   :  { %5577 = vpow2.f32 %v4756_v1 }
 0x85b   :  { %5579 = vtanh.f32 %v4881_v9  ;;  %v8907_v9 = vld [vmem:[#allocation78_spill] sm:$0xff] }
 0x85c   :  { %5581 = vpow2.f32 %v4757_v61  ;;  %v8908_v61 = vld [vmem:[#allocation38_spill] sm:$0xff] }
 0x85d   :  { %v5566_v7 = vpop.eup %5565 }
 0x85e   :  { %v7876_v63 = vmul.f32 %v5566_v7, %v5564_v53  ;;  %v5568_v35 = vpop.eup %5567  ;;  %v8906_v53 = vld [vmem:[#allocation77_spill] sm:$0xff] }
 0x860   :  { %8904 = vst [vmem:[#allocation68_spill] sm:$0xff] %v7876_v63  ;;  %v5570_v0 = vpop.eup %5569  ;;  %v3555_v10 = vmul.f32 %v7882_v50, %v7876_v63 }
 0x861   :  { %v5572_v25 = vpop.eup %5571  ;;  %v3696_v23 = vadd.f32 1.0, %v5570_v0 }
 0x862   :  { %v5574_v8 = vpop.eup %5573  ;;  %3557 = vadd.xlane.f32.xlu0 %v3555_v10  ;;  %v7886_v34 = vmul.f32 %v5572_v25, %v5568_v35  ;;  %v8909_v10 = vld [vmem:[#allocation39_spill] sm:$0xff] }
 0x863   :  { %5583 = vrcp.f32 %v3696_v23  ;;  %v3708_v20 = vadd.f32 1.0, %v5574_v8  ;;  %v5576_v48 = vpop.eup %5575  ;;  %v8910_v8 = vld [vmem:[#allocation40_spill] sm:$0xff] }
 0x864   :  { %8905 = vst [vmem:[#allocation69_spill] sm:$0xff] %v7886_v34  ;;  %5585 = vtanh.f32 %v4883_v41  ;;  %v3739_v43 = vpack.c.bf16 %v7886_v34, %v7876_v63  ;;  %v3556_v56 = vmul.f32 %v7882_v50, %v7886_v34  ;;  %v3697_v3 = vadd.f32 1.0, %v5576_v48  ;;  %v5578_v55 = vpop.eup %5577 }
 0x865   :  { %5587 = vrcp.f32 %v3708_v20  ;;  %v3709_v1 = vadd.f32 1.0, %v5578_v55  ;;  %v5580_v27 = vpop.eup %5579 }
 0x866   :  { %5589 = vpow2.f32 %v4758_v36  ;;  %3773 = vmatmul.mubr.bf16.vlgmr.msra.gmra.mrb[52].mxu0 %v3739_v43  ;;  %3816 = vmatmul.mubr.bf16.vlgmr.msra.gmra.mrb[64].mxu1 %v3739_v43  ;;  %v5582_v7 = vpop.eup %5581 }
 0x867   :  { %5591 = vrcp.f32 %v3697_v3  ;;  %3827 = vmatpush1.bf16.msra.mxu0 %v7623_v38  ;;  %3870 = vmatpush1.bf16.msra.mxu1 %v7626_v42  ;;  %v3722_v20 = vadd.f32 1.0, %v5582_v7  ;;  %v8913_v7 = vld [vmem:[#allocation43_spill] sm:$0xff] }
 0x868   :  { %3559 = vadd.xlane.f32.xlu1 %v3556_v56  ;;  %3828 = vmatprep.subr.bf16.mxu0 %v7629_v44  ;;  %5593 = vrcp.f32 %v3709_v1  ;;  %v8911_v1 = vld [vmem:[#allocation41_spill] sm:$0xff] }
 0x869   :  { %3871 = vmatprep.subr.bf16.mxu1 %v7632_v60  ;;  %3858 = vmatprep.mubr.bf16.mxu0 %v8539_v5  ;;  %5595 = vrcp.f32 %v3722_v20 }
 0x86a   :  { %3901 = vmatprep.mubr.bf16.mxu1 %v8539_v5 }
 0x86b   :  { %3829 = vmatpush1.bf16.msra.mxu0 %v7637_v22  ;;  %3872 = vmatpush1.bf16.msra.mxu1 %v8906_v53 }
 0x86c   :  { %3830 = vmatprep.subr.bf16.mxu0 %v8907_v9  ;;  %3873 = vmatprep.subr.bf16.mxu1 %v8908_v61 }
 0x86d   :  { %v5584_v40 = vpop.eup %5583 }
 0x86e   :  { %v5586_v35 = vpop.eup %5585  ;;  %v3730_v0 = vmul.f32 %v5584_v40, %v5580_v27  ;;  %v8912_v27 = vld [vmem:[#allocation42_spill] sm:$0xff]  ;;  %v8914_v40 = vld [vmem:[#allocation44_spill] sm:$0xff] }
 0x86f   :  { %v5588_v41 = vpop.eup %5587  ;;  %3831 = vmatpush1.bf16.msra.mxu0 %v8909_v10  ;;  %3874 = vmatpush1.bf16.msra.mxu1 %v7652_v54 }
 0x870   :  { %v5590_v25 = vpop.eup %5589  ;;  %v3728_v23 = vmul.f32 %v5588_v41, %v7662_v47  ;;  %3832 = vmatprep.subr.bf16.mxu0 %v8910_v8  ;;  %3875 = vmatprep.subr.bf16.mxu1 %v7659_v14  ;;  %v8918_v41 = vld [vmem:[#allocation46_spill] sm:$0xff] }
 0x871   :  { %v5592_v36 = vpop.eup %5591  ;;  %v3723_v3 = vadd.f32 1.0, %v5590_v25 }
 0x872   :  { %v7907_v48 = vadd.f32 %v3730_v0, %v3728_v23  ;;  %v3731_v43 = vmul.f32 %v5592_v36, %v5586_v35  ;;  %v5594_v56 = vpop.eup %5593  ;;  %v8916_v35 = vld [vmem:[#allocation59_spill] sm:$0xff]  ;;  %v8917_v0 = vld [vmem:[#allocation45_spill] sm:$0xff]  ;;  %v8919_v23 = vld [vmem:[#allocation60_spill] sm:$0xff] }
 0x873   :  { %3833 = vmatpush1.bf16.msra.mxu0 %v7664_v12  ;;  %3876 = vmatpush1.bf16.msra.mxu1 %v7667_v13  ;;  %v3729_v55 = vmul.f32 %v5594_v56, %v7678_v17  ;;  %v8915_v17 = vld [vmem:[#allocation58_spill] sm:$0xff]  ;;  %v5596_v25 = vpop.eup %5595  ;;  %v8920_v36 = vld [vmem:[#allocation61_spill] sm:$0xff] }
 0x874   :  { %3834 = vmatprep.subr.bf16.mxu0 %v7671_v28  ;;  %3877 = vmatprep.subr.bf16.mxu1 %v7674_v32  ;;  %5597 = vtanh.f32 %v7907_v48 }
 0x875   :  { %v7915_v47 = vadd.f32 %v3731_v43, %v3729_v55  ;;  %5599 = vrcp.f32 %v3723_v3  ;;  %v8921_v43 = vld [vmem:[#allocation62_spill] sm:$0xff] }
 0x877   :  { %3835 = vmatpush1.bf16.msra.mxu0 %v8911_v1  ;;  %3878 = vmatpush1.bf16.msra.mxu1 %v8912_v27  ;;  %5601 = vtanh.f32 %v7915_v47 }
 0x878   :  { %3836 = vmatprep.subr.bf16.mxu0 %v8913_v7  ;;  %3879 = vmatprep.subr.bf16.mxu1 %v8914_v40 }
 0x87b   :  { %3837 = vmatpush1.bf16.msra.mxu0 %v8915_v17  ;;  %3880 = vmatpush1.bf16.msra.mxu1 %v8916_v35 }
 0x87c   :  { %3838 = vmatprep.subr.bf16.mxu0 %v8917_v0  ;;  %3881 = vmatprep.subr.bf16.mxu1 %v8918_v41 }
 0x87e   :  { %v5598_v20 = vpop.eup %5597 }
 0x87f   :  { %3839 = vmatpush1.bf16.msra.mxu0 %v8919_v23  ;;  %3882 = vmatpush1.bf16.msra.mxu1 %v8920_v36  ;;  %v5600_v56 = vpop.eup %5599  ;;  %v3736_v55 = vmul.f32 %v5598_v20, %v5596_v25  ;;  %v8940_v25 = vld [vmem:[#allocation34_spill] sm:$0xff]  ;;  %v8941_v20 = vld [vmem:[#allocation63_spill] sm:$0xff] }
 0x880   :  { %3840 = vmatprep.subr.bf16.mxu0 %v8921_v43  ;;  %3883 = vmatprep.subr.bf16.mxu1 %v7714_v49 }
 0x881   :  { %v5602_v3 = vpop.eup %5601 }
 0x882   :  { %v3737_v34 = vmul.f32 %v5602_v3, %v5600_v56  ;;  %v8942_v56 = vld [vmem:[#allocation64_spill] sm:$0xff]  ;;  %v8943_v3 = vld [vmem:[#allocation35_spill] sm:$0xff] }
 0x883   :  { %3841 = vmatpush1.bf16.msra.mxu0 %v7717_v19  ;;  %3884 = vmatpush1.bf16.msra.mxu1 %v7720_v6 }
 0x884   :  { %4009 = vmatprep.subr.bf16.mxu0 %v7437_v18  ;;  %4052 = vmatprep.subr.bf16.mxu1 %v7440_v24  ;;  %v3738_v63 = vpack.c.bf16 %v3737_v34, %v3736_v55  ;;  %v8922_v18 = vld [vmem:[#allocation51_spill] sm:$0xff]  ;;  %v8923_v24 = vld [vmem:[#allocation52_spill] sm:$0xff]  ;;  %v8939_v34 = vld [vmem:[#allocation33_spill] sm:$0xff] }
 0x885   :  { %v8944_v55 = vld [vmem:[#allocation36_spill] sm:$0xff] }
 0x886   :  { %3859 = vmatmul.mubr.bf16.vlgmr.msra.gmra.mrb[52].mxu0 %v3738_v63  ;;  %3902 = vmatmul.mubr.bf16.vlgmr.msra.gmra.mrb[64].mxu1 %v3738_v63 }
 0x887   :  { %4010 = vmatpush1.bf16.msra.mxu0 %v7447_v30  ;;  %4053 = vmatpush1.bf16.msra.mxu1 %v7450_v26  ;;  %v8924_v30 = vld [vmem:[#allocation53_spill] sm:$0xff]  ;;  %v8925_v26 = vld [vmem:[#allocation54_spill] sm:$0xff] }
 0x888   :  { %4011 = vmatprep.subr.bf16.mxu0 %v7453_v15  ;;  %4054 = vmatprep.subr.bf16.mxu1 %v7456_v31  ;;  %v8926_v15 = vld [vmem:[#allocation55_spill] sm:$0xff]  ;;  %v8927_v31 = vld [vmem:[#allocation56_spill] sm:$0xff] }
 0x889   :  { %4041 = vmatprep.mubr.bf16.mxu0 %v8539_v5  ;;  %4084 = vmatprep.mubr.bf16.mxu1 %v8539_v5 }
 0x88b   :  { %4012 = vmatpush1.bf16.msra.mxu0 %v7461_v45  ;;  %4055 = vmatpush1.bf16.msra.mxu1 %v7464_v37  ;;  %v8928_v45 = vld [vmem:[#allocation57_spill] sm:$0xff]  ;;  %v8929_v37 = vld [vmem:[#allocation22_spill] sm:$0xff] }
 0x88c   :  { %4013 = vmatprep.subr.bf16.mxu0 %v7467_v16  ;;  %4056 = vmatprep.subr.bf16.mxu1 %v7470_v33  ;;  %v8930_v16 = vld [vmem:[#allocation23_spill] sm:$0xff]  ;;  %v8931_v33 = vld [vmem:[#allocation24_spill] sm:$0xff] }
 0x88f   :  { %4014 = vmatpush1.bf16.msra.mxu0 %v7473_v59  ;;  %4057 = vmatpush1.bf16.msra.mxu1 %v7476_v58  ;;  %v8932_v59 = vld [vmem:[#allocation25_spill] sm:$0xff]  ;;  %v8933_v58 = vld [vmem:[#allocation26_spill] sm:$0xff] }
 0x890   :  { %4015 = vmatprep.subr.bf16.mxu0 %v7479_v4  ;;  %4058 = vmatprep.subr.bf16.mxu1 %v7482_v51  ;;  %v8934_v4 = vld [vmem:[#allocation27_spill] sm:$0xff]  ;;  %v8935_v51 = vld [vmem:[#allocation28_spill] sm:$0xff] }
 0x893   :  { %4016 = vmatpush1.bf16.msra.mxu0 %v7485_v29  ;;  %4059 = vmatpush1.bf16.msra.mxu1 %v7488_v52  ;;  %v8936_v29 = vld [vmem:[#allocation30_spill] sm:$0xff]  ;;  %v8937_v52 = vld [vmem:[#allocation31_spill] sm:$0xff] }
 0x894   :  { %4017 = vmatprep.subr.bf16.mxu0 %v7491_v11  ;;  %4060 = vmatprep.subr.bf16.mxu1 %v8922_v18  ;;  %v8938_v11 = vld [vmem:[#allocation32_spill] sm:$0xff]  ;;  %v8945_v18 = vld [vmem:[#allocation65_spill] sm:$0xff] }
 0x897   :  { %4018 = vmatpush1.bf16.msra.mxu0 %v8923_v24  ;;  %4061 = vmatpush1.bf16.msra.mxu1 %v8924_v30  ;;  %v8946_v24 = vld [vmem:[#allocation66_spill] sm:$0xff]  ;;  %v8948_v30 = vld [vmem:[#allocation29_spill] sm:$0xff] }
 0x898   :  { %4019 = vmatprep.subr.bf16.mxu0 %v8925_v26  ;;  %4062 = vmatprep.subr.bf16.mxu1 %v8926_v15  ;;  %v8949_v26 = vld [vmem:[#allocation79_spill] sm:$0xff]  ;;  %v8950_v15 = vld [vmem:[#allocation80_spill] sm:$0xff] }
 0x89b   :  { %4020 = vmatpush1.bf16.msra.mxu0 %v8927_v31  ;;  %4063 = vmatpush1.bf16.msra.mxu1 %v8928_v45  ;;  %v8951_v31 = vld [vmem:[#allocation81_spill] sm:$0xff]  ;;  %v8952_v45 = vld [vmem:[#allocation82_spill] sm:$0xff] }
 0x89c   :  { %4021 = vmatprep.subr.bf16.mxu0 %v8929_v37  ;;  %4064 = vmatprep.subr.bf16.mxu1 %v8930_v16  ;;  %v8953_v37 = vld [vmem:[#allocation83_spill] sm:$0xff]  ;;  %v8954_v16 = vld [vmem:[#allocation84_spill] sm:$0xff] }
 0x89f   :  { %4022 = vmatpush1.bf16.msra.mxu0 %v8931_v33  ;;  %4065 = vmatpush1.bf16.msra.mxu1 %v8932_v59  ;;  %v8955_v33 = vld [vmem:[#allocation85_spill] sm:$0xff]  ;;  %v8956_v59 = vld [vmem:[#allocation86_spill] sm:$0xff] }
 0x8a0   :  { %4023 = vmatprep.subr.bf16.mxu0 %v8933_v58  ;;  %4066 = vmatprep.subr.bf16.mxu1 %v8934_v4  ;;  %v8957_v58 = vld [vmem:[#allocation87_spill] sm:$0xff]  ;;  %v8958_v4 = vld [vmem:[#allocation88_spill] sm:$0xff] }
 0x8a3   :  { %4024 = vmatpush1.bf16.msra.mxu0 %v8935_v51  ;;  %4067 = vmatpush1.bf16.msra.mxu1 %v8936_v29  ;;  %v8959_v51 = vld [vmem:[#allocation89_spill] sm:$0xff]  ;;  %v8960_v29 = vld [vmem:[#allocation90_spill] sm:$0xff] }
 0x8a4   :  { %4153 = vmatprep.subr.bf16.mxu0 %v8937_v52  ;;  %4196 = vmatprep.subr.bf16.mxu1 %v8938_v11  ;;  %v8961_v52 = vld [vmem:[#allocation91_spill] sm:$0xff]  ;;  %v8962_v11 = vld [vmem:[#allocation92_spill] sm:$0xff] }
 0x8a6   :  { %4042 = vmatmul.mubr.bf16.vlgmr.msra.gmra.mrb[56].mxu0 %v3738_v63  ;;  %4085 = vmatmul.mubr.bf16.vlgmr.msra.gmra.mrb[36].mxu1 %v3738_v63  ;;  %v8947_v63 = vld [vmem:[#allocation67_spill] sm:$0xff] }
 0x8a7   :  { %4154 = vmatpush1.bf16.msra.mxu0 %v8939_v34  ;;  %4197 = vmatpush1.bf16.msra.mxu1 %v8940_v25  ;;  %v8963_v34 = vld [vmem:[#allocation93_spill] sm:$0xff]  ;;  %v8964_v25 = vld [vmem:[#allocation94_spill] sm:$0xff] }
 0x8a8   :  { %4155 = vmatprep.subr.bf16.mxu0 %v8941_v20  ;;  %4198 = vmatprep.subr.bf16.mxu1 %v8942_v56  ;;  %v8965_v20 = vld [vmem:[#allocation95_spill] sm:$0xff]  ;;  %v8966_v56 = vld [vmem:[#allocation98_spill] sm:$0xff] }
 0x8a9   :  { %4185 = vmatprep.mubr.bf16.mxu0 %v8539_v5  ;;  %4228 = vmatprep.mubr.bf16.mxu1 %v8539_v5 }
 0x8ab   :  { %4156 = vmatpush1.bf16.msra.mxu0 %v8943_v3  ;;  %4199 = vmatpush1.bf16.msra.mxu1 %v8944_v55  ;;  %v8967_v3 = vld [vmem:[#allocation99_spill] sm:$0xff]  ;;  %v8968_v55 = vld [vmem:[#allocation100_spill] sm:$0xff] }
 0x8ac   :  { %4157 = vmatprep.subr.bf16.mxu0 %v8945_v18  ;;  %4200 = vmatprep.subr.bf16.mxu1 %v8946_v24  ;;  %v8969_v18 = vld [vmem:[#allocation101_spill] sm:$0xff]  ;;  %v8970_v24 = vld [vmem:[#allocation102_spill] sm:$0xff] }
 0x8af   :  { %4158 = vmatpush1.bf16.msra.mxu0 %v8947_v63  ;;  %4201 = vmatpush1.bf16.msra.mxu1 %v8948_v30 }
 0x8b0   :  { %4159 = vmatprep.subr.bf16.mxu0 %v8949_v26  ;;  %4202 = vmatprep.subr.bf16.mxu1 %v8950_v15  ;;  %v8971_v26 = vld [vmem:[#allocation16_spill] sm:$0xff] }
 0x8b3   :  { %4160 = vmatpush1.bf16.msra.mxu0 %v8951_v31  ;;  %4203 = vmatpush1.bf16.msra.mxu1 %v8952_v45 }
 0x8b4   :  { %4161 = vmatprep.subr.bf16.mxu0 %v8953_v37  ;;  %4204 = vmatprep.subr.bf16.mxu1 %v8954_v16  ;;  %v8972_v37 = vld [vmem:[#allocation17_spill] sm:$0xff] }
 0x8b7   :  { %4162 = vmatpush1.bf16.msra.mxu0 %v8955_v33  ;;  %4205 = vmatpush1.bf16.msra.mxu1 %v8956_v59 }
 0x8b8   :  { %4163 = vmatprep.subr.bf16.mxu0 %v8957_v58  ;;  %4206 = vmatprep.subr.bf16.mxu1 %v8958_v4 }
 0x8bb   :  { %4164 = vmatpush1.bf16.msra.mxu0 %v8959_v51  ;;  %4207 = vmatpush1.bf16.msra.mxu1 %v8960_v29 }
 0x8bc   :  { %4165 = vmatprep.subr.bf16.mxu0 %v8961_v52  ;;  %4208 = vmatprep.subr.bf16.mxu1 %v8962_v11 }
 0x8bf   :  { %4166 = vmatpush1.bf16.msra.mxu0 %v8963_v34  ;;  %4209 = vmatpush1.bf16.msra.mxu1 %v8964_v25 }
 0x8c0   :  { %4167 = vmatprep.subr.bf16.mxu0 %v8965_v20  ;;  %4210 = vmatprep.subr.bf16.mxu1 %v8966_v56  ;;  %v8973_v20 = vld [vmem:[#allocation18_spill] sm:$0xff] }
 0x8c3   :  { %4168 = vmatpush1.bf16.msra.mxu0 %v8967_v3  ;;  %4211 = vmatpush1.bf16.msra.mxu1 %v8968_v55  ;;  %v8974_v55 = vld [vmem:[#allocation19_spill] sm:$0xff] }
 0x8c4   :  { %4239 = vmatprep.subr.bf16.mxu0 %v8969_v18  ;;  %4282 = vmatprep.subr.bf16.mxu1 %v8970_v24 }
 0x959   :  { %v3860_v63 = vpop.f32.mrb[52].mxu0  ;;  %v3903_v30 = vpop.f32.mrb[64].mxu1 }
 0x95a   :  { %v3912_v15 = vadd.f32 %v3860_v63, %v8971_v26  ;;  %v3862_v31 = vpop.f32.mrb[53].mxu0  ;;  %v3905_v45 = vpop.f32.mrb[65].mxu1  ;;  %v3914_v18 = vadd.f32 %v3903_v30, %v8974_v55 }
 0x95b   :  { %v3913_v16 = vadd.f32 %v3862_v31, %v8972_v37  ;;  %v3864_v33 = vpop.f32.mrb[54].mxu0  ;;  %v3907_v59 = vpop.f32.mrb[66].mxu1  ;;  %v3915_v56 = vadd.f32 %v3905_v45, %v8973_v20 }
 0x95c   :  { %v4759_v58 = vmul.f32 -1.442695, %v3912_v15  ;;  %v3916_v4 = vadd.f32 %v3864_v33, %v8971_v26  ;;  %v3866_v51 = vpop.f32.mrb[55].mxu0  ;;  %v3909_v29 = vpop.f32.mrb[67].mxu1  ;;  %v3918_v33 = vadd.f32 %v3907_v59, %v8974_v55  ;;  %v8978_v55 = vld [vmem:[#allocation75_spill] sm:$0xff] }
 0x95d   :  { %v4761_v52 = vmul.f32 -1.442695, %v3913_v16  ;;  %v3917_v11 = vadd.f32 %v3866_v51, %v8972_v37  ;;  %v3919_v3 = vadd.f32 %v3909_v29, %v8973_v20  ;;  %v4763_v24 = vmul.f32 -1.442695, %v3915_v56 }
 0x95e   :  { %5603 = vpow2.f32 %v4759_v58  ;;  %v4760_v34 = vmul.f32 -1.442695, %v3916_v4 }
 0x95f   :  { %5605 = vpow2.f32 %v4761_v52  ;;  %v4762_v25 = vmul.f32 -1.442695, %v3917_v11  ;;  %v4764_v63 = vmul.f32 -1.442695, %v3919_v3 }
 0x960   :  { %5607 = vpow2.f32 %v4760_v34 }
 0x961   :  { %5609 = vpow2.f32 %v4762_v25 }
 0x962   :  { %5611 = vtanh.f32 %v3914_v18 }
 0x963   :  { %5613 = vpow2.f32 %v4763_v24 }
 0x964   :  { %5615 = vpow2.f32 %v4764_v63  ;;  %v8975_v63 = vld [vmem:[#allocation72_spill] sm:$0xff] }
 0x968   :  { %v5604_v15 = vpop.eup %5603 }
 0x969   :  { %v5606_v31 = vpop.eup %5605  ;;  %v3926_v16 = vadd.f32 1.0, %v5604_v15  ;;  %v322_v15 = vadd.f32 %v8975_v63, %v8609_v57  ;;  %v328_v63 = vadd.f32 %v8978_v55, %v8610_v39 }
 0x96a   :  { %v3938_v58 = vadd.f32 1.0, %v5606_v31  ;;  %v5608_v4 = vpop.eup %5607  ;;  %v8976_v31 = vld [vmem:[#allocation73_spill] sm:$0xff] }
 0x96b   :  { %5617 = vrcp.f32 %v3926_v16  ;;  %v3927_v45 = vadd.f32 1.0, %v5608_v4  ;;  %v5610_v51 = vpop.eup %5609  ;;  %v324_v16 = vadd.f32 %v8976_v31, %v8610_v39 }
 0x96c   :  { %5619 = vrcp.f32 %v3938_v58  ;;  %v3939_v29 = vadd.f32 1.0, %v5610_v51  ;;  %v5612_v30 = vpop.eup %5611 }
 0x96d   :  { %5621 = vtanh.f32 %v3918_v33  ;;  %v5614_v52 = vpop.eup %5613 }
 0x96e   :  { %5623 = vrcp.f32 %v3927_v45  ;;  %v5616_v11 = vpop.eup %5615  ;;  %v3952_v3 = vadd.f32 1.0, %v5614_v52 }
 0x96f   :  { %5625 = vrcp.f32 %v3939_v29  ;;  %v3953_v4 = vadd.f32 1.0, %v5616_v11 }
 0x970   :  { %5627 = vrcp.f32 %v3952_v3 }
 0x975   :  { %v5618_v34 = vpop.eup %5617 }
 0x976   :  { %v5620_v25 = vpop.eup %5619  ;;  %v3960_v56 = vmul.f32 %v5618_v34, %v5612_v30  ;;  %v8977_v30 = vld [vmem:[#allocation74_spill] sm:$0xff] }
 0x977   :  { %v5622_v18 = vpop.eup %5621  ;;  %v3958_v59 = vmul.f32 %v5620_v25, %v7862_v21  ;;  %v326_v52 = vadd.f32 %v8977_v30, %v8609_v57 }
 0x978   :  { %v5624_v24 = vpop.eup %5623 }
 0x979   :  { %v8015_v33 = vadd.f32 %v3960_v56, %v3958_v59  ;;  %v3961_v58 = vmul.f32 %v5624_v24, %v5622_v18  ;;  %v4043_v45 = vpop.f32.mrb[56].mxu0  ;;  %v4086_v51 = vpop.f32.mrb[36].mxu1 }
 0x97a   :  { %v5626_v29 = vpop.eup %5625  ;;  %v4095_v34 = vadd.f32 %v4043_v45, %v322_v15  ;;  %v4045_v21 = vpop.f32.mrb[57].mxu0  ;;  %v4885_v45 = vadd.f32 %v4086_v51, %v8611_v2 }
 0x97b   :  { %v4088_v25 = vpop.f32.mrb[37].mxu1  ;;  %v3959_v20 = vmul.f32 %v5626_v29, %v7870_v46  ;;  %v4096_v31 = vadd.f32 %v4045_v21, %v324_v16  ;;  %v4047_v56 = vpop.f32.mrb[58].mxu0  ;;  %5629 = vtanh.f32 %v8015_v33 }
 0x97c   :  { %v4090_v59 = vpop.f32.mrb[38].mxu1  ;;  %v4765_v11 = vmul.f32 -1.442695, %v4095_v34  ;;  %v4099_v18 = vadd.f32 %v4047_v56, %v326_v52  ;;  %v4049_v24 = vpop.f32.mrb[59].mxu0  ;;  %5631 = vrcp.f32 %v3953_v4  ;;  %v4886_v46 = vadd.f32 %v4088_v25, %v6629_v62 }
 0x97d   :  { %v4092_v37 = vpop.f32.mrb[39].mxu1  ;;  %v8023_v26 = vadd.f32 %v3961_v58, %v3959_v20  ;;  %v4767_v57 = vmul.f32 -1.442695, %v4096_v31  ;;  %v4100_v3 = vadd.f32 %v4049_v24, %v328_v63  ;;  %v5628_v55 = vpop.eup %5627  ;;  %v4887_v52 = vadd.f32 %v4090_v59, %v8611_v2 }
 0x97e   :  { %5633 = vpow2.f32 %v4765_v11  ;;  %v4766_v15 = vmul.f32 -1.442695, %v4099_v18  ;;  %v4769_v29 = vmul.f32 -1.442695, %v4886_v46  ;;  %v4888_v20 = vadd.f32 %v4092_v37, %v6629_v62 }
 0x97f   :  { %5635 = vtanh.f32 %v8023_v26  ;;  %v4768_v39 = vmul.f32 -1.442695, %v4100_v3 }
 0x980   :  { %5637 = vpow2.f32 %v4767_v57  ;;  %v4770_v31 = vmul.f32 -1.442695, %v4888_v20  ;;  %v8982_v20 = vld [vmem:[#allocation19_spill] sm:$0xff] }
 0x981   :  { %5639 = vpow2.f32 %v4766_v15 }
 0x982   :  { %5641 = vpow2.f32 %v4768_v39 }
 0x983   :  { %5643 = vtanh.f32 %v4885_v45  ;;  %v8981_v45 = vld [vmem:[#allocation18_spill] sm:$0xff] }
 0x984   :  { %5645 = vpow2.f32 %v4769_v29 }
 0x985   :  { %v5630_v16 = vpop.eup %5629 }
 0x986   :  { %v8029_v58 = vmul.f32 %v5630_v16, %v5628_v55  ;;  %v5632_v4 = vpop.eup %5631 }
 0x988   :  { %v5634_v30 = vpop.eup %5633  ;;  %v3968_v34 = vmul.f32 %v7882_v50, %v8029_v58 }
 0x989   :  { %v5636_v21 = vpop.eup %5635  ;;  %v4109_v25 = vadd.f32 1.0, %v5634_v30 }
 0x98a   :  { %v5638_v63 = vpop.eup %5637  ;;  %3970 = vadd.xlane.f32.xlu0 %v3968_v34  ;;  %v8034_v51 = vmul.f32 %v5636_v21, %v5632_v4 }
 0x98b   :  { %5647 = vrcp.f32 %v4109_v25  ;;  %v4121_v62 = vadd.f32 1.0, %v5638_v63  ;;  %v5640_v37 = vpop.eup %5639 }
 0x98c   :  { %5649 = vtanh.f32 %v4887_v52  ;;  %v4152_v56 = vpack.c.bf16 %v8034_v51, %v8029_v58  ;;  %v3969_v2 = vmul.f32 %v7882_v50, %v8034_v51  ;;  %v4110_v59 = vadd.f32 1.0, %v5640_v37  ;;  %v5642_v11 = vpop.eup %5641 }
 0x98d   :  { %5651 = vrcp.f32 %v4121_v62  ;;  %v4122_v18 = vadd.f32 1.0, %v5642_v11  ;;  %v5644_v24 = vpop.eup %5643 }
 0x98e   :  { %5653 = vpow2.f32 %v4770_v31  ;;  %4186 = vmatmul.mubr.bf16.vlgmr.msra.gmra.mrb[60].mxu0 %v4152_v56  ;;  %4229 = vmatmul.mubr.bf16.vlgmr.msra.gmra.mrb[68].mxu1 %v4152_v56  ;;  %v5646_v57 = vpop.eup %5645 }
 0x98f   :  { %5655 = vrcp.f32 %v4110_v59  ;;  %4240 = vmatpush1.bf16.msra.mxu0 %v7623_v38  ;;  %4283 = vmatpush1.bf16.msra.mxu1 %v7626_v42  ;;  %v4135_v15 = vadd.f32 1.0, %v5646_v57 }
 0x990   :  { %3972 = vadd.xlane.f32.xlu1 %v3969_v2  ;;  %4241 = vmatprep.subr.bf16.mxu0 %v7629_v44  ;;  %5657 = vrcp.f32 %v4122_v18 }
 0x991   :  { %4284 = vmatprep.subr.bf16.mxu1 %v7632_v60  ;;  %4271 = vmatprep.mubr.bf16.mxu0 %v8539_v5  ;;  %5659 = vrcp.f32 %v4135_v15 }
 0x992   :  { %4314 = vmatprep.mubr.bf16.mxu1 %v8539_v5 }
 0x993   :  { %4242 = vmatpush1.bf16.msra.mxu0 %v7637_v22  ;;  %4285 = vmatpush1.bf16.msra.mxu1 %v8906_v53 }
 0x994   :  { %4243 = vmatprep.subr.bf16.mxu0 %v8907_v9  ;;  %4286 = vmatprep.subr.bf16.mxu1 %v8908_v61 }
 0x995   :  { %v5648_v38 = vpop.eup %5647 }
 0x996   :  { %v5650_v42 = vpop.eup %5649  ;;  %v4143_v44 = vmul.f32 %v5648_v38, %v5644_v24 }
 0x997   :  { %v5652_v3 = vpop.eup %5651  ;;  %4244 = vmatpush1.bf16.msra.mxu0 %v8909_v10  ;;  %4287 = vmatpush1.bf16.msra.mxu1 %v7652_v54 }
 0x998   :  { %v5654_v5 = vpop.eup %5653  ;;  %v4141_v60 = vmul.f32 %v5652_v3, %v7907_v48  ;;  %4245 = vmatprep.subr.bf16.mxu0 %v8910_v8  ;;  %4288 = vmatprep.subr.bf16.mxu1 %v7659_v14 }
 0x999   :  { %v5656_v22 = vpop.eup %5655  ;;  %v4136_v39 = vadd.f32 1.0, %v5654_v5 }
 0x99a   :  { %v4145_v53 = vadd.f32 %v4143_v44, %v4141_v60  ;;  %v4144_v9 = vmul.f32 %v5656_v22, %v5650_v42  ;;  %v5658_v61 = vpop.eup %5657 }
 0x99b   :  { %4246 = vmatpush1.bf16.msra.mxu0 %v7664_v12  ;;  %4289 = vmatpush1.bf16.msra.mxu1 %v7667_v13  ;;  %v4142_v54 = vmul.f32 %v5658_v61, %v7915_v47  ;;  %v5660_v14 = vpop.eup %5659 }
 0x99c   :  { %5661 = vtanh.f32 %v4145_v53  ;;  %4247 = vmatprep.subr.bf16.mxu0 %v7671_v28  ;;  %4290 = vmatprep.subr.bf16.mxu1 %v7674_v32 }
 0x99d   :  { %v4146_v10 = vadd.f32 %v4144_v9, %v4142_v54  ;;  %5663 = vrcp.f32 %v4136_v39 }
 0x99f   :  { %4248 = vmatpush1.bf16.msra.mxu0 %v8911_v1  ;;  %4291 = vmatpush1.bf16.msra.mxu1 %v8912_v27  ;;  %5665 = vtanh.f32 %v4146_v10  ;;  %v8979_v27 = vld [vmem:[#allocation16_spill] sm:$0xff] }
 0x9a0   :  { %4249 = vmatprep.subr.bf16.mxu0 %v8913_v7  ;;  %4292 = vmatprep.subr.bf16.mxu1 %v8914_v40 }
 0x9a3   :  { %4250 = vmatpush1.bf16.msra.mxu0 %v8915_v17  ;;  %4293 = vmatpush1.bf16.msra.mxu1 %v8916_v35  ;;  %v8980_v35 = vld [vmem:[#allocation17_spill] sm:$0xff] }
 0x9a4   :  { %4251 = vmatprep.subr.bf16.mxu0 %v8917_v0  ;;  %4294 = vmatprep.subr.bf16.mxu1 %v8918_v41 }
 0x9a6   :  { %v5662_v12 = vpop.eup %5661 }
 0x9a7   :  { %4252 = vmatpush1.bf16.msra.mxu0 %v8919_v23  ;;  %4295 = vmatpush1.bf16.msra.mxu1 %v8920_v36  ;;  %v4149_v28 = vmul.f32 %v5662_v12, %v5660_v14  ;;  %v5664_v13 = vpop.eup %5663 }
 0x9a8   :  { %4253 = vmatprep.subr.bf16.mxu0 %v8921_v43  ;;  %4296 = vmatprep.subr.bf16.mxu1 %v7714_v49 }
 0x9a9   :  { %v5666_v32 = vpop.eup %5665 }
 0x9aa   :  { %v4150_v8 = vmul.f32 %v5666_v32, %v5664_v13 }
 0x9ab   :  { %4254 = vmatpush1.bf16.msra.mxu0 %v7717_v19  ;;  %4297 = vmatpush1.bf16.msra.mxu1 %v7720_v6 }
 0x9ac   :  { %v4151_v48 = vpack.c.bf16 %v4150_v8, %v4149_v28  ;;  %v6086_v8 = vmov 0.0  }
 0x9ad   :  { %4795 = vmatprep.subr.bf16.mxu0 %v6086_v8 }
 0x9ae   :  { %4272 = vmatmul.mubr.bf16.vlgmr.msra.gmra.mrb[60].mxu0 %v4151_v48  ;;  %4315 = vmatmul.mubr.bf16.vlgmr.msra.gmra.mrb[68].mxu1 %v4151_v48  ;;  %v5180_v48 = vld [vmem:[%s8191_s8 + $0x8] sm:$0xff]  }
 0x9af   :  { %4811 = vmatprep.mubr.msk.bf16.mxu0 %vm6087_vm1, %v6086_v8 }
 0xa81   :  { %v4273_v47 = vpop.f32.mrb[60].mxu0  ;;  %v4316_v1 = vpop.f32.mrb[68].mxu1 }
 0xa82   :  { %v4325_v7 = vadd.f32 %v4273_v47, %v8979_v27  ;;  %v4275_v40 = vpop.f32.mrb[61].mxu0  ;;  %v4318_v17 = vpop.f32.mrb[69].mxu1  ;;  %v4327_v4 = vadd.f32 %v4316_v1, %v8982_v20  ;;  %v5181_v47 = vld [vmem:[%s8191_s8 + $0x10] sm:$0xff]   ;;  %v5183_v1 = vld [vmem:[%s8191_s8 + $0x20] sm:$0xff]  }
 0xa83   :  { %v4326_v0 = vadd.f32 %v4275_v40, %v8980_v35  ;;  %v4277_v41 = vpop.f32.mrb[62].mxu0  ;;  %v4320_v49 = vpop.f32.mrb[70].mxu1  ;;  %v4328_v29 = vadd.f32 %v4318_v17, %v8981_v45  ;;  %v5186_v40 = vld [vmem:[%s8191_s8 + $0x38] sm:$0xff]  }
 0xa84   :  { %v4771_v23 = vmul.f32 -1.442695, %v4325_v7  ;;  %v4329_v36 = vadd.f32 %v4277_v41, %v8979_v27  ;;  %v4279_v19 = vpop.f32.mrb[63].mxu0  ;;  %v4322_v43 = vpop.f32.mrb[71].mxu1  ;;  %v4331_v34 = vadd.f32 %v4320_v49, %v8982_v20  ;;  %v5184_v27 = vld [vmem:[%s8191_s8 + $0x28] sm:$0xff]   ;;  %v5185_v7 = vld [vmem:[%s8191_s8 + $0x30] sm:$0xff]  }
 0xa85   :  { %v4773_v6 = vmul.f32 -1.442695, %v4326_v0  ;;  %v4330_v46 = vadd.f32 %v4279_v19, %v8980_v35  ;;  %v4775_v30 = vmul.f32 -1.442695, %v4328_v29  ;;  %v4332_v52 = vadd.f32 %v4322_v43, %v8981_v45  ;;  %v1497_v17 = vpop.xlane.xlu0 %1496  ;;  %v1906_v35 = vpop.xlane.xlu1 %1905 }
 0xa86   :  { %5667 = vpow2.f32 %v4771_v23  ;;  %v4772_v55 = vmul.f32 -1.442695, %v4329_v36  ;;  %v1500_v0 = vsub.f32 -inf, %v1497_v17  ;;  %v1909_v49 = vmax.f32 %v1497_v17, %v1906_v35 }
 0xa87   :  { %5669 = vpow2.f32 %v4773_v6  ;;  %v4774_v16 = vmul.f32 -1.442695, %v4330_v46  ;;  %v4776_v31 = vmul.f32 -1.442695, %v4332_v52  ;;  %v1506_v43 = vsub.f32 %v1497_v17, %v1497_v17 }
 0xa88   :  { %5671 = vpow2.f32 %v4772_v55  ;;  %v1502_v36 = vmul.f32 1.442695, %v1500_v0  ;;  %v1911_v46 = vsub.f32 %v1497_v17, %v1909_v49 }
 0xa89   :  { %5673 = vpow2.f32 %v4774_v16  ;;  %v1499_v41 = vpop.xlane.xlu0 %1498  ;;  %v1908_v23 = vpop.xlane.xlu1 %1907  ;;  %v1508_v29 = vmul.f32 1.442695, %v1506_v43 }
 0xa8a   :  { %5675 = vtanh.f32 %v4327_v4  ;;  %v1501_v19 = vsub.f32 -inf, %v1499_v41  ;;  %v1910_v55 = vmax.f32 %v1499_v41, %v1908_v23  ;;  %v1507_v20 = vsub.f32 %v1499_v41, %v1499_v41 }
 0xa8b   :  { %5677 = vpow2.f32 %v4775_v30  ;;  %v1913_v30 = vmul.f32 1.442695, %v1911_v46 }
 0xa8c   :  { %5679 = vtanh.f32 %v4331_v34  ;;  %v1504_v16 = vmul.f32 1.442695, %v1501_v19  ;;  %v1912_v52 = vsub.f32 %v1499_v41, %v1910_v55  ;;  %v1917_v34 = vsub.f32 %v1906_v35, %v1909_v49 }
 0xa8d   :  { %v2319_v6 = vpop.xlane.xlu0 %2318  ;;  %v2321_v4 = vpop.xlane.xlu1 %2320 }
 0xa8e   :  { %v2322_v45 = vmax.f32 %v1909_v49, %v2319_v6 }
 0xa90   :  { %v5668_v21 = vpop.eup %5667 }
 0xa91   :  { %v5670_v25 = vpop.eup %5669  ;;  %v4339_v63 = vadd.f32 1.0, %v5668_v21  ;;  %v2732_v21 = vpop.xlane.xlu0 %2731 }
 0xa92   :  { %v4351_v62 = vadd.f32 1.0, %v5670_v25  ;;  %v5672_v37 = vpop.eup %5671  ;;  %v2324_v25 = vsub.f32 %v1909_v49, %v2322_v45 }
 0xa93   :  { %5681 = vrcp.f32 %v4339_v63  ;;  %v4340_v56 = vadd.f32 1.0, %v5672_v37  ;;  %v5674_v2 = vpop.eup %5673  ;;  %v2323_v63 = vmax.f32 %v1910_v55, %v2321_v4  ;;  %v2735_v37 = vmax.f32 %v2322_v45, %v2732_v21 }
 0xa94   :  { %5683 = vrcp.f32 %v4351_v62  ;;  %v4352_v59 = vadd.f32 1.0, %v5674_v2  ;;  %v5676_v11 = vpop.eup %5675  ;;  %v1915_v62 = vmul.f32 1.442695, %v1912_v52  ;;  %v1918_v2 = vsub.f32 %v1908_v23, %v1910_v55 }
 0xa95   :  { %5685 = vpow2.f32 %v4776_v31  ;;  %v5678_v18 = vpop.eup %5677  ;;  %v1510_v31 = vmul.f32 1.442695, %v1507_v20 }
 0xa96   :  { %5687 = vrcp.f32 %v4340_v56  ;;  %v5680_v24 = vpop.eup %5679  ;;  %v4365_v44 = vadd.f32 1.0, %v5678_v18  ;;  %v1919_v56 = vmul.f32 1.442695, %v1917_v34  ;;  %v2325_v18 = vsub.f32 %v1910_v55, %v2323_v63 }
 0xa97   :  { %5689 = vrcp.f32 %v4352_v59  ;;  %v2734_v59 = vpop.xlane.xlu1 %2733 }
 0xa98   :  { %5691 = vrcp.f32 %v4365_v44  ;;  %v2736_v44 = vmax.f32 %v2323_v63, %v2734_v59 }
 0xa9a   :  { %v2744_v17 = vsub.f32 %v2734_v59, %v2736_v44 }
 0xa9c   :  { %v2747_v52 = vmul.f32 1.442695, %v2744_v17 }
 0xa9d   :  { %v5682_v57 = vpop.eup %5681 }
 0xa9e   :  { %v5684_v38 = vpop.eup %5683  ;;  %v4373_v42 = vmul.f32 %v5682_v57, %v5676_v11  ;;  %v2326_v11 = vmul.f32 1.442695, %v2324_v25  ;;  %v3145_v57 = vpop.xlane.xlu0 %3144 }
 0xa9f   :  { %v5686_v3 = vpop.eup %5685  ;;  %v4371_v15 = vmul.f32 %v5684_v38, %v8015_v33 }
 0xaa0   :  { %v5688_v5 = vpop.eup %5687  ;;  %v4366_v9 = vadd.f32 1.0, %v5686_v3  ;;  %v1921_v3 = vmul.f32 1.442695, %v1918_v2 }
 0xaa1   :  { %v4374_v60 = vmul.f32 %v5688_v5, %v5680_v24  ;;  %v4375_v22 = vadd.f32 %v4373_v42, %v4371_v15  ;;  %v5690_v53 = vpop.eup %5689  ;;  %v2330_v24 = vsub.f32 %v2319_v6, %v2322_v45  ;;  %v2737_v42 = vsub.f32 %v2322_v45, %v2735_v37 }
 0xaa2   :  { %v4372_v61 = vmul.f32 %v5690_v53, %v8023_v26  ;;  %v5692_v54 = vpop.eup %5691  ;;  %v5179_v26 = vld [vmem:[%s8191_s8] sm:$0xff]   ;;  %v2328_v15 = vmul.f32 1.442695, %v2325_v18  ;;  %v3148_v5 = vmax.f32 %v2735_v37, %v3145_v57  ;;  %v2331_v53 = vsub.f32 %v2321_v4, %v2323_v63 }
 0xaa3   :  { %5693 = vtanh.f32 %v4375_v22  ;;  %4796 = vmatpush3.bf16.msra.mxu0 %v5179_v26  ;;  %v2332_v22 = vmul.f32 1.442695, %v2330_v24 }
 0xaa4   :  { %v4376_v39 = vadd.f32 %v4374_v60, %v4372_v61  ;;  %5695 = vrcp.f32 %v4366_v9  ;;  %4797 = vmatprep.subr.bf16.mxu0 %v6086_v8  ;;  %v8116_v9 = vpop.xlane.xlu1 %3146  ;;  %v3156_v6 = vsub.f32 %v3145_v57, %v3148_v5 }
 0xaa5   :  { %v3149_v26 = vmax.f32 %v2736_v44, %v8116_v9 }
 0xaa6   :  { %5697 = vtanh.f32 %v4376_v39  ;;  %v2739_v39 = vmul.f32 1.442695, %v2737_v42 }
 0xaa7   :  { %4798 = vmatpush3.bf16.msra.mxu0 %v5180_v48  ;;  %5699 = vpow2.f32 %v1502_v36  ;;  %v3151_v49 = vsub.f32 %v2736_v44, %v3149_v26  ;;  %v8983_v36 = vld [vmem:[#allocation20_spill] sm:$0xff] }
 0xaa8   :  { %4799 = vmatprep.subr.bf16.mxu0 %v6086_v8  ;;  %5701 = vpow2.f32 %v1504_v16  ;;  %v8122_v35 = vpop.xlane.xlu1 %3559  ;;  %v8984_v16 = vld [vmem:[#allocation21_spill] sm:$0xff] }
 0xaa9   :  { %5703 = vpow2.f32 %v1508_v29  ;;  %v3562_v20 = vmax.f32 %v3149_v26, %v8122_v35  ;;  %v3154_v34 = vmul.f32 1.442695, %v3151_v49 }
 0xaaa   :  { %5705 = vpow2.f32 %v1913_v30 }
 0xaab   :  { %4800 = vmatpush3.bf16.msra.mxu0 %v5181_v47  ;;  %5707 = vpow2.f32 %v1510_v31  ;;  %v2334_v47 = vmul.f32 1.442695, %v2331_v53  ;;  %v3564_v18 = vsub.f32 %v3149_v26, %v3562_v20 }
 0xaac   :  { %4801 = vmatprep.subr.bf16.mxu0 %v6086_v8  ;;  %5709 = vpow2.f32 %v1915_v62  ;;  %v3158_v62 = vmul.f32 1.442695, %v3156_v6  ;;  %v8988_v6 = vld [vmem:[#allocation97_spill] sm:$0xff] }
 0xaad   :  { %v5694_v10 = vpop.eup %5693  ;;  %5711 = vpow2.f32 %v1919_v56  ;;  %v8133_v56 = vpop.xlane.xlu1 %3972 }
 0xaae   :  { %v8084_v14 = vmul.f32 %v5694_v10, %v5692_v54  ;;  %v5696_v12 = vpop.eup %5695  ;;  %5713 = vpow2.f32 %v2326_v11  ;;  %v2738_v54 = vsub.f32 %v2323_v63, %v2736_v44 }
 0xaaf   :  { %5715 = vpow2.f32 %v1921_v3  ;;  %v8985_v3 = vld [vmem:[#allocation47_spill] sm:$0xff] }
 0xab0   :  { %v4381_v33 = vmul.f32 %v7882_v50, %v8084_v14  ;;  %v5698_v28 = vpop.eup %5697  ;;  %5717 = vpow2.f32 %v2328_v15 }
 0xab1   :  { %v8088_v13 = vmul.f32 %v5698_v28, %v5696_v12  ;;  %v5700_v38 = vpop.eup %5699  ;;  %v2743_v12 = vsub.f32 %v2732_v21, %v2735_v37  ;;  %5719 = vpow2.f32 %v2332_v22 }
 0xab2   :  { %4383 = vadd.xlane.f32.xlu0 %v4381_v33  ;;  %v1512_v60 = vmul.f32 0.0, %v5700_v38  ;;  %v5702_v61 = vpop.eup %5701  ;;  %v8118_v33 = vpop.xlane.xlu0 %3557  ;;  %5721 = vpow2.f32 %v2739_v39  ;;  %v8986_v39 = vld [vmem:[#allocation48_spill] sm:$0xff] }
 0xab3   :  { %v4382_v32 = vmul.f32 %v7882_v50, %v8088_v13  ;;  %v5182_v50 = vld [vmem:[%s8191_s8 + $0x18] sm:$0xff]   ;;  %v5704_v10 = vpop.eup %5703  ;;  %v1513_v48 = vmul.f32 0.0, %v5702_v61  ;;  %5723 = vpow2.f32 %v2334_v47 }
 0xab4   :  { %4802 = vmatpush3.bf16.msra.mxu0 %v5182_v50  ;;  %v5706_v28 = vpop.eup %5705  ;;  %v2741_v50 = vmul.f32 1.442695, %v2738_v54  ;;  %v1516_v19 = vmul.f32 %v5704_v10, %v8983_v36 }
 0xab5   :  { %4385 = vadd.xlane.f32.xlu1 %v4382_v32  ;;  %4803 = vmatprep.subr.bf16.mxu0 %v6086_v8  ;;  %v3150_v32 = vsub.f32 %v2735_v37, %v3148_v5  ;;  %v3157_v37 = vsub.f32 %v8116_v9, %v3149_v26 }
 0xab6   :  { %v8125_v46 = vpop.xlane.xlu0 %3970  ;;  %5725 = vpow2.f32 %v2741_v50  ;;  %v1518_v63 = vadd.f32 %v1516_v19, %v1512_v60 }
 0xab7   :  { %v3152_v41 = vmul.f32 1.442695, %v3150_v32  ;;  %v3160_v9 = vmul.f32 1.442695, %v3157_v37  ;;  %v3570_v32 = vsub.f32 %v8122_v35, %v3562_v20  ;;  %v8987_v35 = vld [vmem:[#allocation96_spill] sm:$0xff] }
 0xab8   :  { %4804 = vmatpush3.bf16.msra.mxu0 %v5183_v1  ;;  %v3561_v1 = vmax.f32 %v3148_v5, %v8118_v33  ;;  %v1927_v57 = vmul.f32 %v5706_v28, %v1518_v63 }
 0xab9   :  { %4805 = vmatprep.subr.bf16.mxu0 %v6086_v8 }
 0xaba   :  { %v3563_v29 = vsub.f32 %v3148_v5, %v3561_v1  ;;  %v8130_v21 = vmax.f32 %v3561_v1, %v8125_v46  ;;  %v3569_v42 = vsub.f32 %v8118_v33, %v3561_v1 }
 0xabc   :  { %4806 = vmatpush3.bf16.msra.mxu0 %v5184_v27  ;;  %v5708_v27 = vpop.eup %5707  ;;  %v3565_v11 = vmul.f32 1.442695, %v3563_v29  ;;  %v3976_v5 = vsub.f32 %v3561_v1, %v8130_v21 }
 0xabd   :  { %4807 = vmatprep.subr.bf16.mxu0 %v6086_v8  ;;  %v5710_v0 = vpop.eup %5709  ;;  %v1515_v43 = vadd.f32 %v5708_v27, %v1513_v48  ;;  %v1517_v45 = vmul.f32 %v5708_v27, %v8984_v16 }
 0xabe   :  { %v5712_v23 = vpop.eup %5711 }
 0xabf   :  { %v5714_v55 = vpop.eup %5713  ;;  %v1924_v30 = vmul.f32 %v5710_v0, %v1515_v43  ;;  %v1519_v59 = vadd.f32 %v1517_v45, %v1513_v48  ;;  %v1929_v15 = vmul.f32 %v5712_v23, %v8985_v3 }
 0xac0   :  { %4808 = vmatpush3.bf16.msra.mxu0 %v5185_v7  ;;  %v5716_v25 = vpop.eup %5715 }
 0xac1   :  { %4809 = vmatprep.subr.bf16.mxu0 %v6086_v8  ;;  %v1514_v8 = vadd.f32 %v5704_v10, %v1512_v60  ;;  %v5718_v2 = vpop.eup %5717  ;;  %v1926_v38 = vadd.f32 %v5716_v25, %v1924_v30  ;;  %v8141_v60 = vmax.f32 %v3562_v20, %v8133_v56  ;;  %v1928_v61 = vmul.f32 %v5710_v0, %v1519_v59 }
 0xac2   :  { %v5720_v24 = vpop.eup %5719  ;;  %v1930_v54 = vmul.f32 %v5716_v25, %v8986_v39  ;;  %v3567_v10 = vmul.f32 1.442695, %v3564_v18  ;;  %v1931_v27 = vadd.f32 %v1929_v15, %v1927_v57 }
 0xac3   :  { %v1923_v7 = vmul.f32 %v5706_v28, %v1514_v8  ;;  %v8136_v44 = vpop.eup %5721  ;;  %v2337_v53 = vmul.f32 %v5718_v2, %v1926_v38  ;;  %v3571_v28 = vmul.f32 1.442695, %v3569_v42  ;;  %v3978_v8 = vmul.f32 1.442695, %v3976_v5  ;;  %v8989_v42 = vld [vmem:[#allocation49_spill] sm:$0xff] }
 0xac4   :  { %4810 = vmatpush3.bf16.msra.mxu0 %v5186_v40  ;;  %v2745_v40 = vmul.f32 1.442695, %v2743_v12  ;;  %v5724_v12 = vpop.eup %5723  ;;  %v3977_v48 = vsub.f32 %v3562_v20, %v8141_v60  ;;  %v2340_v49 = vmul.f32 %v5714_v55, %v1931_v27  ;;  %v3983_v29 = vsub.f32 %v8133_v56, %v8141_v60  ;;  %v8991_v27 = vld [vmem:[#allocation37_spill] sm:$0xff] }
 0xac5   :  { %v1925_v4 = vadd.f32 %v5712_v23, %v1923_v7  ;;  %v5726_v26 = vpop.eup %5725  ;;  %v2339_v50 = vadd.f32 %v5724_v12, %v2337_v53  ;;  %v1932_v7 = vadd.f32 %v1930_v54, %v1928_v61  ;;  %v2342_v23 = vmul.f32 %v5720_v24, %v8987_v35 }
 0xac6   :  { %5727 = vpow2.f32 %v2745_v40  ;;  %v3982_v40 = vsub.f32 %v8125_v46, %v8130_v21  ;;  %v3980_v36 = vmul.f32 1.442695, %v3977_v48  ;;  %v2343_v16 = vmul.f32 %v5724_v12, %v8988_v6 }
 0xac7   :  { %5729 = vpow2.f32 %v3152_v41  ;;  %v2336_v31 = vmul.f32 %v5714_v55, %v1925_v4  ;;  %v2750_v0 = vmul.f32 %v5726_v26, %v2339_v50  ;;  %v3573_v41 = vmul.f32 1.442695, %v3570_v32 }
 0xac8   :  { %5731 = vpow2.f32 %v2747_v52  ;;  %v2341_v43 = vmul.f32 %v5718_v2, %v1932_v7  ;;  %v3984_v46 = vmul.f32 1.442695, %v3982_v40  ;;  %v2344_v25 = vadd.f32 %v2342_v23, %v2340_v49  ;;  %v8992_v40 = vld [vmem:[#allocation76_spill] sm:$0xff] }
 0xac9   :  { %5733 = vpow2.f32 %v3154_v34  ;;  %v2338_v22 = vadd.f32 %v5720_v24, %v2336_v31  ;;  %v3986_v59 = vmul.f32 1.442695, %v3983_v29 }
 0xaca   :  { %5735 = vpow2.f32 %v3158_v62  ;;  %v2345_v62 = vadd.f32 %v2343_v16, %v2341_v43  ;;  %v2753_v38 = vmul.f32 %v8136_v44, %v2344_v25 }
 0xacb   :  { %5737 = vpow2.f32 %v3565_v11  ;;  %v2749_v33 = vmul.f32 %v8136_v44, %v2338_v22 }
 0xacc   :  { %5739 = vpow2.f32 %v3160_v9  ;;  %v2754_v15 = vmul.f32 %v5726_v26, %v2345_v62 }
 0xacd   :  { %5741 = vpow2.f32 %v3567_v10 }
 0xace   :  { %5743 = vpow2.f32 %v3571_v28 }
 0xacf   :  { %5745 = vpow2.f32 %v3978_v8 }
 0xad0   :  { %v5728_v47 = vpop.eup %5727  ;;  %5747 = vpow2.f32 %v3573_v41 }
 0xad1   :  { %v5730_v1 = vpop.eup %5729  ;;  %v2751_v17 = vadd.f32 %v5728_v47, %v2749_v33  ;;  %5749 = vpow2.f32 %v3980_v36  ;;  %v2755_v3 = vmul.f32 %v5728_v47, %v8989_v42 }
 0xad2   :  { %v5732_v19 = vpop.eup %5731  ;;  %5751 = vpow2.f32 %v3984_v46  ;;  %v8994_v46 = vld [vmem:[#allocation69_spill] sm:$0xff] }
 0xad3   :  { %v3162_v45 = vmul.f32 %v5730_v1, %v2751_v17  ;;  %v5734_v4 = vpop.eup %5733  ;;  %v2752_v34 = vadd.f32 %v5732_v19, %v2750_v0  ;;  %v2757_v28 = vadd.f32 %v2755_v3, %v2753_v38 }
 0xad4   :  { %v5736_v52 = vpop.eup %5735 }
 0xad5   :  { %v5738_v55 = vpop.eup %5737  ;;  %v3164_v37 = vadd.f32 %v5736_v52, %v3162_v45  ;;  %v3163_v2 = vmul.f32 %v5734_v4, %v2752_v34  ;;  %v3166_v48 = vmul.f32 %v5730_v1, %v2757_v28  ;;  %v3168_v7 = vmul.f32 %v5736_v52, %v8991_v27  ;;  %v8993_v1 = vld [vmem:[#allocation68_spill] sm:$0xff] }
 0xad6   :  { %v5740_v57 = vpop.eup %5739 }
 0xad7   :  { %v3575_v5 = vmul.f32 %v5738_v55, %v3164_v37  ;;  %v5742_v22 = vpop.eup %5741  ;;  %v3165_v54 = vadd.f32 %v5740_v57, %v3163_v2  ;;  %v3169_v17 = vmul.f32 %v5740_v57, %v8992_v40  ;;  %v3170_v36 = vadd.f32 %v3168_v7, %v3166_v48 }
 0xad8   :  { %v5744_v39 = vpop.eup %5743 }
 0xad9   :  { %v5746_v10 = vpop.eup %5745  ;;  %v3577_v44 = vadd.f32 %v5744_v39, %v3575_v5  ;;  %v3576_v32 = vmul.f32 %v5742_v22, %v3165_v54  ;;  %v3579_v45 = vmul.f32 %v5738_v55, %v3170_v36  ;;  %v3581_v29 = vmul.f32 %v5744_v39, %v8993_v1 }
 0xada   :  { %v5748_v26 = vpop.eup %5747 }
 0xadb   :  { %v3988_v47 = vmul.f32 %v5746_v10, %v3577_v44  ;;  %v5750_v50 = vpop.eup %5749  ;;  %v3578_v0 = vadd.f32 %v5748_v26, %v3576_v32 }
 0xadc   :  { %v5752_v41 = vpop.eup %5751 }
 0xadd   :  { %v3990_v49 = vadd.f32 %v5752_v41, %v3988_v47  ;;  %v3989_v35 = vmul.f32 %v5750_v50, %v3578_v0  ;;  %v3994_v2 = vmul.f32 %v5752_v41, %v8029_v58 }
 0xb3f   :  { %v4384_v20 = vpop.xlane.xlu0 %4383 }
 0xb40   :  { %v4387_v30 = vmax.f32 %v8130_v21, %v4384_v20 }
 0xb42   :  { %v4389_v63 = vsub.f32 %v8130_v21, %v4387_v30  ;;  %v4395_v31 = vsub.f32 %v4384_v20, %v4387_v30  ;;  %v4386_v11 = vpop.xlane.xlu1 %4385  ;;  %v8990_v21 = vld [vmem:[#allocation50_spill] sm:$0xff]  ;;  %v3582_v30 = vmul.f32 %v5748_v26, %v8994_v46 }
 0xb43   :  { %v4388_v24 = vmax.f32 %v8141_v60, %v4386_v11  ;;  %v2756_v53 = vmul.f32 %v5732_v19, %v8990_v21 }
 0xb44   :  { %v4391_v56 = vmul.f32 1.442695, %v4389_v63  ;;  %v4397_v18 = vmul.f32 1.442695, %v4395_v31  ;;  %v3583_v31 = vadd.f32 %v3581_v29, %v3579_v45 }
 0xb45   :  { %v4390_v9 = vsub.f32 %v8141_v60, %v4388_v24  ;;  %v4396_v61 = vsub.f32 %v4386_v11, %v4388_v24  ;;  %v2758_v8 = vadd.f32 %v2756_v53, %v2754_v15 }
 0xb46   :  { %5753 = vpow2.f32 %v4391_v56  ;;  %v3992_v11 = vmul.f32 %v5746_v10, %v3583_v31 }
 0xb47   :  { %5755 = vpow2.f32 %v3986_v59  ;;  %v4393_v12 = vmul.f32 1.442695, %v4390_v9  ;;  %v4399_v33 = vmul.f32 1.442695, %v4396_v61  ;;  %v3167_v60 = vmul.f32 %v5734_v4, %v2758_v8 }
 0xb48   :  { %5757 = vpow2.f32 %v4397_v18  ;;  %v3996_v56 = vadd.f32 %v3994_v2, %v3992_v11 }
 0xb49   :  { %5759 = vpow2.f32 %v4393_v12  ;;  %v3171_v19 = vadd.f32 %v3169_v17, %v3167_v60 }
 0xb4a   :  { %5761 = vpow2.f32 %v4399_v33 }
 0xb4b   :  { %v3580_v20 = vmul.f32 %v5742_v22, %v3171_v19 }
 0xb4d   :  { %v3584_v62 = vadd.f32 %v3582_v30, %v3580_v20 }
 0xb4f   :  { %v3993_v55 = vmul.f32 %v5750_v50, %v3584_v62 }
 0xb50   :  { %v5754_v23 = vpop.eup %5753 }
 0xb51   :  { %v5756_v43 = vpop.eup %5755  ;;  %v4401_v6 = vmul.f32 %v5754_v23, %v3990_v49  ;;  %v4405_v38 = vmul.f32 %v5754_v23, %v3996_v56 }
 0xb52   :  { %v5758_v16 = vpop.eup %5757  ;;  %v3991_v4 = vadd.f32 %v5756_v43, %v3989_v35  ;;  %v3995_v59 = vmul.f32 %v5756_v43, %v8034_v51  ;;  %v4777_v51 = vld [vmem:[%s8192_s9] ss:$0 sm:$0xff] }
 0xb53   :  { %v4403_v52 = vadd.f32 %v5758_v16, %v4401_v6  ;;  %v5760_v34 = vpop.eup %5759  ;;  %v4407_v24 = vmul.f32 %v5758_v16, %v8084_v14 }
 0xb54   :  { %v4402_v25 = vmul.f32 %v5760_v34, %v3991_v4  ;;  %v5762_v63 = vpop.eup %5761  ;;  %v3997_v18 = vadd.f32 %v3995_v59, %v3993_v55 }
 0xb55   :  { %5763 = vrcp.f32 %v4403_v52  ;;  %v4408_v57 = vmul.f32 %v5762_v63, %v8088_v13  ;;  %v4409_v15 = vadd.f32 %v4407_v24, %v4405_v38 }
 0xb56   :  { %v4404_v37 = vadd.f32 %v5762_v63, %v4402_v25  ;;  %v4406_v42 = vmul.f32 %v5760_v34, %v3997_v18 }
 0xb58   :  { %5765 = vrcp.f32 %v4404_v37  ;;  %v4410_v5 = vadd.f32 %v4408_v57, %v4406_v42 }
 0xb5f   :  { %v5764_v3 = vpop.eup %5763 }
 0xb60   :  { %v4413_v21 = vmul.f32 %v5764_v3, %v4409_v15 }
 0xb62   :  { %v5766_v22 = vpop.eup %5765 }
 0xb63   :  { %v4414_v53 = vmul.f32 %v5766_v22, %v4410_v5 }
 0xb65   :  { %v4415_v58 = vpack.c.bf16 %v4414_v53, %v4413_v21 }
 0xb67   :  { %4812 = vmatmul.mubr.bf16.vlgmr.msra.gmra.mrb[64].mxu0 %v4415_v58 }
 0xc3a   :  { %v4521_v9 = vpop.f32.mrb[64].mxu0 }
 0xc3b   :  { %v4522_v14 = vadd.f32 %v4777_v51, %v4521_v9  ;;  %v4813_v61 = vpop.f32.mrb[65].mxu0 }
 0xc3c   :  { %v4524_v13 = vpop.f32.mrb[66].mxu0 }
 0xc3d   :  { %4528 = vst [vmem:[#allocation11] sm:$0xff] %v4522_v14  ;;  %v4525_v39 = vadd.f32 %v4777_v51, %v4524_v13  ;;  %v4814_v54 = vpop.f32.mrb[67].mxu0 }
 0xc3f   :  { %4529 = vst [vmem:[#allocation11 + $0x8] sm:$0xff] %v4525_v39 }
 0xc40   :  { %6060 = shalt.err (!%p6057_p8)
}
 0xc41   :  { %s6061_s25 = scalar_lea.hbm %s8193_s10, 256 }
 0xc42   :  { %p6062_p9 = scmp.ne.s32.totalorder %s8193_s10, %s6061_s25  ;;  %p6065_p10 = scmp.lt.u32.totalorder %s6061_s25, %s8193_s10 }
 0xc44   :  { %p6067_p11 = pnand %p6065_p10, %p6062_p9 }
 0xc46   :  { %6070 = shalt.err (!%p6067_p11)
}
 0xc47   :  { %s6089_s24 = smov 128   ;;  %s6090_s6 = smov 8  }
 0xc48   :  { %4541 = dma.vmem_to_hbm [thread:$0]  %s4536_s21, 256, %s8193_s10, [#allocation5], %s6089_s24, %s6089_s24, %s6090_s6  }
 0xc49   :  { %6077 = dma.done.wait [#allocation5], 256  }
 0xc4a   :  { %6078 = vsyncadd [#allocation5], 4294967040 }
 0xc4b   :  { %4545 = vsyncpa [#allocation4], 1 }
 0xc4c   :  { %4546 = vsyncpa [#allocation7], 1 }
 0xc4d   :  { %4547 = vsyncpa [#allocation10], 1 }
 0xc4e   :  { %4548 = vsyncpa [#allocation5], 1 }

</bundles_post_ra>
